<compile_context>
chip_gen: v6e
topology: v6e:2x2x1
jax: 0.10.0
libtpu: 0.0.40
codegen_flags: <defaults>
</compile_context>

<pallas_src>
import functools

import jax
import jax.numpy as jnp
from jax import lax
from jax.experimental import pallas as pl
from jax.experimental.pallas import tpu as pltpu


# ----------------------------- helpers (glue) --------------------------------

def make_divisible(v, divisor=8, min_value=None):
    min_value = min_value or divisor
    new_v = max(min_value, int(v + divisor / 2) // divisor * divisor)
    if new_v < 0.9 * v:
        new_v += divisor
    return new_v


def fold_bn(w, gamma, beta, mean, var, eps=1e-5):
    """Fold BatchNorm (eval semantics) into a conv whose output channels are last."""
    scale = gamma / jnp.sqrt(var + eps)
    return w * scale, beta - mean * scale


# ------------------------------ fused Pallas kernel ---------------------------

def _edge_block_kernel(H, W, pad, x_ref, w1_ref, b1_ref, w2_ref, b2_ref,
                       o_ref, xs_ref, col_ref):
    """One image per grid step; all intermediates stay in VMEM / registers.

    x_ref  : (1, H*W, Cin)      f32  NHWC image, flattened row-major over (H, W)
    w1_ref : (9*Cin, Cmid)      bf16 BN-folded 3x3 conv as im2col matrix,
                                     row = (dy*3 + dx)*Cin + cin
    b1_ref : (1, Cmid)          f32
    w2_ref : (Cmid, Cout)       bf16 BN-folded 1x1 conv
    b2_ref : (1, Cout)          f32
    o_ref  : (1, H*W, Cout)     f32
    xs_ref : (pad + H*W + pad, Cin) bf16 scratch: input with zero halo rows
    col_ref: (H*W, 9*Cin)       bf16 scratch: im2col buffer
    """
    HW = H * W
    Cin = xs_ref.shape[1]

    # --- zero halo rows once; scratch persists across grid steps ---------------
    @pl.when(pl.program_id(0) == 0)
    def _():
        xs_ref[pl.ds(0, pad), :] = jnp.zeros((pad, Cin), xs_ref.dtype)
        xs_ref[pl.ds(pad + HW, pad), :] = jnp.zeros((pad, Cin), xs_ref.dtype)

    # --- stage input into VMEM with a single f32 -> bf16 cast ------------------
    xs_ref[pl.ds(pad, HW), :] = x_ref[0].astype(jnp.bfloat16)

    # Left / right image-border masks in the flat (h*W + w) row layout.
    col_idx = lax.broadcasted_iota(jnp.int32, (HW, 1), 0) % W
    left_edge = col_idx == 0
    right_edge = col_idx == (W - 1)
    zero_b = jnp.zeros((), jnp.bfloat16)      # bf16 zero: avoid f32 re-promotion

    # --- conv1_kxk (3x3, stride 1, pad 1): build bf16 im2col buffer ------------
    # Vertical halo handled by the zero rows, horizontal halo by column masks.
    for dy in range(3):
        for dx in range(3):
            tap = dy * 3 + dx
            start = pad + (dy - 1) * W + (dx - 1)        # static offset
            lhs = xs_ref[pl.ds(start, HW), :]
            if dx == 0:
                lhs = jnp.where(left_edge, zero_b, lhs)
            elif dx == 2:
                lhs = jnp.where(right_edge, zero_b, lhs)
            col_ref[:, pl.ds(tap * Cin, Cin)] = lhs

    # One lane-dense K=9*Cin MXU matmul; result accumulates in registers only.
    h1 = jnp.dot(col_ref[...], w1_ref[...], preferred_element_type=jnp.float32)
    h1 = jnp.maximum(h1 + b1_ref[...], 0.0).astype(jnp.bfloat16)   # BN bias + ReLU

    # --- conv2_1x1 + BN (no act) + identity shortcut + final ReLU --------------
    y = jnp.dot(h1, w2_ref[...], preferred_element_type=jnp.float32)
    y = y + b2_ref[...] + x_ref[0]                       # shortcut read in f32
    o_ref[0] = jnp.maximum(y, 0.0).astype(o_ref.dtype)


# ------------------------------ EdgeBlock forward ------------------------------

@jax.jit
def edge_block_forward(x_nchw, params):
    N, Cin, H, W = x_nchw.shape
    w1, b1 = params["w1"], params["b1"]        # (3,3,Cin,Cmid), (1,Cmid)
    w2, b2 = params["w2"], params["b2"]        # (Cmid,Cout),   (1,Cout)
    Cmid, Cout = w1.shape[-1], w2.shape[-1]
    assert Cin == Cout, "identity-shortcut config only"  # TODO(synk): DownsampleAvg
    HW = H * W
    pad = -(-(W + 1) // 16) * 16               # >= W+1 zero halo rows, 16-row aligned

    x = jnp.transpose(x_nchw, (0, 2, 3, 1)).astype(jnp.float32).reshape(N, HW, Cin)
    # (3,3,Cin,Cmid) -> (9*Cin, Cmid): row index (dy*3+dx)*Cin + cin matches the
    # im2col column order built in the kernel.
    w1_im2col = w1.reshape(9 * Cin, Cmid).astype(jnp.bfloat16)
    w2_b = w2.astype(jnp.bfloat16)

    out_flat = pl.pallas_call(
        functools.partial(_edge_block_kernel, H, W, pad),
        out_shape=jax.ShapeDtypeStruct((N, HW, Cout), jnp.float32),
        grid_spec=pltpu.PrefetchScalarGridSpec(
            num_scalar_prefetch=0,
            grid=(N,),
            in_specs=[
                pl.BlockSpec((1, HW, Cin), lambda n: (n, 0, 0)),
                pl.BlockSpec((9 * Cin, Cmid), lambda n: (0, 0)),   # resident weights
                pl.BlockSpec((1, Cmid), lambda n: (0, 0)),
                pl.BlockSpec((Cmid, Cout), lambda n: (0, 0)),
                pl.BlockSpec((1, Cout), lambda n: (0, 0)),
            ],
            out_specs=pl.BlockSpec((1, HW, Cout), lambda n: (n, 0, 0)),
            scratch_shapes=[
                pltpu.VMEM((2 * pad + HW, Cin), jnp.bfloat16),   # haloed bf16 input
                pltpu.VMEM((HW, 9 * Cin), jnp.bfloat16),         # im2col buffer
            ],
        ),
        compiler_params=pltpu.CompilerParams(
            dimension_semantics=("parallel",),
            vmem_limit_bytes=32 * 1024 * 1024),
    )(x, w1_im2col, b1, w2_b, b2)

    out = out_flat.reshape(N, H, W, Cout)
    return jnp.transpose(out, (0, 3, 1, 2))    # back to NCHW


# ------------------------------ reference (pure JAX) ---------------------------

def reference_forward(x_nchw, params):
    # Mirrors the kernel's mixed precision: conv operands rounded to bf16,
    # accumulation / bias / residual / ReLU in f32, shortcut in full f32.
    x = jnp.transpose(x_nchw, (0, 2, 3, 1)).astype(jnp.float32)   # NHWC
    xb = x.astype(jnp.bfloat16).astype(jnp.float32)
    w1 = params["w1"].astype(jnp.bfloat16).astype(jnp.float32)    # (3,3,Cin,Cmid)
    h1 = lax.conv_general_dilated(
        xb, w1, window_strides=(1, 1), padding=((1, 1), (1, 1)),
        dimension_numbers=("NHWC", "HWIO", "NHWC"))
    h1 = jnp.maximum(h1 + params["b1"][0], 0.0)
    h1b = h1.astype(jnp.bfloat16).astype(jnp.float32)
    w2 = params["w2"].astype(jnp.bfloat16).astype(jnp.float32)
    h2 = jnp.einsum("nhwc,cd->nhwd", h1b, w2) + params["b2"][0]
    out = jnp.maximum(h2 + x, 0.0)
    return jnp.transpose(out, (0, 3, 1, 2))


# ------------------------------ parameter construction -------------------------

def build_params(key, in_chs, out_chs, bottle_ratio=1.0):
    mid_chs = make_divisible(out_chs * bottle_ratio)
    ks = jax.random.split(key, 10)

    def bn(kset, c):
        g = jax.random.uniform(kset[0], (c,), jnp.float32, 0.5, 1.5)
        b = 0.1 * jax.random.normal(kset[1], (c,), jnp.float32)
        m = 0.1 * jax.random.normal(kset[2], (c,), jnp.float32)
        v = jax.random.uniform(kset[3], (c,), jnp.float32, 0.5, 1.5)
        return g, b, m, v

    # conv weights (no conv bias, as in ConvBnAct), output channels last (HWIO)
    w1_raw = 0.1 * jax.random.normal(ks[0], (3, 3, in_chs, mid_chs), jnp.float32)
    w2_raw = 0.1 * jax.random.normal(ks[1], (mid_chs, out_chs), jnp.float32)

    w1, b1 = fold_bn(w1_raw, *bn(ks[2:6], mid_chs))
    w2, b2 = fold_bn(w2_raw, *bn(ks[6:10], out_chs))

    return {"w1": w1, "b1": b1.reshape(1, mid_chs),
            "w2": w2, "b2": b2.reshape(1, out_chs)}


if __name__ == "__main__":
    key = jax.random.PRNGKey(0)
    k_x, k_p = jax.random.split(key)

    N, C, H, W = 2, 32, 16, 16          # in_chs == out_chs == 32 -> mid_chs == 32
    x_nchw = jax.random.normal(k_x, (N, C, H, W), jnp.float32)
    params = build_params(k_p, in_chs=C, out_chs=C, bottle_ratio=1.0)

    out = jax.block_until_ready(edge_block_forward(x_nchw, params))
    ref = reference_forward(x_nchw, params)

    assert out.shape == (N, C, H, W)
    err = float(jnp.max(jnp.abs(out - ref)))
    # bf16 matmul operands + different f32 summation order (im2col vs conv)
    # => loosened tolerance vs the bf16-mirrored reference.
    assert jnp.allclose(out, ref, rtol=1e-2, atol=1e-2), f"max abs err {err}"

    print("KERNEL_OK")
</pallas_src>

<mosaic_0001>
module attributes {stable_mosaic.version = 11 : i64} {
  func.func @_edge_block_kernel(%arg0: i32, %arg1: memref<1x256x32xf32, #tpu.memory_space<vmem>>, %arg2: memref<288x32xbf16, #tpu.memory_space<vmem>>, %arg3: memref<1x32xf32, #tpu.memory_space<vmem>>, %arg4: memref<32x32xbf16, #tpu.memory_space<vmem>>, %arg5: memref<1x32xf32, #tpu.memory_space<vmem>>, %arg6: memref<1x256x32xf32, #tpu.memory_space<vmem>>, %arg7: memref<320x32xbf16, #tpu.memory_space<vmem>>, %arg8: memref<256x288xbf16, #tpu.memory_space<vmem>>) attributes {dimension_semantics = [#tpu.dimension_semantics<parallel>], iteration_bounds = array<i64: 2>, scalar_prefetch = 0 : i64, scratch_operands = 2 : i64, tpu.core_type = #tpu.core_type<tc>, window_params = [{transform_indices = @transform_0, window_bounds = array<i64: 1, 256, 32>}, {pipeline_mode = #tpu.pipeline_mode<synchronous>, transform_indices = @transform_1, window_bounds = array<i64: 288, 32>}, {pipeline_mode = #tpu.pipeline_mode<synchronous>, transform_indices = @transform_2, window_bounds = array<i64: 1, 32>}, {pipeline_mode = #tpu.pipeline_mode<synchronous>, transform_indices = @transform_3, window_bounds = array<i64: 32, 32>}, {pipeline_mode = #tpu.pipeline_mode<synchronous>, transform_indices = @transform_4, window_bounds = array<i64: 1, 32>}, {transform_indices = @transform_5, window_bounds = array<i64: 1, 256, 32>}]} {
    %c0_i32 = arith.constant 0 : i32
    %0 = arith.cmpi eq, %arg0, %c0_i32 : i32
    %1 = arith.extui %0 : i1 to i32
    %c0_i32_0 = arith.constant 0 : i32
    %2 = arith.cmpi ne, %1, %c0_i32_0 : i32
    scf.if %2 {
      %cst_55 = arith.constant 0.000000e+00 : bf16
      %92 = vector.broadcast %cst_55 : bf16 to vector<32x32xbf16>
      %c0_56 = arith.constant 0 : index
      %c0_57 = arith.constant 0 : index
      %93 = vector.load %arg7[%c0_56, %c0_57] : memref<320x32xbf16, #tpu.memory_space<vmem>>, vector<32x32xbf16>
      tpu.vector_store %arg7[%c0_56, %c0_57], %92 {strides = array<i32>} : memref<320x32xbf16, #tpu.memory_space<vmem>>, vector<32x32xbf16>,
      %cst_58 = arith.constant 0.000000e+00 : bf16
      %94 = vector.broadcast %cst_58 : bf16 to vector<32x32xbf16>
      %c288 = arith.constant 288 : index
      %c0_59 = arith.constant 0 : index
      %95 = vector.load %arg7[%c288, %c0_59] : memref<320x32xbf16, #tpu.memory_space<vmem>>, vector<32x32xbf16>
      tpu.vector_store %arg7[%c288, %c0_59], %94 {strides = array<i32>} : memref<320x32xbf16, #tpu.memory_space<vmem>>, vector<32x32xbf16>,
    } else {
    }
    %c0 = arith.constant 0 : index
    %c0_1 = arith.constant 0 : index
    %c0_2 = arith.constant 0 : index
    %3 = vector.load %arg1[%c0, %c0_1, %c0_2] : memref<1x256x32xf32, #tpu.memory_space<vmem>>, vector<1x256x32xf32>
    %4 = vector.shape_cast %3 : vector<1x256x32xf32> to vector<256x32xf32>
    %5 = arith.truncf %4 : vector<256x32xf32> to vector<256x32xbf16>
    %c32 = arith.constant 32 : index
    %c0_3 = arith.constant 0 : index
    %6 = vector.load %arg7[%c32, %c0_3] : memref<320x32xbf16, #tpu.memory_space<vmem>>, vector<256x32xbf16>
    tpu.vector_store %arg7[%c32, %c0_3], %5 {strides = array<i32>} : memref<320x32xbf16, #tpu.memory_space<vmem>>, vector<256x32xbf16>,
    %7 = tpu.iota {dimensions = array<i32: 0>} : vector<256x1xi32>
    %c16_i32 = arith.constant 16 : i32
    %c0_i32_4 = arith.constant 0 : i32
    %8 = arith.cmpi eq, %c16_i32, %c0_i32_4 : i32
    %c1_i32 = arith.constant 1 : i32
    %9 = arith.select %8, %c1_i32, %c16_i32 : i32
    %10 = vector.broadcast %9 : i32 to vector<256x1xi32>
    %11 = arith.remsi %7, %10 : vector<256x1xi32>
    %c0_i32_5 = arith.constant 0 : i32
    %12 = vector.broadcast %c0_i32_5 : i32 to vector<256x1xi32>
    %13 = arith.cmpi ne, %11, %12 : vector<256x1xi32>
    %c0_i32_6 = arith.constant 0 : i32
    %14 = vector.broadcast %c0_i32_6 : i32 to vector<256x1xi32>
    %15 = arith.cmpi slt, %11, %14 : vector<256x1xi32>
    %c0_i32_7 = arith.constant 0 : i32
    %16 = arith.cmpi slt, %9, %c0_i32_7 : i32
    %17 = vector.broadcast %16 : i1 to vector<256x1xi1>
    %18 = vector.broadcast %17 : vector<256x1xi1> to vector<256x1xi1>
    %19 = arith.xori %15, %18 : vector<256x1xi1>
    %20 = arith.andi %19, %13 : vector<256x1xi1>
    %21 = vector.broadcast %9 : i32 to vector<256x1xi32>
    %22 = arith.addi %11, %21 : vector<256x1xi32>
    %23 = arith.select %20, %22, %11 : vector<256x1xi1>, vector<256x1xi32>
    %c0_i32_8 = arith.constant 0 : i32
    %24 = vector.broadcast %c0_i32_8 : i32 to vector<256x1xi32>
    %25 = arith.cmpi eq, %23, %24 : vector<256x1xi32>
    %c15_i32 = arith.constant 15 : i32
    %26 = vector.broadcast %c15_i32 : i32 to vector<256x1xi32>
    %27 = arith.cmpi eq, %23, %26 : vector<256x1xi32>
    %c15 = arith.constant 15 : index
    %c0_9 = arith.constant 0 : index
    %28 = vector.load %arg7[%c15, %c0_9] : memref<320x32xbf16, #tpu.memory_space<vmem>>, vector<256x32xbf16>
    %cst = arith.constant 0.000000e+00 : bf16
    %29 = vector.shape_cast %25 : vector<256x1xi1> to vector<256x1xi1>
    %30 = vector.broadcast %29 : vector<256x1xi1> to vector<256x32xi1>
    %31 = vector.broadcast %cst : bf16 to vector<256x32xbf16>
    %32 = arith.select %30, %31, %28 : vector<256x32xi1>, vector<256x32xbf16>
    %c0_10 = arith.constant 0 : index
    %c0_11 = arith.constant 0 : index
    %33 = vector.load %arg8[%c0_10, %c0_11] : memref<256x288xbf16, #tpu.memory_space<vmem>>, vector<256x32xbf16>
    tpu.vector_store %arg8[%c0_10, %c0_11], %32 {strides = array<i32>} : memref<256x288xbf16, #tpu.memory_space<vmem>>, vector<256x32xbf16>,
    %c16 = arith.constant 16 : index
    %c0_12 = arith.constant 0 : index
    %34 = vector.load %arg7[%c16, %c0_12] : memref<320x32xbf16, #tpu.memory_space<vmem>>, vector<256x32xbf16>
    %c0_13 = arith.constant 0 : index
    %c32_14 = arith.constant 32 : index
    %35 = vector.load %arg8[%c0_13, %c32_14] : memref<256x288xbf16, #tpu.memory_space<vmem>>, vector<256x32xbf16>
    tpu.vector_store %arg8[%c0_13, %c32_14], %34 {strides = array<i32>} : memref<256x288xbf16, #tpu.memory_space<vmem>>, vector<256x32xbf16>,
    %c17 = arith.constant 17 : index
    %c0_15 = arith.constant 0 : index
    %36 = vector.load %arg7[%c17, %c0_15] : memref<320x32xbf16, #tpu.memory_space<vmem>>, vector<256x32xbf16>
    %cst_16 = arith.constant 0.000000e+00 : bf16
    %37 = vector.shape_cast %27 : vector<256x1xi1> to vector<256x1xi1>
    %38 = vector.broadcast %37 : vector<256x1xi1> to vector<256x32xi1>
    %39 = vector.broadcast %cst_16 : bf16 to vector<256x32xbf16>
    %40 = arith.select %38, %39, %36 : vector<256x32xi1>, vector<256x32xbf16>
    %c0_17 = arith.constant 0 : index
    %c64 = arith.constant 64 : index
    %41 = vector.load %arg8[%c0_17, %c64] : memref<256x288xbf16, #tpu.memory_space<vmem>>, vector<256x32xbf16>
    tpu.vector_store %arg8[%c0_17, %c64], %40 {strides = array<i32>} : memref<256x288xbf16, #tpu.memory_space<vmem>>, vector<256x32xbf16>,
    %c31 = arith.constant 31 : index
    %c0_18 = arith.constant 0 : index
    %42 = vector.load %arg7[%c31, %c0_18] : memref<320x32xbf16, #tpu.memory_space<vmem>>, vector<256x32xbf16>
    %cst_19 = arith.constant 0.000000e+00 : bf16
    %43 = vector.shape_cast %25 : vector<256x1xi1> to vector<256x1xi1>
    %44 = vector.broadcast %43 : vector<256x1xi1> to vector<256x32xi1>
    %45 = vector.broadcast %cst_19 : bf16 to vector<256x32xbf16>
    %46 = arith.select %44, %45, %42 : vector<256x32xi1>, vector<256x32xbf16>
    %c0_20 = arith.constant 0 : index
    %c96 = arith.constant 96 : index
    %47 = vector.load %arg8[%c0_20, %c96] : memref<256x288xbf16, #tpu.memory_space<vmem>>, vector<256x32xbf16>
    tpu.vector_store %arg8[%c0_20, %c96], %46 {strides = array<i32>} : memref<256x288xbf16, #tpu.memory_space<vmem>>, vector<256x32xbf16>,
    %c32_21 = arith.constant 32 : index
    %c0_22 = arith.constant 0 : index
    %48 = vector.load %arg7[%c32_21, %c0_22] : memref<320x32xbf16, #tpu.memory_space<vmem>>, vector<256x32xbf16>
    %c0_23 = arith.constant 0 : index
    %c128 = arith.constant 128 : index
    %49 = vector.load %arg8[%c0_23, %c128] : memref<256x288xbf16, #tpu.memory_space<vmem>>, vector<256x32xbf16>
    tpu.vector_store %arg8[%c0_23, %c128], %48 {strides = array<i32>} : memref<256x288xbf16, #tpu.memory_space<vmem>>, vector<256x32xbf16>,
    %c33 = arith.constant 33 : index
    %c0_24 = arith.constant 0 : index
    %50 = vector.load %arg7[%c33, %c0_24] : memref<320x32xbf16, #tpu.memory_space<vmem>>, vector<256x32xbf16>
    %cst_25 = arith.constant 0.000000e+00 : bf16
    %51 = vector.shape_cast %27 : vector<256x1xi1> to vector<256x1xi1>
    %52 = vector.broadcast %51 : vector<256x1xi1> to vector<256x32xi1>
    %53 = vector.broadcast %cst_25 : bf16 to vector<256x32xbf16>
    %54 = arith.select %52, %53, %50 : vector<256x32xi1>, vector<256x32xbf16>
    %c0_26 = arith.constant 0 : index
    %c160 = arith.constant 160 : index
    %55 = vector.load %arg8[%c0_26, %c160] : memref<256x288xbf16, #tpu.memory_space<vmem>>, vector<256x32xbf16>
    tpu.vector_store %arg8[%c0_26, %c160], %54 {strides = array<i32>} : memref<256x288xbf16, #tpu.memory_space<vmem>>, vector<256x32xbf16>,
    %c47 = arith.constant 47 : index
    %c0_27 = arith.constant 0 : index
    %56 = vector.load %arg7[%c47, %c0_27] : memref<320x32xbf16, #tpu.memory_space<vmem>>, vector<256x32xbf16>
    %cst_28 = arith.constant 0.000000e+00 : bf16
    %57 = vector.shape_cast %25 : vector<256x1xi1> to vector<256x1xi1>
    %58 = vector.broadcast %57 : vector<256x1xi1> to vector<256x32xi1>
    %59 = vector.broadcast %cst_28 : bf16 to vector<256x32xbf16>
    %60 = arith.select %58, %59, %56 : vector<256x32xi1>, vector<256x32xbf16>
    %c0_29 = arith.constant 0 : index
    %c192 = arith.constant 192 : index
    %61 = vector.load %arg8[%c0_29, %c192] : memref<256x288xbf16, #tpu.memory_space<vmem>>, vector<256x32xbf16>
    tpu.vector_store %arg8[%c0_29, %c192], %60 {strides = array<i32>} : memref<256x288xbf16, #tpu.memory_space<vmem>>, vector<256x32xbf16>,
    %c48 = arith.constant 48 : index
    %c0_30 = arith.constant 0 : index
    %62 = vector.load %arg7[%c48, %c0_30] : memref<320x32xbf16, #tpu.memory_space<vmem>>, vector<256x32xbf16>
    %c0_31 = arith.constant 0 : index
    %c224 = arith.constant 224 : index
    %63 = vector.load %arg8[%c0_31, %c224] : memref<256x288xbf16, #tpu.memory_space<vmem>>, vector<256x32xbf16>
    tpu.vector_store %arg8[%c0_31, %c224], %62 {strides = array<i32>} : memref<256x288xbf16, #tpu.memory_space<vmem>>, vector<256x32xbf16>,
    %c49 = arith.constant 49 : index
    %c0_32 = arith.constant 0 : index
    %64 = vector.load %arg7[%c49, %c0_32] : memref<320x32xbf16, #tpu.memory_space<vmem>>, vector<256x32xbf16>
    %cst_33 = arith.constant 0.000000e+00 : bf16
    %65 = vector.shape_cast %27 : vector<256x1xi1> to vector<256x1xi1>
    %66 = vector.broadcast %65 : vector<256x1xi1> to vector<256x32xi1>
    %67 = vector.broadcast %cst_33 : bf16 to vector<256x32xbf16>
    %68 = arith.select %66, %67, %64 : vector<256x32xi1>, vector<256x32xbf16>
    %c0_34 = arith.constant 0 : index
    %c256 = arith.constant 256 : index
    %69 = vector.load %arg8[%c0_34, %c256] : memref<256x288xbf16, #tpu.memory_space<vmem>>, vector<256x32xbf16>
    tpu.vector_store %arg8[%c0_34, %c256], %68 {strides = array<i32>} : memref<256x288xbf16, #tpu.memory_space<vmem>>, vector<256x32xbf16>,
    %c0_35 = arith.constant 0 : index
    %c0_36 = arith.constant 0 : index
    %70 = vector.load %arg8[%c0_35, %c0_36] : memref<256x288xbf16, #tpu.memory_space<vmem>>, vector<256x288xbf16>
    %c0_37 = arith.constant 0 : index
    %c0_38 = arith.constant 0 : index
    %71 = vector.load %arg2[%c0_37, %c0_38] : memref<288x32xbf16, #tpu.memory_space<vmem>>, vector<288x32xbf16>
    %cst_39 = arith.constant dense<0.000000e+00> : vector<256x32xf32>
    %72 = tpu.matmul %70, %71, %cst_39 {dimension_numbers = #tpu.dot_dimension_numbers<[1], [0], [0], [1], [0, 0, 1, 1], [], []>} : vector<256x288xbf16>, vector<288x32xbf16>, vector<256x32xf32> -> vector<256x32xf32>
    %c0_40 = arith.constant 0 : index
    %c0_41 = arith.constant 0 : index
    %73 = vector.load %arg3[%c0_40, %c0_41] : memref<1x32xf32, #tpu.memory_space<vmem>>, vector<1x32xf32>
    %74 = vector.broadcast %73 : vector<1x32xf32> to vector<256x32xf32>
    %75 = arith.addf %72, %74 : vector<256x32xf32>
    %cst_42 = arith.constant 0.000000e+00 : f32
    %76 = vector.broadcast %cst_42 : f32 to vector<256x32xf32>
    %77 = arith.maximumf %75, %76 : vector<256x32xf32>
    %78 = arith.truncf %77 : vector<256x32xf32> to vector<256x32xbf16>
    %c0_43 = arith.constant 0 : index
    %c0_44 = arith.constant 0 : index
    %79 = vector.load %arg4[%c0_43, %c0_44] : memref<32x32xbf16, #tpu.memory_space<vmem>>, vector<32x32xbf16>
    %cst_45 = arith.constant dense<0.000000e+00> : vector<256x32xf32>
    %80 = tpu.matmul %78, %79, %cst_45 {dimension_numbers = #tpu.dot_dimension_numbers<[1], [0], [0], [1], [0, 0, 1, 1], [], []>} : vector<256x32xbf16>, vector<32x32xbf16>, vector<256x32xf32> -> vector<256x32xf32>
    %c0_46 = arith.constant 0 : index
    %c0_47 = arith.constant 0 : index
    %81 = vector.load %arg5[%c0_46, %c0_47] : memref<1x32xf32, #tpu.memory_space<vmem>>, vector<1x32xf32>
    %82 = vector.broadcast %81 : vector<1x32xf32> to vector<256x32xf32>
    %83 = arith.addf %80, %82 : vector<256x32xf32>
    %c0_48 = arith.constant 0 : index
    %c0_49 = arith.constant 0 : index
    %c0_50 = arith.constant 0 : index
    %84 = vector.load %arg1[%c0_48, %c0_49, %c0_50] : memref<1x256x32xf32, #tpu.memory_space<vmem>>, vector<1x256x32xf32>
    %85 = vector.shape_cast %84 : vector<1x256x32xf32> to vector<256x32xf32>
    %86 = arith.addf %83, %85 : vector<256x32xf32>
    %cst_51 = arith.constant 0.000000e+00 : f32
    %87 = vector.broadcast %cst_51 : f32 to vector<256x32xf32>
    %88 = arith.maximumf %86, %87 : vector<256x32xf32>
    %c0_52 = arith.constant 0 : index
    %c0_53 = arith.constant 0 : index
    %c0_54 = arith.constant 0 : index
    %89 = vector.load %arg6[%c0_52, %c0_53, %c0_54] : memref<1x256x32xf32, #tpu.memory_space<vmem>>, vector<1x256x32xf32>
    %90 = vector.shape_cast %89 : vector<1x256x32xf32> to vector<256x32xf32>
    %91 = vector.shape_cast %88 : vector<256x32xf32> to vector<1x256x32xf32>
    tpu.vector_store %arg6[%c0_52, %c0_53, %c0_54], %91 {strides = array<i32>} : memref<1x256x32xf32, #tpu.memory_space<vmem>>, vector<1x256x32xf32>,
    return
  }
  func.func @transform_0(%arg0: i32) -> (i32, i32, i32) {
    %c0_i32 = arith.constant 0 : i32
    %c0_i32_0 = arith.constant 0 : i32
    %c0_i32_1 = arith.constant 0 : i32
    return %arg0, %c0_i32, %c0_i32_0 : i32, i32, i32
  }
  func.func @transform_1(%arg0: i32) -> (i32, i32) {
    %c0_i32 = arith.constant 0 : i32
    %c0_i32_0 = arith.constant 0 : i32
    %c0_i32_1 = arith.constant 0 : i32
    return %c0_i32, %c0_i32_0 : i32, i32
  }
  func.func @transform_2(%arg0: i32) -> (i32, i32) {
    %c0_i32 = arith.constant 0 : i32
    %c0_i32_0 = arith.constant 0 : i32
    %c0_i32_1 = arith.constant 0 : i32
    return %c0_i32, %c0_i32_0 : i32, i32
  }
  func.func @transform_3(%arg0: i32) -> (i32, i32) {
    %c0_i32 = arith.constant 0 : i32
    %c0_i32_0 = arith.constant 0 : i32
    %c0_i32_1 = arith.constant 0 : i32
    return %c0_i32, %c0_i32_0 : i32, i32
  }
  func.func @transform_4(%arg0: i32) -> (i32, i32) {
    %c0_i32 = arith.constant 0 : i32
    %c0_i32_0 = arith.constant 0 : i32
    %c0_i32_1 = arith.constant 0 : i32
    return %c0_i32, %c0_i32_0 : i32, i32
  }
  func.func @transform_5(%arg0: i32) -> (i32, i32, i32) {
    %c0_i32 = arith.constant 0 : i32
    %c0_i32_0 = arith.constant 0 : i32
    %c0_i32_1 = arith.constant 0 : i32
    return %arg0, %c0_i32, %c0_i32_0 : i32, i32, i32
  }
}

</mosaic_0001>

<bundles_post_ra>
// kernel: edge_block_forward.1
= control target key start
LH: loop header
LB: loop body
LE: loop exit
PB: predicated region body
PF: predicated region fallthrough
CT: control target
= control target key end

     0   :  { %10 = vsyncpa [#allocation5], 0  ;;  %s10787_s0 = inlined_call_operand.hbm [shape: f32[2,256,32], index: 0, kind: input, shape index: {}]   ;;  %s10788_s1 = inlined_call_operand.vmem [shape: bf16[288,32], index: 1, kind: input, shape index: {}]   ;;  %s10789_s2 = inlined_call_operand.vmem [shape: f32[1,32], index: 2, kind: input, shape index: {}]   ;;  %s10790_s3 = inlined_call_operand.vmem [shape: bf16[32,32], index: 3, kind: input, shape index: {}]   ;;  %s10791_s4 = inlined_call_operand.vmem [shape: f32[1,32], index: 4, kind: input, shape index: {}]   ;;  %s10792_s5 = inlined_call_operand.hbm [shape: f32[2,256,32], index: 5, kind: output, shape index: {}]  }
   0x1   :  { %12 = vsyncpa [#allocation5 + $0x1], 0 }
   0x2   :  { %13 = vsyncpa [#allocation6], 0 }
   0x3   :  { %15 = vsyncpa [#allocation6 + $0x1], 0  ;;  %s7192_s18 = smov 0   ;;  %s7194_s19 = smov 0  }
   0x4   :  { %s7196_s20 = smov 0   ;;  %s7198_s21 = smov 0  }
   0x5 LB: > { %s7213_s22 = sadd.s32 4294967295, %s7148_s21   ;;  %s6523_s23 = sadd.s32 4294967294, %s7148_s21   ;;  %s7148_s21 = sphi %s7198_s21, %s11124_s21   ;;  %s7144_s20 = sphi %s7196_s20, %s11123_s20   ;;  %s7140_s19 = sphi %s7194_s19, %s11122_s19   ;;  %s7136_s18 = sphi %s7192_s18, %s11121_s18  }
   0x6   : > { %s7217_s24 = sadd.s32 1, %s7148_s21   ;;  %s28_s25 = sadd.s32 1, %s7144_s20 }
   0x7   : > { %s25_s26 = ssub.s32 %s7148_s21, %s7217_s24  ;;  %p35_p0 = scmp.ne.s32.totalorder %s7144_s20, %s7140_s19 }
   0x8   : > { %p26_p1 = scmp.eq.s32.totalorder %s25_s26, 0  ;;  %p36_p2 = scmp.eq.s32.totalorder %s7148_s21, 0 }
   0x9   : > { %p41_p3 = scmp.ne.s32.totalorder %s7140_s19, %s7136_s18  ;;  %p42_p4 = scmp.eq.s32.totalorder %s7213_s22, 0 }
   0xa   : > { %s7229_s27 = scalar_select %p26_p1, %s7144_s20, %s28_s25  }
   0xb   : > { %p7231_p5 = por %p36_p2, %p35_p0  ;;  %p7235_p6 = por %p42_p4, %p41_p3 }
   0xc   : > { %p149_p7 = scmp.eq.s32.totalorder %s7213_s22, 1  ;;  %p155_p8 = scmp.eq.s32.totalorder %s6523_s23, 1 }
   0xd   : > { %s10802_s29 = scalar_select %p7235_p6, 1, 0 }
   0xe   : > { %p6941_p10 = scmp.lt.s32.totalorder %s7148_s21, 2  ;;  %p7242_p11 = por %p149_p7, %p35_p0 }
   0xf   : > { %p7246_p12 = por %p155_p8, %p41_p3  ;;  %s187_s7 = sand.u32 1, %s7144_s20  }
  0x10   : > { %s10803_s30 = scalar_select %p7242_p11, 1, 0 }
  0x11   : > { %s10804_s6 = scalar_select %p7246_p12, 1, 0 }
  0x12   : > { %s6675_s8 = sshll.u32 %s7148_s21, 12  ;;  %s6526_s9 = sshll.u32 %s187_s7, 8 }
  0x13   : > { %s7255_s12 = scalar_lea.hbm %s10787_s0, %s6675_s8  ;;  %s191_s13 = scalar_lea.vmem [#allocation4], %s6526_s9 }
  0x14   : > { %s198_s14 = sshll.u32 %s191_s13, 4  ;;  %p7259_p13 = pnand %p6941_p10, %p7231_p5  ;;  %s7263_s14 = int_to_ptr.vmem [resolvable:$true] %s198_s14 }
  0x15   : > { %s7265_s16 = scalar_lea.sflag [#allocation5], %s187_s7  ;;  %s7056_s17 = scalar_lea.hbm %s7255_s12, 4096 }
  0x16   : > { %p7057_p0 = scmp.ne.s32.totalorder %s7255_s12, %s7056_s17  ;;  %p7058_p1 = pneg %p7259_p13 }
  0x17   : > { %s7061_s26 = scalar_lea.hbm %s10787_s0, 8192  ;;  %p7062_p4 = scmp.lt.s32.totalorder %s7255_s12, %s10787_s0 }
  0x18   : > { %p7059_p2 = pnand %p7058_p1, %p7057_p0  ;;  %p7063_p5 = scmp.lt.s32.totalorder %s7061_s26, %s7056_s17 }
  0x1a   : > { %p7060_p3 = pneg %p7059_p2  ;;  %p7064_p7 = por %p7063_p5, %p7062_p4 }
  0x1c   : > { %p7065_p8 = pnand %p7064_p7, %p7060_p3 }
  0x1e   : > { %7068 = shalt.err (!%p7065_p8)
}
  0x1f   : > { %s7069_s7 = scalar_lea.vmem %s7263_s14, 4096  ;;  %s7150_s9 = smov [#allocation4]  }
  0x20   : > { %p7070_p10 = scmp.ne.s32.totalorder %s7263_s14, %s7069_s7  ;;  %s7074_s10 = sshll.u32 %s7150_s9, 4  ;;  %s7075_s10 = int_to_ptr.vmem [resolvable:$false] %s7074_s10 }
  0x21   : > { %s7076_s11 = scalar_lea.vmem %s7075_s10, 8192  ;;  %p7077_p2 = scmp.lt.s32.totalorder %s7263_s14, %s7075_s10 }
  0x22   : > { %p7072_p9 = pnand %p7070_p10, %p7058_p1  ;;  %p7078_p12 = scmp.lt.s32.totalorder %s7076_s11, %s7069_s7 }
  0x24   : > { %p7073_p0 = pneg %p7072_p9  ;;  %p7079_p11 = por %p7078_p12, %p7077_p2 }
  0x26   : > { %p7080_p6 = pnand %p7079_p11, %p7073_p0 }
  0x28   : > { %7083 = shalt.err (!%p7080_p6)
}
  0x29   : > { %s7151_s13 = smov 128   ;;  %s7152_s17 = smov 8  }
  0x2a   : > { %6936 = dma.hbm_to_vmem [thread:$0]  (!%p7259_p13), %s7255_s12, 4096, %s7263_s14, %s7265_s16, %s7151_s13, %s7151_s13, %s7152_s17  }
  0x2b   : > { %p6529_p9 = scmp.ge.s32.totalorder %s7148_s21, 1  ;;  %p206_p1 = scmp.lt.s32.totalorder %s7148_s21, 3 }
  0x2d   : > { %p207_p3 = pnand %p6529_p9, %p206_p1 }
  0x2e   : > { %s7289_s23 = sand.u32 (!%p207_p3), 1, %s7140_s19   ;;  %p10806_p6 = scmp.ne.s32.totalorder (!%p207_p3), %s10802_s29, 0 }
  0x2f   : > { %210 = sbr.rel (%p207_p3) target bundleno = 1132 (0x46c), region = 40  ;;  %s6530_s25 = sshll.u32 (!%p207_p3), %s7289_s23, 8 }
  0x30   : > { %s213_s26 = scalar_lea.sflag (!%p207_p3), [#allocation5], %s7289_s23  ;;  %s7293_s28 = scalar_lea.vmem (!%p207_p3), [#allocation4], %s6530_s25 }
  0x34   : > { %7127 = dma.done.wait (%p10806_p6), %s213_s26, 4096  }
  0x35   : > { %7129 = vsyncadd (%p10806_p6), %s213_s26, 4294963200  ;;  %s7299_s12 = scalar_lea.vmem [#allocation7], %s6530_s25  ;;  %p6532_p11 = scmp.ne.s32.totalorder %s7213_s22, 0 }
  0x37   : > { %249 = sbr.rel (%p6532_p11) target bundleno = 64 (0x40), region = 48 }
  0x3c   : > { %vm250_vm0 = vcmask 257024   ;;  %v7153_v0 = vmov 0  }
  0x3d   : > { %252 = vst.msk [vmem:[#allocation2 + $0x4] sm:$0xf] %vm250_vm0, %v7153_v0  ;;  %253 = vst.msk [vmem:[#allocation2 + $0x8] sm:$0xf] %vm250_vm0, %v7153_v0 }
  0x3e   : > { %254 = vst.msk [vmem:[#allocation2 + $0xc] sm:$0xf] %vm250_vm0, %v7153_v0  ;;  %255 = vst.msk [vmem:[#allocation2 + $0x90] sm:$0xf] %vm250_vm0, %v7153_v0 }
  0x3f   : > { %256 = vst.msk [vmem:[#allocation2 + $0x94] sm:$0xf] %vm250_vm0, %v7153_v0  ;;  %257 = vst.msk [vmem:[#allocation2 + $0x98] sm:$0xf] %vm250_vm0, %v7153_v0 }
  0x40 PF: > { %v262_v2 = vld [vmem:[%s7293_s28 + $0x18] sm:$0xff]  ;;  %v452_v3 = vlaneseq  ;;  %s7154_s29 = smov 32   ;;  %vm419_vm1 = vcmask 257024   ;;  %v261_v5 = vld [vmem:[%s7293_s28 + $0x10] sm:$0xff]  ;;  %v260_v6 = vld [vmem:[%s7293_s28 + $0x8] sm:$0xff]  ;;  %vm7155_vm2 = vmmov 0  }
  0x41   : > { %v6679_v4 = vpack.c.bf16 %v262_v2, %v262_v2  ;;  %v259_v7 = vld [vmem:[%s7293_s28] sm:$0xff]  ;;  %v6678_v9 = vpack.c.bf16 %v261_v5, %v261_v5  ;;  %v6677_v10 = vpack.c.bf16 %v260_v6, %v260_v6  ;;  %vm1031_vm3 = vmpackc.low %vm7155_vm2, %vm7155_vm2  ;;  %v10798_v15 = vmov 0   ;;  %v264_v23 = vld [vmem:[%s7293_s28 + $0x28] sm:$0xff]  ;;  %s7157_s14 = smov 96   ;;  %s7158_s15 = smov 64  }
  0x42   : > { %v6676_v11 = vpack.c.bf16 %v259_v7, %v259_v7  ;;  %v7307_v12 = vshrl.u32 %v452_v3, 7  ;;  %v263_v13 = vld [vmem:[%s7293_s28 + $0x20] sm:$0xff]  ;;  %v1063_v16 = vsel %vm1031_vm3, 65537, %v10798_v15  ;;  %vm1482_vm4 = vsmask.f32 256  ;;  %v265_v25 = vld [vmem:[%s7293_s28 + $0x30] sm:$0xff] }
  0x43   : > { %423 = vst.msk [vmem:[#allocation2 + $0x1c] sm:$0xf] %vm419_vm1, %v6679_v4  ;;  %422 = vst.msk [vmem:[#allocation2 + $0x18] sm:$0xf] %vm419_vm1, %v6678_v9  ;;  %v1107_v17 = vshll.u32 %v1063_v16, 16  ;;  %v1111_v18 = vshrl.u32 %v1063_v16, 16  ;;  %v6680_v22 = vpack.c.bf16 %v263_v13, %v263_v13  ;;  %v6681_v35 = vpack.c.bf16 %v264_v23, %v264_v23 }
  0x44   : > { %v1841_v1 = vld [vmem:[#allocation2 + $0x8] sm:$0xf]  ;;  %421 = vst.msk [vmem:[#allocation2 + $0x14] sm:$0xf] %vm419_vm1, %v6677_v10  ;;  %420 = vst.msk [vmem:[#allocation2 + $0x10] sm:$0xf] %vm419_vm1, %v6676_v11  ;;  %v6682_v48 = vpack.c.bf16 %v265_v25, %v265_v25 }
  0x45   : > { %1905 = vrot.lane.b32.xlu0 %v1841_v1, %s7154_s29  ;;  %v1842_v8 = vld [vmem:[#allocation2 + $0xc] sm:$0xf]  ;;  %v454_v14 = vadd.s32 8, %v7307_v12  ;;  %v455_v19 = vadd.s32 16, %v7307_v12  ;;  %v489_v20 = vand.u32 15, %v7307_v12  ;;  %v7321_v24 = vadd.s32 24, %v7307_v12 }
  0x46   : > { %vm1483_vm5 = vsmask.f32 4368  ;;  %v7324_v26 = vrot.slane %v1107_v17, 5  ;;  %v2198_v27 = vrot.slane %v1111_v18, 7  ;;  %v266_v30 = vld [vmem:[%s7293_s28 + $0x38] sm:$0xff]  ;;  %v267_v31 = vld [vmem:[%s7293_s28 + $0x40] sm:$0xff] }
  0x47   : > { %v496_v21 = vand.u32 15, %v454_v14  ;;  %v503_v28 = vand.u32 15, %v455_v19  ;;  %vm7326_vm6 = vcmp.eq.s32.totalorder %v489_v20, 0  ;;  %v2034_v33 = vld [vmem:[#allocation2 + $0x8] sm:$0xf]  ;;  %v7339_v34 = vrot.slane %v1111_v18, 4  ;;  %vm7396_vm15 = vmor %vm1482_vm4, %vm1483_vm5 }
  0x48   : > { %vm1030_vm8 = vmpackc.low %vm7326_vm6, %vm7326_vm6  ;;  %424 = vst.msk [vmem:[#allocation2 + $0x20] sm:$0xf] %vm419_vm1, %v6680_v22  ;;  %v510_v36 = vand.u32 15, %v7321_v24  ;;  %v268_v37 = vld [vmem:[%s7293_s28 + $0x48] sm:$0xff]  ;;  %v269_v38 = vld [vmem:[%s7293_s28 + $0x50] sm:$0xff]  ;;  %v7348_v39 = vor.u32 %v2198_v27, %v1107_v17  ;;  %v7350_v40 = vrot.slane %v2198_v27, 4  ;;  %v6683_v52 = vpack.c.bf16 %v266_v30, %v266_v30 }
  0x49   : > { %1907 = vrot.lane.b32.xlu0 %v1842_v8, %s7154_s29  ;;  %vm7332_vm7 = vcmp.eq.s32.totalorder %v496_v21, 15  ;;  %vm7352_vm10 = vcmp.eq.s32.totalorder %v503_v28, 0  ;;  %v7357_v42 = vsel %vm1030_vm8, 65537, %v10798_v15  ;;  %v270_v43 = vld [vmem:[%s7293_s28 + $0x58] sm:$0xff]  ;;  %v1114_v47 = vor.u32 %v7339_v34, %v7324_v26  ;;  %425 = vst.msk [vmem:[#allocation2 + $0x24] sm:$0xf] %vm419_vm1, %v6681_v35 }
  0x4a   : > { %vm2132_vm9 = vmpackc.low %vm7332_vm7, %vm7332_vm7  ;;  %v4557_v44 = vld [vmem:[#allocation2 + $0x1c] sm:$0xf]  ;;  %v1098_v46 = vshll.u32 %v7357_v42, 16  ;;  %v271_v49 = vld [vmem:[%s7293_s28 + $0x60] sm:$0xff]  ;;  %vm1094_vm12 = vsmask.f32 3328  ;;  %v6684_v53 = vpack.c.bf16 %v267_v31, %v267_v31  ;;  %v6685_v54 = vpack.c.bf16 %v268_v37, %v268_v37 }
  0x4b   : > { %v2164_v45 = vsel %vm2132_vm9, 65537, %v10798_v15  ;;  %vm1032_vm11 = vmpackc.low %vm7352_vm10, %vm7352_vm10  ;;  %4622 = vrot.lane.b32.xlu1 %v4557_v44, %s7157_s14  ;;  %v4556_v50 = vld [vmem:[#allocation2 + $0x18] sm:$0xf]  ;;  %v1844_v51 = vld [vmem:[#allocation2 + $0x14] sm:$0xf]  ;;  %v6686_v55 = vpack.c.bf16 %v269_v38, %v269_v38  ;;  %vm2482_vm14 = vcmp.ne.s16.totalorder %v7348_v39, 0  ;;  %v6687_v0 = vpack.c.bf16 %v270_v43, %v270_v43 }
  0x4c   : > { %vm1095_vm13 = vsmask.f32 7440  ;;  %v2204_v56 = vshrl.u32 %v2164_v45, 16  ;;  %v2207_v57 = vshll.u32 %v2164_v45, 16  ;;  %v3552_v58 = vld [vmem:[#allocation2 + $0x10] sm:$0xf]  ;;  %v6688_v1 = vpack.c.bf16 %v271_v49, %v271_v49 }
  0x4d   : > { %4620 = vrot.lane.b32.xlu0 %v4556_v50, %s7157_s14  ;;  %v7378_v59 = vsel %vm1032_vm11, 65537, %v10798_v15  ;;  %426 = vst.msk [vmem:[#allocation2 + $0x28] sm:$0xf] %vm419_vm1, %v6682_v48  ;;  %v1843_v60 = vld [vmem:[#allocation2 + $0x10] sm:$0xf]  ;;  %v3585_v61 = vsel %vm2482_vm14, 0, %v3552_v58  ;;  %vm7417_vm2 = vmor %vm1094_vm12, %vm1095_vm13 }
  0x4e   : > { %v4748_v62 = vld [vmem:[#allocation2 + $0x18] sm:$0xf]  ;;  %v2515_v63 = vsel %vm2482_vm14, 0, %v2034_v33  ;;  %427 = vst.msk [vmem:[#allocation2 + $0x2c] sm:$0xf] %vm419_vm1, %v6683_v52  ;;  %v7389_v2 = vrot.slane %v2204_v56, 7 }
  0x4f   : > { %428 = vst.msk [vmem:[#allocation2 + $0x30] sm:$0xf] %vm419_vm1, %v6684_v53  ;;  %429 = vst.msk [vmem:[#allocation2 + $0x34] sm:$0xf] %vm419_vm1, %v6685_v54  ;;  %v3619_v3 = vshrl.u32 %v3585_v61, 16  ;;  %v3622_v4 = vshll.u32 %v3585_v61, 16  ;;  %1911 = vrot.lane.b32.xlu1 %v1844_v51, %s7154_s29 }
  0x50   : > { %430 = vst.msk [vmem:[#allocation2 + $0x38] sm:$0xf] %vm419_vm1, %v6686_v55  ;;  %v4781_v5 = vsel %vm2482_vm14, 0, %v4748_v62  ;;  %v2035_v9 = vld [vmem:[#allocation2 + $0xc] sm:$0xf]  ;;  %v2549_v10 = vshrl.u32 %v2515_v63, 16  ;;  %v2209_v13 = vor.u32 %v2207_v57, %v7389_v2 }
  0x51   : > { %v4815_v7 = vshrl.u32 %v4781_v5, 16  ;;  %v4818_v8 = vshll.u32 %v4781_v5, 16  ;;  %v2552_v11 = vshll.u32 %v2515_v63, 16  ;;  %431 = vst.msk [vmem:[#allocation2 + $0x3c] sm:$0xf] %vm419_vm1, %v6687_v0  ;;  %1909 = vrot.lane.b32.xlu0 %v1843_v60, %s7154_s29  ;;  %v3621_v14 = vrot.slane %v3619_v3, 4 }
  0x52   : > { %432 = vst.msk [vmem:[#allocation2 + $0x40] sm:$0xf] %vm419_vm1, %v6688_v1  ;;  %v3624_v16 = vrot.slane %v3622_v4, 5  ;;  %v4749_v17 = vld [vmem:[#allocation2 + $0x1c] sm:$0xf]  ;;  %v7404_v18 = vrot.slane %v1098_v46, 5  ;;  %v2210_v25 = vsel %vm7396_vm15, %v7350_v40, %v2209_v13 }
  0x53   : > { %v3553_v19 = vld [vmem:[#allocation2 + $0x14] sm:$0xf]  ;;  %v4817_v20 = vrot.slane %v4815_v7, 4  ;;  %v4820_v21 = vrot.slane %v4818_v8, 5  ;;  %v2551_v22 = vrot.slane %v2549_v10, 4  ;;  %v2554_v23 = vrot.slane %v2552_v11, 5 }
  0x54   : > { %v3625_v27 = vor.u32 %v3624_v16, %v3621_v14  ;;  %v1101_v28 = vshrl.u32 %v7357_v42, 16  ;;  %v7410_v29 = vrot.slane %v1114_v47, 4  ;;  %vm2483_vm0 = vcmp.ne.s16.totalorder %v2210_v25, 0  ;;  %v4072_v49 = vld [vmem:[#allocation2 + $0x1c] sm:$0xf]  ;;  %s6708_s9 = sshll.u32 %s7213_s22, 12 }
  0x55   : > { %v4821_v30 = vor.u32 %v4820_v21, %v4817_v20  ;;  %v2555_v31 = vor.u32 %v2554_v23, %v2551_v22  ;;  %v1117_v32 = vshll.u32 %v7378_v59, 16  ;;  %v3586_v33 = vsel %vm2483_vm0, 0, %v3553_v19  ;;  %v4070_v54 = vld [vmem:[#allocation2 + $0x14] sm:$0x8]  ;;  %v3001_v5 = vld [vmem:[#allocation2 + $0xc] sm:$0x8]  ;;  %s10738_s17 = scalar_lea.hbm %s10792_s5, %s6708_s9 }
  0x56   : > { %v3626_v34 = vrot.slane %v3625_v27, 4  ;;  %v4782_v35 = vsel %vm2483_vm0, 0, %v4749_v17  ;;  %v7413_v37 = vsel %vm2483_vm0, 0, %v2035_v9  ;;  %v3628_v38 = vshll.u32 %v3586_v33, 16  ;;  %v3003_v58 = vld [vmem:[#allocation2 + $0x14] sm:$0xf] }
  0x57   : > { %v3632_v41 = vshrl.u32 %v3586_v33, 16  ;;  %v4822_v43 = vrot.slane %v4821_v30, 4  ;;  %v4824_v44 = vshll.u32 %v4782_v35, 16  ;;  %v4828_v45 = vshrl.u32 %v4782_v35, 16  ;;  %v4071_v8 = vld [vmem:[#allocation2 + $0x18] sm:$0xf] }
  0x58   : > { %v2556_v46 = vrot.slane %v2555_v31, 4  ;;  %v2558_v47 = vshll.u32 %v7413_v37, 16  ;;  %v2562_v48 = vshrl.u32 %v7413_v37, 16  ;;  %v7423_v50 = vrot.slane %v3628_v38, 5  ;;  %v3002_v17 = vld [vmem:[#allocation2 + $0x10] sm:$0xf] }
  0x59   : > { %v4826_v51 = vrot.slane %v4824_v44, 5  ;;  %v1103_v52 = vrot.slane %v1101_v28, 4  ;;  %v7425_v53 = vrot.slane %v1117_v32, 5  ;;  %v4830_v55 = vrot.slane %v4828_v45, 4  ;;  %v3554_v31 = vld [vmem:[#allocation2 + $0x18] sm:$0xf] }
  0x5a   : > { %v7427_v56 = vrot.slane %v2558_v47, 5  ;;  %v1121_v57 = vshrl.u32 %v7378_v59, 16  ;;  %vm1416_vm3 = vcmp.ne.s16.totalorder %v7404_v18, 0  ;;  %v3631_v60 = vsel %vm7417_vm2, %v3626_v34, %v7423_v50  ;;  %v4750_v38 = vld [vmem:[#allocation2 + $0x20] sm:$0xf]  ;;  %v6986_v24 = vld [vmem:[%s10788_s1 + $0x38] sm:$0xff]  }
  0x5b   : > { %v4827_v61 = vsel %vm7417_vm2, %v4822_v43, %v4826_v51  ;;  %v1104_v62 = vor.u32 %v1103_v52, %v7404_v18  ;;  %v1120_v63 = vsel %vm7417_vm2, %v7410_v29, %v7425_v53  ;;  %v4831_v0 = vor.u32 %v4830_v55, %v4826_v51  ;;  %3942 = vrot.lane.b32.xlu1 %v3631_v60, %s7154_s29  ;;  %v2036_v47 = vld [vmem:[#allocation2 + $0x10] sm:$0xf]  ;;  %v935_v18 = vld [vmem:[#allocation2 + $0xc] sm:$0xf]  ;;  %s6450_s10 = sshll.u32 %s7299_s12, 4  ;;  %s6437_s22 = scalar_lea.sflag [#allocation6], %s7289_s23  ;;  %s10740_s10 = int_to_ptr.vmem [resolvable:$true] %s6450_s10 }
  0x5c   : > { %5170 = vst.msk [vmem:[#allocation3 + $0x8] sm:$0xf] %vm419_vm1, %v4827_v61  ;;  %v2561_v1 = vsel %vm7417_vm2, %v2556_v46, %v7427_v56  ;;  %vm7446_vm4 = vcmp.ne.s16.totalorder %v1120_v63, 0  ;;  %v4103_v4 = vsel %vm1416_vm3, 0, %v4070_v54  ;;  %v3034_v23 = vsel %vm1416_vm3, 0, %v3001_v5  ;;  %p11118_p13 = scmp.ne.s32.totalorder %s10803_s30, 0 }
  0x5d   : > { %2872 = vrot.lane.b32.xlu0 %v2561_v1, %s7158_s15  ;;  %v1105_v7 = vrot.slane %v1104_v62, 4  ;;  %v4105_v9 = vsel %vm7446_vm4, 0, %v4072_v49  ;;  %v4137_v10 = vshrl.u32 %v4103_v4, 16  ;;  %v3036_v11 = vsel %vm7446_vm4, 0, %v3003_v58  ;;  %s7159_s25 = smov [#allocation7]  }
  0x5e   : > { %v7457_v13 = vrot.slane %v4831_v0, 4  ;;  %v4151_v14 = vshrl.u32 %v4105_v9, 16  ;;  %v4154_v16 = vshll.u32 %v4105_v9, 16  ;;  %v3082_v19 = vshrl.u32 %v3036_v11, 16  ;;  %s7088_s26 = sshll.u32 %s7159_s25, 4  ;;  %s7089_s26 = int_to_ptr.vmem [resolvable:$false] %s7088_s26 }
  0x5f   : > { %v1110_v20 = vsel %vm7417_vm2, %v1105_v7, %v7324_v26  ;;  %v6567_v21 = vrot.slane %v4137_v10, 11  ;;  %v3085_v22 = vshll.u32 %v3036_v11, 16  ;;  %v3068_v30 = vshrl.u32 %v3034_v23, 16  ;;  %s7090_s16 = scalar_lea.vmem %s7089_s26, 8192  ;;  %p7091_p7 = scmp.lt.s32.totalorder %s10740_s10, %s7089_s26 }
  0x60   : > { %vm7464_vm5 = vcmp.ne.s16.totalorder %v1110_v20, 0  ;;  %v7468_v27 = vrot.slane %v4151_v14, 7  ;;  %v7470_v28 = vrot.slane %v3082_v19, 7  ;;  %v2211_v34 = vrot.slane %v7389_v2, 4  ;;  %v6985_v19 = vld [vmem:[%s10788_s1 + $0x78] sm:$0xff]  }
  0x61   : > { %v4104_v32 = vsel %vm7464_vm5, 0, %v4071_v8  ;;  %v3035_v33 = vsel %vm7464_vm5, 0, %v3002_v17  ;;  %v3634_v35 = vrot.slane %v3632_v41, 4  ;;  %v6566_v51 = vrot.slane %v3068_v30, 11  ;;  %6709 = vmatprep.subr.bf16.mxu0 %v6985_v19 }
  0x62   : > { %v4142_v43 = vshrl.u32 %v4104_v32, 16  ;;  %v4156_v44 = vor.u32 %v4154_v16, %v7468_v27  ;;  %v4145_v45 = vshll.u32 %v4104_v32, 16  ;;  %v3073_v46 = vshrl.u32 %v3035_v33, 16  ;;  %6710 = vmatpush3.bf16.msra.mxu0 %v6986_v24 }
  0x63   : > { %v3087_v49 = vor.u32 %v3085_v22, %v7470_v28  ;;  %v3076_v52 = vshll.u32 %v3035_v33, 16  ;;  %v2219_v54 = vsel %vm7396_vm15, %v2211_v34, %v7348_v39  ;;  %v3635_v2 = vor.u32 %v3634_v35, %v7423_v50 }
  0x64   : > { %v4144_v55 = vrot.slane %v4142_v43, 7  ;;  %v3075_v58 = vrot.slane %v3073_v46, 7  ;;  %vm2484_vm6 = vcmp.ne.s16.totalorder %v2219_v54, 0  ;;  %v2564_v62 = vrot.slane %v2562_v48, 4  ;;  %v6988_v54 = vld [vmem:[%s10788_s1 + $0x30] sm:$0xff]  }
  0x65   : > { %v3587_v41 = vsel %vm2484_vm6, 0, %v3554_v31  ;;  %v4783_v60 = vsel %vm2484_vm6, 0, %v4750_v38  ;;  %v2517_v61 = vsel %vm2484_vm6, 0, %v2036_v47  ;;  %v3636_v5 = vrot.slane %v3635_v2, 4  ;;  %v4751_v2 = vld [vmem:[#allocation2 + $0x24] sm:$0xf] }
  0x66   : > { %v4149_v63 = vrot.slane %v4144_v55, 4  ;;  %v4147_v0 = vor.u32 %v4145_v45, %v4144_v55  ;;  %v3080_v1 = vrot.slane %v3075_v58, 4  ;;  %v3078_v4 = vor.u32 %v3076_v52, %v3075_v58  ;;  %v3555_v58 = vld [vmem:[#allocation2 + $0x1c] sm:$0xf] }
  0x67   : > { %v3638_v7 = vshll.u32 %v3587_v41, 16  ;;  %v3642_v8 = vshrl.u32 %v3587_v41, 16  ;;  %v4834_v9 = vshll.u32 %v4783_v60, 16  ;;  %v4838_v16 = vshrl.u32 %v4783_v60, 16 }
  0x68   : > { %v4157_v10 = vsel %vm7396_vm15, %v4149_v63, %v4156_v44  ;;  %v4148_v50 = vsel %vm7396_vm15, %v6567_v21, %v4147_v0  ;;  %v3088_v11 = vsel %vm7396_vm15, %v3080_v1, %v3087_v49  ;;  %v3079_v37 = vsel %vm7396_vm15, %v6566_v51, %v3078_v4  ;;  %v6987_v44 = vld [vmem:[%s10788_s1 + $0x70] sm:$0xff]   ;;  %v3556_v63 = vld [vmem:[#allocation2 + $0x20] sm:$0xf]  ;;  %v4752_v4 = vld [vmem:[#allocation2 + $0x28] sm:$0xf] }
  0x69   : > { %4430 = vrot.lane.b32.xlu1 %v4157_v10, %s7158_s15  ;;  %4428 = vrot.lane.b32.xlu0 %v4148_v50, %s7158_s15  ;;  %v3640_v48 = vrot.slane %v3638_v7, 5  ;;  %v4836_v14 = vrot.slane %v4834_v9, 5  ;;  %v2565_v17 = vor.u32 %v2564_v62, %v7427_v56  ;;  %v2568_v20 = vshll.u32 %v2517_v61, 16 }
  0x6a   : > { %v2572_v21 = vshrl.u32 %v2517_v61, 16  ;;  %vm904_vm7 = vcmp.eq.s32.totalorder %v510_v36, 15  ;;  %v3644_v22 = vrot.slane %v3642_v8, 4  ;;  %v4840_v30 = vrot.slane %v4838_v16, 4  ;;  %6711 = vmatprep.subr.bf16.mxu0 %v6987_v44  ;;  %v2038_v44 = vld [vmem:[#allocation2 + $0x18] sm:$0xf] }
  0x6b   : > { %v4837_v23 = vsel %vm7417_vm2, %v7457_v13, %v4836_v14  ;;  %v2566_v31 = vrot.slane %v2565_v17, 4  ;;  %vm2134_vm8 = vmpackc.low %vm904_vm7, %vm904_vm7  ;;  %v457_v32 = vadd.s32 32, %v7307_v12  ;;  %v2570_v56 = vrot.slane %v2568_v20, 5  ;;  %6712 = vmatpush3.bf16.msra.mxu0 %v6988_v54 }
  0x6c   : > { %5171 = vst.msk [vmem:[#allocation3 + $0x14] sm:$0xf] %vm419_vm1, %v4837_v23  ;;  %v2166_v33 = vsel %vm2134_vm8, 65537, %v10798_v15  ;;  %v3645_v34 = vor.u32 %v3644_v22, %v3640_v48  ;;  %v2574_v35 = vrot.slane %v2572_v21, 4  ;;  %v4841_v36 = vor.u32 %v4840_v30, %v4836_v14 }
  0x6d   : > { %3361 = vrot.lane.b32.xlu1 %v3088_v11, %s7157_s14  ;;  %3359 = vrot.lane.b32.xlu0 %v3079_v37, %s7157_s14  ;;  %v2222_v13 = vshrl.u32 %v2166_v33, 16  ;;  %v2225_v38 = vshll.u32 %v2166_v33, 16  ;;  %v1123_v43 = vrot.slane %v1121_v57, 4  ;;  %v3641_v45 = vsel %vm7417_vm2, %v3636_v5, %v3640_v48  ;;  %v6989_v48 = vld [vmem:[%s10788_s1 + $0x68] sm:$0xff]  }
  0x6e   : > { %v2571_v46 = vsel %vm7417_vm2, %v2566_v31, %v2570_v56  ;;  %v7521_v47 = vrot.slane %v3645_v34, 4  ;;  %v2575_v49 = vor.u32 %v2574_v35, %v2570_v56  ;;  %v4158_v59 = vrot.slane %v7468_v27, 4  ;;  %6713 = vmatprep.subr.bf16.mxu0 %v6989_v48  ;;  %v2037_v56 = vld [vmem:[#allocation2 + $0x14] sm:$0xf] }
  0x6f   : > { %v2224_v51 = vrot.slane %v2222_v13, 7  ;;  %v1124_v52 = vor.u32 %v1123_v43, %v7425_v53  ;;  %v517_v57 = vand.u32 15, %v457_v32  ;;  %v4842_v55 = vrot.slane %v4841_v36, 4  ;;  %v6995_v27 = vld [vmem:[%s10788_s1 + $0x50] sm:$0xff]  }
  0x70   : > { %v7528_v41 = vrot.slane %v2575_v49, 4  ;;  %v7531_v60 = vadd.s32 40, %v7307_v12  ;;  %v7534_v61 = vadd.s32 48, %v7307_v12  ;;  %v3089_v5 = vrot.slane %v7470_v28, 4  ;;  %v4753_v28 = vld [vmem:[#allocation2 + $0x2c] sm:$0xf] }
  0x71   : > { %3944 = vrot.lane.b32.xlu1 %v3641_v45, %s7154_s29  ;;  %v2227_v53 = vor.u32 %v2225_v38, %v2224_v51  ;;  %v2229_v62 = vrot.slane %v2224_v51, 4  ;;  %v1125_v0 = vrot.slane %v1124_v52, 4  ;;  %vm7537_vm9 = vcmp.eq.s32.totalorder %v517_v57, 0 }
  0x72   : > { %vm1034_vm10 = vmpackc.low %vm7537_vm9, %vm7537_vm9  ;;  %v524_v7 = vand.u32 15, %v7531_v60  ;;  %v531_v8 = vand.u32 15, %v7534_v61  ;;  %v7548_v9 = vadd.s32 56, %v7307_v12  ;;  %v7560_v37 = vadd.s32 64, %v7307_v12  ;;  %v1845_v61 = vld [vmem:[#allocation2 + $0x18] sm:$0xf] }
  0x73   : > { %v2228_v10 = vsel %vm7396_vm15, %v7350_v40, %v2227_v53  ;;  %v2237_v50 = vsel %vm7396_vm15, %v2229_v62, %v7348_v39  ;;  %v1130_v11 = vsel %vm7417_vm2, %v1125_v0, %v7324_v26  ;;  %v7574_v17 = vsel %vm1034_vm10, 65537, %v10798_v15 }
  0x74   : > { %vm7565_vm11 = vcmp.ne.s16.totalorder %v2228_v10, 0  ;;  %vm2486_vm12 = vcmp.ne.s16.totalorder %v2237_v50, 0  ;;  %vm7569_vm13 = vcmp.ne.s16.totalorder %v1130_v11, 0  ;;  %v1137_v24 = vshll.u32 %v7574_v17, 16 }
  0x75   : > { %2874 = vrot.lane.b32.xlu1 %v2571_v46, %s7158_s15  ;;  %v3588_v19 = vsel %vm7565_vm11, 0, %v3555_v58  ;;  %v4784_v20 = vsel %vm7565_vm11, 0, %v4751_v2  ;;  %v7582_v21 = vsel %vm2486_vm12, 0, %v3556_v63  ;;  %v4785_v22 = vsel %vm2486_vm12, 0, %v4752_v4  ;;  %v4073_v2 = vld [vmem:[#allocation2 + $0x20] sm:$0xf] }
  0x76   : > { %v3648_v23 = vshll.u32 %v3588_v19, 16  ;;  %v3652_v30 = vshrl.u32 %v3588_v19, 16  ;;  %v4844_v31 = vshll.u32 %v4784_v20, 16  ;;  %v4848_v32 = vshrl.u32 %v4784_v20, 16  ;;  %v3004_v19 = vld [vmem:[#allocation2 + $0x18] sm:$0xf] }
  0x77   : > { %v3658_v33 = vshll.u32 %v7582_v21, 16  ;;  %v4854_v34 = vshll.u32 %v4785_v22, 16  ;;  %v4858_v35 = vshrl.u32 %v4785_v22, 16  ;;  %v2518_v51 = vsel %vm7565_vm11, 0, %v2037_v56 }
  0x78   : > { %v3650_v36 = vrot.slane %v3648_v23, 5  ;;  %v4846_v13 = vrot.slane %v4844_v31, 5  ;;  %v4850_v38 = vrot.slane %v4848_v32, 4  ;;  %v3654_v43 = vrot.slane %v3652_v30, 4 }
  0x79   : > { %v7587_v45 = vrot.slane %v3658_v33, 5  ;;  %v7589_v46 = vrot.slane %v4854_v34, 5  ;;  %v7591_v49 = vrot.slane %v4858_v35, 4  ;;  %v3662_v53 = vshrl.u32 %v7582_v21, 16  ;;  %v4074_v34 = vld [vmem:[#allocation2 + $0x24] sm:$0xf] }
  0x7a   : > { %v3651_v52 = vsel %vm7417_vm2, %v7521_v47, %v3650_v36  ;;  %v4847_v57 = vsel %vm7417_vm2, %v4842_v55, %v4846_v13  ;;  %v4851_v54 = vor.u32 %v4850_v38, %v4846_v13  ;;  %v3655_v58 = vor.u32 %v3654_v43, %v3650_v36  ;;  %v6990_v47 = vld [vmem:[%s10788_s1 + $0x28] sm:$0xff]   ;;  %v3005_v38 = vld [vmem:[#allocation2 + $0x1c] sm:$0xf]  ;;  %v3557_v21 = vld [vmem:[#allocation2 + $0x24] sm:$0xf] }
  0x7b   : > { %5172 = vst.msk [vmem:[#allocation3 + $0x20] sm:$0xf] %vm419_vm1, %v4847_v57  ;;  %3946 = vrot.lane.b32.xlu0 %v3651_v52, %s7154_s29  ;;  %v2578_v62 = vshll.u32 %v2518_v51, 16  ;;  %v2582_v63 = vshrl.u32 %v2518_v51, 16  ;;  %v7604_v0 = vsel %vm2486_vm12, 0, %v2038_v44  ;;  %v4861_v4 = vor.u32 %v7591_v49, %v7589_v46  ;;  %6714 = vmatpush3.bf16.msra.mxu0 %v6990_v47  ;;  %v6992_v57 = vld [vmem:[%s10788_s1 + $0x20] sm:$0xff]  }
  0x7c   : > { %v4852_v1 = vrot.slane %v4851_v54, 4  ;;  %v3656_v55 = vrot.slane %v3655_v58, 4  ;;  %v2588_v10 = vshll.u32 %v7604_v0, 16  ;;  %v2592_v14 = vshrl.u32 %v7604_v0, 16 }
  0x7d   : > { %v2580_v11 = vrot.slane %v2578_v62, 5  ;;  %v2584_v48 = vrot.slane %v2582_v63, 4  ;;  %v4106_v50 = vsel %vm7569_vm13, 0, %v4073_v2  ;;  %v7628_v33 = vrot.slane %v1137_v24, 5  ;;  %v6993_v63 = vld [vmem:[%s10788_s1 + $0x58] sm:$0xff]  }
  0x7e   : > { %v3661_v20 = vsel %vm7417_vm2, %v3656_v55, %v7587_v45  ;;  %v4857_v22 = vsel %vm7417_vm2, %v4852_v1, %v7589_v46  ;;  %v7621_v23 = vrot.slane %v2588_v10, 5  ;;  %v4160_v30 = vshrl.u32 %v4106_v50, 16  ;;  %v6994_v10 = vld [vmem:[%s10788_s1 + $0x18] sm:$0xff]  }
  0x7f   : > { %5173 = vst.msk [vmem:[#allocation3 + $0x2c] sm:$0xf] %vm419_vm1, %v4857_v22  ;;  %3948 = vrot.lane.b32.xlu1 %v3661_v20, %s7154_s29  ;;  %v2581_v31 = vsel %vm7417_vm2, %v7528_v41, %v2580_v11  ;;  %v2585_v32 = vor.u32 %v2584_v48, %v2580_v11  ;;  %v4163_v56 = vshll.u32 %v4106_v50, 16  ;;  %v1141_v36 = vshrl.u32 %v7574_v17, 16  ;;  %v6991_v17 = vld [vmem:[%s10788_s1 + $0x60] sm:$0xff]  }
  0x80   : > { %2876 = vrot.lane.b32.xlu0 %v2581_v31, %s7158_s15  ;;  %v7631_v35 = vrot.slane %v4160_v30, 7  ;;  %v3037_v13 = vsel %vm7569_vm13, 0, %v3004_v19  ;;  %vm906_vm14 = vcmp.eq.s32.totalorder %v524_v7, 15  ;;  %v1140_v41 = vsel %vm7417_vm2, %v7410_v29, %v7628_v33  ;;  %6715 = vmatprep.subr.bf16.mxu0 %v6991_v17 }
  0x81   : > { %v2586_v43 = vrot.slane %v2585_v32, 4  ;;  %v3091_v24 = vshrl.u32 %v3037_v13, 16  ;;  %v3094_v44 = vshll.u32 %v3037_v13, 16  ;;  %vm2136_vm0 = vmpackc.low %vm906_vm14, %vm906_vm14  ;;  %vm7646_vm6 = vcmp.ne.s16.totalorder %v1140_v41, 0  ;;  %6716 = vmatpush3.bf16.msra.mxu0 %v6992_v57  ;;  %v3558_v41 = vld [vmem:[#allocation2 + $0x28] sm:$0xf] }
  0x82   : > { %v4165_v51 = vor.u32 %v4163_v56, %v7631_v35  ;;  %v4167_v60 = vrot.slane %v7631_v35, 4  ;;  %v2168_v7 = vsel %vm2136_vm0, 65537, %v10798_v15  ;;  %v4107_v58 = vsel %vm7646_vm6, 0, %v4074_v34  ;;  %6717 = vmatprep.subr.bf16.mxu0 %v6993_v63  ;;  %v6998_v57 = vld [vmem:[%s10788_s1 + $0x8] sm:$0xff]  }
  0x83   : > { %v2591_v54 = vsel %vm7417_vm2, %v2586_v43, %v7621_v23  ;;  %v3093_v2 = vrot.slane %v3091_v24, 7  ;;  %v3038_v62 = vsel %vm7646_vm6, 0, %v3005_v38  ;;  %v4169_v47 = vshrl.u32 %v4107_v58, 16  ;;  %v4558_v43 = vld [vmem:[#allocation2 + $0x20] sm:$0xf] }
  0x84   : > { %2878 = vrot.lane.b32.xlu1 %v2591_v54, %s7158_s15  ;;  %v4166_v0 = vsel %vm7396_vm15, %v4158_v59, %v4165_v51  ;;  %v4172_v1 = vshll.u32 %v4107_v58, 16  ;;  %v3100_v55 = vshrl.u32 %v3038_v62, 16  ;;  %v3103_v50 = vshll.u32 %v3038_v62, 16  ;;  %v4754_v24 = vld [vmem:[#allocation2 + $0x30] sm:$0xf] }
  0x85   : > { %4432 = vrot.lane.b32.xlu0 %v4166_v0, %s7158_s15  ;;  %v3096_v11 = vor.u32 %v3094_v44, %v3093_v2  ;;  %v3098_v48 = vrot.slane %v3093_v2, 4  ;;  %v2240_v19 = vshrl.u32 %v2168_v7, 16  ;;  %v7677_v59 = vrot.slane %v4169_v47, 7  ;;  %6718 = vmatpush3.bf16.msra.mxu0 %v6994_v10  ;;  %v2039_v54 = vld [vmem:[#allocation2 + $0x1c] sm:$0xf] }
  0x86   : > { %v7679_v20 = vrot.slane %v3100_v55, 7  ;;  %v2243_v22 = vshll.u32 %v2168_v7, 16  ;;  %v3664_v30 = vrot.slane %v3662_v53, 4  ;;  %v2594_v56 = vrot.slane %v2592_v14, 4  ;;  %v6996_v14 = vld [vmem:[%s10788_s1 + $0x10] sm:$0xff]   ;;  %6719 = vmatprep.subr.bf16.mxu0 %v6995_v27 }
  0x87   : > { %v3097_v31 = vsel %vm7396_vm15, %v3089_v5, %v3096_v11  ;;  %v2242_v32 = vrot.slane %v2240_v19, 7  ;;  %v1143_v34 = vrot.slane %v1141_v36, 4  ;;  %v7690_v35 = vrot.slane %v4861_v4, 4  ;;  %v3488_v5 = vld [vmem:[#allocation2 + $0x10] sm:$0xf] }
  0x88   : > { %v4174_v13 = vor.u32 %v4172_v1, %v7677_v59  ;;  %v3105_v38 = vor.u32 %v3103_v50, %v7679_v20  ;;  %v3665_v53 = vor.u32 %v3664_v30, %v7587_v45  ;;  %v2595_v4 = vor.u32 %v2594_v56, %v7621_v23  ;;  %3520 = vst.msk [vmem:[#allocation3 + $0x4] sm:$0xf] %vm419_vm1, %v3488_v5  ;;  %v6997_v45 = vld [vmem:[%s10788_s1 + $0x48] sm:$0xff]   ;;  %v4559_v1 = vld [vmem:[#allocation2 + $0x24] sm:$0xf] }
  0x89   : > { %3363 = vrot.lane.b32.xlu0 %v3097_v31, %s7157_s14  ;;  %v2245_v46 = vor.u32 %v2243_v22, %v2242_v32  ;;  %v2247_v49 = vrot.slane %v2242_v32, 4  ;;  %v1144_v36 = vor.u32 %v1143_v34, %v7628_v33  ;;  %v4176_v51 = vrot.slane %v7677_v59, 4  ;;  %6720 = vmatpush3.bf16.msra.mxu0 %v6996_v14  ;;  %v2040_v34 = vld [vmem:[#allocation2 + $0x20] sm:$0xf]  ;;  %v4075_v14 = vld [vmem:[#allocation2 + $0x28] sm:$0xf] }
  0x8a   : > { %v4175_v44 = vsel %vm7396_vm15, %v4167_v60, %v4174_v13  ;;  %v3106_v17 = vsel %vm7396_vm15, %v3098_v48, %v3105_v38  ;;  %vm875_vm7 = vcmp.eq.s32.totalorder %v531_v8, 0  ;;  %v3666_v33 = vrot.slane %v3665_v53, 4  ;;  %6721 = vmatprep.subr.bf16.mxu0 %v6997_v45  ;;  %v1846_v53 = vld [vmem:[#allocation2 + $0x1c] sm:$0xf] }
  0x8b   : > { %4434 = vrot.lane.b32.xlu1 %v4175_v44, %s7158_s15  ;;  %v2246_v23 = vsel %vm7396_vm15, %v7350_v40, %v2245_v46  ;;  %v2255_v7 = vsel %vm7396_vm15, %v2247_v49, %v7348_v39  ;;  %v7719_v60 = vrot.slane %v2595_v4, 4  ;;  %vm1036_vm8 = vmpackc.low %vm875_vm7, %vm875_vm7  ;;  %v1145_v58 = vrot.slane %v1144_v36, 4 }
  0x8c   : > { %vm7724_vm9 = vcmp.ne.s16.totalorder %v2246_v23, 0  ;;  %vm2488_vm10 = vcmp.ne.s16.totalorder %v2255_v7, 0  ;;  %v7729_v2 = vsel %vm1036_vm8, 65537, %v10798_v15  ;;  %v3107_v22 = vrot.slane %v7679_v20, 4  ;;  %v6999_v7 = vld [vmem:[%s10788_s1 + $0x40] sm:$0xff]  }
  0x8d   : > { %4624 = vrot.lane.b32.xlu0 %v4558_v43, %s7157_s14  ;;  %v3590_v62 = vsel %vm7724_vm9, 0, %v3557_v21  ;;  %v4786_v63 = vsel %vm7724_vm9, 0, %v4753_v28  ;;  %v7737_v0 = vsel %vm2488_vm10, 0, %v3558_v41  ;;  %v4787_v47 = vsel %vm2488_vm10, 0, %v4754_v24  ;;  %6722 = vmatpush3.bf16.msra.mxu0 %v6998_v57 }
  0x8e   : > { %v3668_v55 = vshll.u32 %v3590_v62, 16  ;;  %v3672_v10 = vshrl.u32 %v3590_v62, 16  ;;  %v4864_v11 = vshll.u32 %v4786_v63, 16  ;;  %v4868_v48 = vshrl.u32 %v4786_v63, 16  ;;  %6723 = vmatprep.subr.bf16.mxu0 %v6999_v7  ;;  %v3491_v7 = vld [vmem:[#allocation2 + $0x1c] sm:$0xf] }
  0x8f   : > { %3365 = vrot.lane.b32.xlu1 %v3106_v17, %s7157_s14  ;;  %v3678_v50 = vshll.u32 %v7737_v0, 16  ;;  %v4874_v19 = vshll.u32 %v4787_v47, 16  ;;  %v4878_v27 = vshrl.u32 %v4787_v47, 16  ;;  %v2520_v21 = vsel %vm7724_vm9, 0, %v2039_v54  ;;  %v3489_v54 = vld [vmem:[#allocation2 + $0x14] sm:$0xf] }
  0x90   : > { %v3670_v30 = vrot.slane %v3668_v55, 5  ;;  %v4866_v31 = vrot.slane %v4864_v11, 5  ;;  %v4870_v32 = vrot.slane %v4868_v48, 4  ;;  %v3674_v56 = vrot.slane %v3672_v10, 4  ;;  %3521 = vst.msk [vmem:[#allocation3 + $0x10] sm:$0xf] %vm419_vm1, %v3489_v54 }
  0x91   : > { %1913 = vrot.lane.b32.xlu0 %v1845_v61, %s7154_s29  ;;  %v7744_v13 = vrot.slane %v3678_v50, 5  ;;  %v4876_v38 = vrot.slane %v4874_v19, 5  ;;  %v4880_v43 = vrot.slane %v4878_v27, 4  ;;  %v3682_v46 = vshrl.u32 %v7737_v0, 16  ;;  %v4076_v19 = vld [vmem:[#allocation2 + $0x2c] sm:$0xf] }
  0x92   : > { %v3671_v28 = vsel %vm7417_vm2, %v3666_v33, %v3670_v30  ;;  %v4867_v41 = vsel %vm7417_vm2, %v7690_v35, %v4866_v31  ;;  %v4871_v24 = vor.u32 %v4870_v32, %v4866_v31  ;;  %v3675_v5 = vor.u32 %v3674_v56, %v3670_v30  ;;  %v3006_v33 = vld [vmem:[#allocation2 + $0x20] sm:$0xf]  ;;  %v3007_v56 = vld [vmem:[#allocation2 + $0x24] sm:$0xf]  ;;  %3523 = vst.msk [vmem:[#allocation3 + $0x28] sm:$0xf] %vm419_vm1, %v3491_v7 }
  0x93   : > { %4626 = vrot.lane.b32.xlu1 %v4559_v1, %s7157_s14  ;;  %5174 = vst.msk [vmem:[#allocation3 + $0x38] sm:$0xf] %vm419_vm1, %v4867_v41  ;;  %v2598_v49 = vshll.u32 %v2520_v21, 16  ;;  %v2602_v4 = vshrl.u32 %v2520_v21, 16  ;;  %v2521_v36 = vsel %vm2488_vm10, 0, %v2040_v34  ;;  %v4881_v17 = vor.u32 %v4880_v43, %v4876_v38 }
  0x94   : > { %v4872_v45 = vrot.slane %v4871_v24, 4  ;;  %v3676_v44 = vrot.slane %v3675_v5, 4  ;;  %v2608_v23 = vshll.u32 %v2521_v36, 16  ;;  %v2612_v61 = vshrl.u32 %v2521_v36, 16 }
  0x95   : > { %3950 = vrot.lane.b32.xlu0 %v3671_v28, %s7154_s29  ;;  %v2600_v35 = vrot.slane %v2598_v49, 5  ;;  %v2604_v57 = vrot.slane %v2602_v4, 4  ;;  %v1150_v8 = vsel %vm7417_vm2, %v1145_v58, %v7324_v26  ;;  %v1157_v10 = vshll.u32 %v7729_v2, 16  ;;  %v7000_v49 = vld [vmem:[%s10788_s1 + $0x88] sm:$0xff]  }
  0x96   : > { %v3681_v62 = vsel %vm7417_vm2, %v3676_v44, %v7744_v13  ;;  %v4877_v63 = vsel %vm7417_vm2, %v4872_v45, %v4876_v38  ;;  %v7769_v0 = vrot.slane %v2608_v23, 5  ;;  %vm7771_vm11 = vcmp.ne.s16.totalorder %v1150_v8, 0  ;;  %6857 = vmatprep.subr.bf16.mxu1 %v7000_v49 }
  0x97   : > { %1915 = vrot.lane.b32.xlu1 %v1846_v53, %s7154_s29  ;;  %5175 = vst.msk [vmem:[#allocation3 + $0x44] sm:$0xf] %vm419_vm1, %v4877_v63  ;;  %v2601_v58 = vsel %vm7417_vm2, %v7719_v60, %v2600_v35  ;;  %v2605_v1 = vor.u32 %v2604_v57, %v2600_v35  ;;  %v4108_v55 = vsel %vm7771_vm11, 0, %v4075_v14  ;;  %v1161_v50 = vshrl.u32 %v7729_v2, 16  ;;  %v3490_v53 = vld [vmem:[#allocation2 + $0x18] sm:$0xf]  ;;  %6858 = vmatpush3.bf16.msra.mxu1 %v7000_v49 }
  0x98   : > { %v4178_v11 = vshrl.u32 %v4108_v55, 16  ;;  %v4181_v48 = vshll.u32 %v4108_v55, 16  ;;  %v3039_v27 = vsel %vm7771_vm11, 0, %v3006_v33  ;;  %v1159_v31 = vrot.slane %v1157_v10, 5  ;;  %3522 = vst.msk [vmem:[#allocation3 + $0x1c] sm:$0xf] %vm419_vm1, %v3490_v53 }
  0x99   : > { %2880 = vrot.lane.b32.xlu0 %v2601_v58, %s7158_s15  ;;  %v2606_v30 = vrot.slane %v2605_v1, 4  ;;  %v3109_v60 = vshrl.u32 %v3039_v27, 16  ;;  %v3112_v32 = vshll.u32 %v3039_v27, 16  ;;  %v7788_v34 = vrot.slane %v4881_v17, 4  ;;  %v7001_v17 = vld [vmem:[%s10788_s1] sm:$0xff]  }
  0x9a   : > { %v4180_v38 = vrot.slane %v4178_v11, 7  ;;  %v538_v43 = vand.u32 15, %v7548_v9  ;;  %v3684_v21 = vrot.slane %v3682_v46, 4  ;;  %v1160_v28 = vsel %vm7417_vm2, %v7410_v29, %v1159_v31  ;;  %6724 = vmatpush3.bf16.msra.mxu0 %v7001_v17  ;;  %v4560_v11 = vld [vmem:[#allocation2 + $0x28] sm:$0xf] }
  0x9b   : > { %3952 = vrot.lane.b32.xlu1 %v3681_v62, %s7154_s29  ;;  %v2611_v2 = vsel %vm7417_vm2, %v2606_v30, %v7769_v0  ;;  %v3111_v41 = vrot.slane %v3109_v60, 7  ;;  %v2614_v24 = vrot.slane %v2612_v61, 4  ;;  %vm7799_vm12 = vcmp.ne.s16.totalorder %v1160_v28, 0  ;;  %v3559_v27 = vld [vmem:[#allocation2 + $0x2c] sm:$0xf] }
  0x9c   : > { %v4183_v5 = vor.u32 %v4181_v48, %v4180_v38  ;;  %vm7803_vm14 = vcmp.eq.s32.totalorder %v538_v43, 15  ;;  %v1163_v46 = vrot.slane %v1161_v50, 4  ;;  %v4109_v4 = vsel %vm7799_vm12, 0, %v4076_v19  ;;  %v4077_v19 = vld [vmem:[#allocation2 + $0x30] sm:$0xf] }
  0x9d   : > { %v4185_v36 = vrot.slane %v4180_v38, 4  ;;  %v3114_v45 = vor.u32 %v3112_v32, %v3111_v41  ;;  %v3040_v44 = vsel %vm7799_vm12, 0, %v3007_v56  ;;  %vm2138_vm0 = vmpackc.low %vm7803_vm14, %vm7803_vm14  ;;  %v4187_v33 = vshrl.u32 %v4109_v4, 16  ;;  %v4755_v30 = vld [vmem:[#allocation2 + $0x34] sm:$0xf] }
  0x9e   : > { %v4184_v23 = vsel %vm7396_vm15, %v4176_v51, %v4183_v5  ;;  %v4190_v35 = vshll.u32 %v4109_v4, 16  ;;  %v3118_v57 = vshrl.u32 %v3040_v44, 16  ;;  %v3121_v8 = vshll.u32 %v3040_v44, 16  ;;  %v3560_v60 = vld [vmem:[#allocation2 + $0x30] sm:$0xf] }
  0x9f   : > { %2882 = vrot.lane.b32.xlu1 %v2611_v2, %s7158_s15  ;;  %4436 = vrot.lane.b32.xlu0 %v4184_v23, %s7158_s15  ;;  %v3115_v61 = vsel %vm7396_vm15, %v3107_v22, %v3114_v45  ;;  %v2170_v54 = vsel %vm2138_vm0, 65537, %v10798_v15  ;;  %v3685_v59 = vor.u32 %v3684_v21, %v7744_v13  ;;  %v7832_v51 = vrot.slane %v4187_v33, 7  ;;  %v4756_v32 = vld [vmem:[#allocation2 + $0x38] sm:$0xf]  ;;  %v1847_v5 = vld [vmem:[#allocation2 + $0x20] sm:$0xf] }
  0xa0   : > { %v7834_v62 = vrot.slane %v3118_v57, 7  ;;  %v2258_v63 = vshrl.u32 %v2170_v54, 16  ;;  %v2261_v58 = vshll.u32 %v2170_v54, 16  ;;  %v3116_v20 = vrot.slane %v3111_v41, 4  ;;  %v2041_v45 = vld [vmem:[#allocation2 + $0x24] sm:$0xf] }
  0xa1   : > { %v2615_v1 = vor.u32 %v2614_v24, %v7769_v0  ;;  %v1164_v22 = vor.u32 %v1163_v46, %v1159_v31  ;;  %v545_v55 = vand.u32 15, %v7560_v37  ;;  %v4192_v10 = vor.u32 %v4190_v35, %v7832_v51  ;;  %v7005_v24 = vld [vmem:[%s10788_s1 + $0x80] sm:$0xff]   ;;  %v4561_v23 = vld [vmem:[#allocation2 + $0x2c] sm:$0xf] }
  0xa2   : > { %v3123_v13 = vor.u32 %v3121_v8, %v7834_v62  ;;  %v2260_v48 = vrot.slane %v2258_v63, 7  ;;  %v7841_v50 = vrot.slane %v3685_v59, 4  ;;  %v4194_v37 = vrot.slane %v7832_v51, 4  ;;  %6859 = vmatprep.subr.bf16.mxu1 %v7005_v24  ;;  %v2042_v63 = vld [vmem:[#allocation2 + $0x28] sm:$0xf] }
  0xa3   : > { %3367 = vrot.lane.b32.xlu0 %v3115_v61, %s7157_s14  ;;  %v7844_v56 = vrot.slane %v2615_v1, 4  ;;  %v1165_v0 = vrot.slane %v1164_v22, 4  ;;  %vm877_vm7 = vcmp.eq.s32.totalorder %v545_v55, 0  ;;  %v4193_v31 = vsel %vm7396_vm15, %v4185_v36, %v4192_v10  ;;  %6860 = vmatpush3.bf16.msra.mxu1 %v7005_v24 }
  0xa4   : > { %v2263_v38 = vor.u32 %v2261_v58, %v2260_v48  ;;  %v2265_v43 = vrot.slane %v2260_v48, 4  ;;  %vm1038_vm8 = vmpackc.low %vm877_vm7, %vm877_vm7  ;;  %v3125_v21 = vrot.slane %v7834_v62, 4  ;;  %4438 = vrot.lane.b32.xlu1 %v4193_v31, %s7158_s15  ;;  %v3124_v53 = vsel %vm7396_vm15, %v3116_v20, %v3123_v13 }
  0xa5   : > { %v1170_v2 = vsel %vm7417_vm2, %v1165_v0, %v7324_v26  ;;  %v7857_v28 = vsel %vm1038_vm8, 65537, %v10798_v15  ;;  %v7860_v41 = vadd.s32 72, %v7307_v12 }
  0xa6   : > { %v2264_v9 = vsel %vm7396_vm15, %v7350_v40, %v2263_v38  ;;  %v2273_v46 = vsel %vm7396_vm15, %v2265_v43, %v7348_v39  ;;  %vm7871_vm9 = vcmp.ne.s16.totalorder %v1170_v2, 0  ;;  %v1177_v4 = vshll.u32 %v7857_v28, 16  ;;  %v1848_v38 = vld [vmem:[#allocation2 + $0x24] sm:$0xf] }
  0xa7   : > { %4628 = vrot.lane.b32.xlu0 %v4560_v11, %s7157_s14  ;;  %vm7877_vm10 = vcmp.ne.s16.totalorder %v2264_v9, 0  ;;  %vm2490_vm14 = vcmp.ne.s16.totalorder %v2273_v46, 0  ;;  %v7883_v44 = vsel %vm7871_vm9, 0, %v4077_v19  ;;  %v1181_v17 = vshrl.u32 %v7857_v28, 16 }
  0xa8   : > { %v3592_v33 = vsel %vm7877_vm10, 0, %v3559_v27  ;;  %v4788_v35 = vsel %vm7877_vm10, 0, %v4755_v30  ;;  %v3593_v57 = vsel %vm2490_vm14, 0, %v3560_v60  ;;  %v4789_v61 = vsel %vm2490_vm14, 0, %v4756_v32  ;;  %3369 = vrot.lane.b32.xlu1 %v3124_v53, %s7157_s14 }
  0xa9   : > { %v3688_v8 = vshll.u32 %v3592_v33, 16  ;;  %v3692_v54 = vshrl.u32 %v3592_v33, 16  ;;  %v4884_v59 = vshll.u32 %v4788_v35, 16  ;;  %v4888_v7 = vshrl.u32 %v4788_v35, 16  ;;  %v3008_v35 = vld [vmem:[#allocation2 + $0x28] sm:$0xf] }
  0xaa   : > { %v3698_v58 = vshll.u32 %v3593_v57, 16  ;;  %v3702_v20 = vshrl.u32 %v3593_v57, 16  ;;  %v4894_v1 = vshll.u32 %v4789_v61, 16  ;;  %v4898_v22 = vshrl.u32 %v4789_v61, 16 }
  0xab   : > { %1917 = vrot.lane.b32.xlu0 %v1847_v5, %s7154_s29  ;;  %v3690_v55 = vrot.slane %v3688_v8, 5  ;;  %v4886_v10 = vrot.slane %v4884_v59, 5  ;;  %v4890_v13 = vrot.slane %v4888_v7, 4  ;;  %v3694_v11 = vrot.slane %v3692_v54, 4  ;;  %v3492_v54 = vld [vmem:[#allocation2 + $0x20] sm:$0xf] }
  0xac   : > { %v7894_v48 = vrot.slane %v3698_v58, 5  ;;  %v4896_v19 = vrot.slane %v4894_v1, 5  ;;  %v4900_v27 = vrot.slane %v4898_v22, 4  ;;  %v2522_v30 = vsel %vm7877_vm10, 0, %v2041_v45  ;;  %4630 = vrot.lane.b32.xlu1 %v4561_v23, %s7157_s14  ;;  %v4078_v1 = vld [vmem:[#allocation2 + $0x34] sm:$0xf] }
  0xad   : > { %v3691_v60 = vsel %vm7417_vm2, %v7841_v50, %v3690_v55  ;;  %v4887_v32 = vsel %vm7417_vm2, %v7788_v34, %v4886_v10  ;;  %v4891_v0 = vor.u32 %v4890_v13, %v4886_v10  ;;  %v3695_v31 = vor.u32 %v3694_v11, %v3690_v55  ;;  %3524 = vst.msk [vmem:[#allocation3 + $0x34] sm:$0xf] %vm419_vm1, %v3492_v54  ;;  %v3493_v22 = vld [vmem:[#allocation2 + $0x24] sm:$0xf]  ;;  %v3009_v55 = vld [vmem:[#allocation2 + $0x2c] sm:$0xf] }
  0xae   : > { %5176 = vst.msk [vmem:[#allocation3 + $0x50] sm:$0xf] %vm419_vm1, %v4887_v32  ;;  %v4901_v43 = vor.u32 %v4900_v27, %v4896_v19  ;;  %v2618_v53 = vshll.u32 %v2522_v30, 16  ;;  %v2622_v2 = vshrl.u32 %v2522_v30, 16  ;;  %v2523_v24 = vsel %vm2490_vm14, 0, %v2042_v63 }
  0xaf   : > { %v4892_v5 = vrot.slane %v4891_v0, 4  ;;  %3954 = vrot.lane.b32.xlu0 %v3691_v60, %s7154_s29  ;;  %v3696_v9 = vrot.slane %v3695_v31, 4  ;;  %v2628_v36 = vshll.u32 %v2523_v24, 16  ;;  %v2632_v50 = vshrl.u32 %v2523_v24, 16  ;;  %3525 = vst.msk [vmem:[#allocation3 + $0x40] sm:$0xf] %vm419_vm1, %v3493_v22 }
  0xb0   : > { %v7908_v45 = vrot.slane %v4901_v43, 4  ;;  %v2620_v23 = vrot.slane %v2618_v53, 5  ;;  %v2624_v34 = vrot.slane %v2622_v2, 4  ;;  %v4196_v33 = vshrl.u32 %v7883_v44, 16  ;;  %1919 = vrot.lane.b32.xlu1 %v1848_v38, %s7154_s29  ;;  %v933_v24 = vld [vmem:[#allocation2 + $0x4] sm:$0x8] }
  0xb1   : > { %v3701_v46 = vsel %vm7417_vm2, %v3696_v9, %v7894_v48  ;;  %v4897_v57 = vsel %vm7417_vm2, %v4892_v5, %v4896_v19  ;;  %v2630_v61 = vrot.slane %v2628_v36, 5  ;;  %v4199_v8 = vshll.u32 %v7883_v44, 16  ;;  %v934_v5 = vld [vmem:[#allocation2 + $0x8] sm:$0xf] }
  0xb2   : > { %5177 = vst.msk [vmem:[#allocation3 + $0x5c] sm:$0xf] %vm419_vm1, %v4897_v57  ;;  %v2621_v59 = vsel %vm7417_vm2, %v7844_v56, %v2620_v23  ;;  %v2625_v7 = vor.u32 %v2624_v34, %v2620_v23  ;;  %v4198_v63 = vrot.slane %v4196_v33, 7  ;;  %v7924_v58 = vrot.slane %v1177_v4, 5 }
  0xb3   : > { %2884 = vrot.lane.b32.xlu0 %v2621_v59, %s7158_s15  ;;  %v3041_v44 = vsel %vm7871_vm9, 0, %v3008_v35  ;;  %v552_v10 = vand.u32 15, %v7860_v41  ;;  %v3704_v13 = vrot.slane %v3702_v20, 4  ;;  %v2634_v56 = vrot.slane %v2632_v50, 4  ;;  %v3494_v35 = vld [vmem:[#allocation2 + $0x28] sm:$0xf] }
  0xb4   : > { %v2626_v11 = vrot.slane %v2625_v7, 4  ;;  %v4201_v19 = vor.u32 %v4199_v8, %v4198_v63  ;;  %v1180_v4 = vsel %vm7417_vm2, %v7410_v29, %v7924_v58  ;;  %v4203_v27 = vrot.slane %v4198_v63, 4  ;;  %3956 = vrot.lane.b32.xlu1 %v3701_v46, %s7154_s29  ;;  %3526 = vst.msk [vmem:[#allocation3 + $0x4c] sm:$0xf] %vm419_vm1, %v3494_v35  ;;  %v4562_v7 = vld [vmem:[#allocation2 + $0x30] sm:$0xf] }
  0xb5   : > { %vm7937_vm0 = vcmp.ne.s16.totalorder %v1180_v4, 0  ;;  %v3127_v60 = vshrl.u32 %v3041_v44, 16  ;;  %v3130_v41 = vshll.u32 %v3041_v44, 16  ;;  %vm910_vm7 = vcmp.eq.s32.totalorder %v552_v10, 15  ;;  %v4757_v10 = vld [vmem:[#allocation2 + $0x3c] sm:$0xf] }
  0xb6   : > { %v2631_v20 = vsel %vm7417_vm2, %v2626_v11, %v2630_v61  ;;  %v4202_v32 = vsel %vm7396_vm15, %v4194_v37, %v4201_v19  ;;  %v4111_v0 = vsel %vm7937_vm0, 0, %v4078_v1  ;;  %v3042_v31 = vsel %vm7937_vm0, 0, %v3009_v55  ;;  %vm2140_vm8 = vmpackc.low %vm910_vm7, %vm910_vm7  ;;  %v3495_v55 = vld [vmem:[#allocation2 + $0x2c] sm:$0xf]  ;;  %v3562_v4 = vld [vmem:[#allocation2 + $0x38] sm:$0xf] }
  0xb7   : > { %4440 = vrot.lane.b32.xlu0 %v4202_v32, %s7158_s15  ;;  %v4205_v38 = vshrl.u32 %v4111_v0, 16  ;;  %v4208_v43 = vshll.u32 %v4111_v0, 16  ;;  %v3129_v53 = vrot.slane %v3127_v60, 7  ;;  %v3136_v2 = vshrl.u32 %v3042_v31, 16  ;;  %3527 = vst.msk [vmem:[#allocation3 + $0x58] sm:$0xf] %vm419_vm1, %v3495_v55 }
  0xb8   : > { %v3139_v9 = vshll.u32 %v3042_v31, 16  ;;  %v2172_v51 = vsel %vm2140_vm8, 65537, %v10798_v15  ;;  %v3705_v37 = vor.u32 %v3704_v13, %v7894_v48  ;;  %v2635_v36 = vor.u32 %v2634_v56, %v2630_v61  ;;  %2886 = vrot.lane.b32.xlu1 %v2631_v20, %s7158_s15  ;;  %v7985_v56 = vpop.permute.xlu0 %1905 }
  0xb9   : > { %v7955_v50 = vrot.slane %v4205_v38, 7  ;;  %v3132_v23 = vor.u32 %v3130_v41, %v3129_v53  ;;  %v3134_v34 = vrot.slane %v3129_v53, 4  ;;  %v7957_v33 = vrot.slane %v3136_v2, 7  ;;  %v4758_v41 = vld [vmem:[#allocation2 + $0x40] sm:$0xf] }
  0xba   : > { %v2276_v46 = vshrl.u32 %v2172_v51, 16  ;;  %v2279_v57 = vshll.u32 %v2172_v51, 16  ;;  %v7959_v8 = vrot.slane %v3705_v37, 4  ;;  %v7961_v54 = vrot.slane %v2635_v36, 4  ;;  %v1849_v2 = vld [vmem:[#allocation2 + $0x28] sm:$0xf] }
  0xbb   : > { %v4210_v48 = vor.u32 %v4208_v43, %v7955_v50  ;;  %v3133_v61 = vsel %vm7396_vm15, %v3125_v21, %v3132_v23  ;;  %v3141_v59 = vor.u32 %v3139_v9, %v7957_v33  ;;  %v1183_v63 = vrot.slane %v1181_v17, 4  ;;  %v3561_v17 = vld [vmem:[#allocation2 + $0x34] sm:$0xf] }
  0xbc   : > { %3371 = vrot.lane.b32.xlu0 %v3133_v61, %s7157_s14  ;;  %v2278_v1 = vrot.slane %v2276_v46, 7  ;;  %v4212_v22 = vrot.slane %v7955_v50, 4  ;;  %v1449_v44 = vsel %vm1416_vm3, 0, %v933_v24  ;;  %v7978_v62 = vsel %vm7464_vm5, 0, %v934_v5  ;;  %v4563_v51 = vld [vmem:[#allocation2 + $0x34] sm:$0xf] }
  0xbd   : > { %v4211_v21 = vsel %vm7396_vm15, %v4203_v27, %v4210_v48  ;;  %v3142_v28 = vsel %vm7396_vm15, %v3134_v34, %v3141_v59  ;;  %v1184_v13 = vor.u32 %v1183_v63, %v7924_v58  ;;  %v1486_v11 = vshrl.u32 %v1449_v44, 16  ;;  %v8030_v34 = vpop.permute.xlu1 %4622  ;;  %v2043_v61 = vld [vmem:[#allocation2 + $0x2c] sm:$0xf]  ;;  %v8032_v59 = vpop.permute.xlu0 %1907 }
  0xbe   : > { %4442 = vrot.lane.b32.xlu1 %v4211_v21, %s7158_s15  ;;  %v2281_v25 = vor.u32 %v2279_v57, %v2278_v1  ;;  %v2283_v19 = vrot.slane %v2278_v1, 4  ;;  %v1491_v27 = vshrl.u32 %v7978_v62, 16  ;;  %v1494_v60 = vshll.u32 %v7978_v62, 16 }
  0xbf   : > { %v7991_v20 = vrot.slane %v1184_v13, 4  ;;  %v7993_v32 = vrot.slane %v1486_v11, 11  ;;  %v7996_v58 = vadd.s32 80, %v7307_v12  ;;  %v3143_v0 = vrot.slane %v7957_v33, 4 }
  0xc0   : > { %4632 = vrot.lane.b32.xlu0 %v4562_v7, %s7157_s14  ;;  %v2282_v31 = vsel %vm7396_vm15, %v7350_v40, %v2281_v25  ;;  %v2291_v38 = vsel %vm7396_vm15, %v2283_v19, %v7348_v39  ;;  %v8006_v43 = vrot.slane %v1491_v27, 7  ;;  %v8010_v53 = vsel %vm7446_vm4, 0, %v935_v18  ;;  %v1850_v19 = vld [vmem:[#allocation2 + $0x2c] sm:$0xf] }
  0xc1   : > { %vm8012_vm3 = vcmp.ne.s16.totalorder %v2282_v31, 0  ;;  %vm2492_vm5 = vcmp.ne.s16.totalorder %v2291_v38, 0  ;;  %v1190_v5 = vsel %vm7417_vm2, %v7991_v20, %v7324_v26  ;;  %v559_v9 = vand.u32 15, %v7996_v58 }
  0xc2   : > { %3373 = vrot.lane.b32.xlu1 %v3142_v28, %s7157_s14  ;;  %v3594_v3 = vsel %vm8012_vm3, 0, %v3561_v17  ;;  %v4790_v37 = vsel %vm8012_vm3, 0, %v4757_v10  ;;  %v8027_v36 = vsel %vm2492_vm5, 0, %v3562_v4  ;;  %v4791_v23 = vsel %vm2492_vm5, 0, %v4758_v41  ;;  %v2044_v10 = vld [vmem:[#allocation2 + $0x30] sm:$0xf] }
  0xc3   : > { %v3708_v35 = vshll.u32 %v3594_v3, 16  ;;  %v3712_v46 = vshrl.u32 %v3594_v3, 16  ;;  %v4904_v57 = vshll.u32 %v4790_v37, 16  ;;  %v4908_v48 = vshrl.u32 %v4790_v37, 16  ;;  %v4079_v3 = vld [vmem:[#allocation2 + $0x38] sm:$0xf]  ;;  %v8053_v37 = vpop.permute.xlu1 %1911 }
  0xc4   : > { %1921 = vrot.lane.b32.xlu0 %v1849_v2, %s7154_s29  ;;  %v3718_v7 = vshll.u32 %v8027_v36, 16  ;;  %v3722_v63 = vshrl.u32 %v8027_v36, 16  ;;  %v4914_v1 = vshll.u32 %v4791_v23, 16  ;;  %v4918_v44 = vshrl.u32 %v4791_v23, 16 }
  0xc5   : > { %v3710_v55 = vrot.slane %v3708_v35, 5  ;;  %v4906_v21 = vrot.slane %v4904_v57, 5  ;;  %v4910_v28 = vrot.slane %v4908_v48, 4  ;;  %v3714_v17 = vrot.slane %v3712_v46, 4  ;;  %v8057_v46 = vpop.permute.xlu0 %4620 }
  0xc6   : > { %4634 = vrot.lane.b32.xlu1 %v4563_v51, %s7157_s14  ;;  %v8038_v13 = vrot.slane %v3718_v7, 5  ;;  %v4916_v11 = vrot.slane %v4914_v1, 5  ;;  %v4920_v18 = vrot.slane %v4918_v44, 4  ;;  %v2524_v25 = vsel %vm8012_vm3, 0, %v2043_v61  ;;  %v3010_v7 = vld [vmem:[#allocation2 + $0x30] sm:$0xf] }
  0xc7   : > { %vm10795_vm4 = vcmask 519424   ;;  %v3711_v4 = vsel %vm7417_vm2, %v7959_v8, %v3710_v55  ;;  %v4907_v27 = vsel %vm7417_vm2, %v7908_v45, %v4906_v21  ;;  %v4911_v41 = vor.u32 %v4910_v28, %v4906_v21 }
  0xc8   : > { %v3715_v20 = vor.u32 %v3714_v17, %v3710_v55  ;;  %5178 = vst.msk [vmem:[#allocation3 + $0x68] sm:$0xf] %vm419_vm1, %v4907_v27  ;;  %3958 = vrot.lane.b32.xlu0 %v3711_v4, %s7154_s29  ;;  %v4921_v31 = vor.u32 %v4920_v18, %v4916_v11  ;;  %v2638_v2 = vshll.u32 %v2524_v25, 16  ;;  %v2642_v24 = vshrl.u32 %v2524_v25, 16 }
  0xc9   : > { %v8051_v51 = vsel %vm2492_vm5, 0, %v2044_v10  ;;  %v4912_v8 = vrot.slane %v4911_v41, 4  ;;  %vm8062_vm10 = vcmp.ne.s16.totalorder %v1190_v5, 0  ;;  %vm879_vm14 = vcmp.eq.s32.totalorder %v559_v9, 0  ;;  %v936_v41 = vld [vmem:[#allocation2 + $0x10] sm:$0xf] }
  0xca   : > { %v3716_v23 = vrot.slane %v3715_v20, 4  ;;  %v2648_v35 = vshll.u32 %v8051_v51, 16  ;;  %v2652_v45 = vshrl.u32 %v8051_v51, 16  ;;  %1923 = vrot.lane.b32.xlu1 %v1850_v19, %s7154_s29  ;;  %v8060_v57 = vrot.slane %v4921_v31, 4  ;;  %vm1040_vm7 = vmpackc.low %vm879_vm14, %vm879_vm14  ;;  %v937_v9 = vld [vmem:[#allocation2 + $0x14] sm:$0xf]  ;;  %v8099_v31 = vpop.permute.xlu0 %1909 }
  0xcb   : > { %v2640_v48 = vrot.slane %v2638_v2, 5  ;;  %v2644_v61 = vrot.slane %v2642_v24, 4  ;;  %v4917_v44 = vsel %vm7417_vm2, %v4912_v8, %v4916_v11  ;;  %v4112_v21 = vsel %vm8062_vm10, 0, %v4079_v3 }
  0xcc   : > { %v3721_v1 = vsel %vm7417_vm2, %v3716_v23, %v8038_v13  ;;  %v8071_v55 = vrot.slane %v2648_v35, 5  ;;  %5179 = vst.msk [vmem:[#allocation3 + $0x74] sm:$0xf] %vm419_vm1, %v4917_v44  ;;  %v4214_v17 = vshrl.u32 %v4112_v21, 16  ;;  %v4217_v10 = vshll.u32 %v4112_v21, 16 }
  0xcd   : > { %v2641_v5 = vsel %vm7417_vm2, %v7961_v54, %v2640_v48  ;;  %v2645_v28 = vor.u32 %v2644_v61, %v2640_v48  ;;  %v1496_v11 = vor.u32 %v1494_v60, %v8006_v43  ;;  %v3043_v18 = vsel %vm8062_vm10, 0, %v3010_v7  ;;  %v3943_v20 = vpop.permute.xlu1 %3942  ;;  %v4080_v7 = vld [vmem:[#allocation2 + $0x3c] sm:$0xf]  ;;  %v3011_v21 = vld [vmem:[#allocation2 + $0x34] sm:$0xf] }
  0xce   : > { %2888 = vrot.lane.b32.xlu0 %v2641_v5, %s7158_s15  ;;  %v1498_v25 = vrot.slane %v8006_v43, 4  ;;  %3960 = vrot.lane.b32.xlu1 %v3721_v1, %s7154_s29  ;;  %v8089_v19 = vrot.slane %v4214_v17, 7  ;;  %v3145_v4 = vshrl.u32 %v3043_v18, 16  ;;  %v3148_v27 = vshll.u32 %v3043_v18, 16  ;;  %4038 = vst.msk [vmem:[#allocation3 + $0x4] sm:$0xf] %vm10795_vm4, %v3943_v20 }
  0xcf   : > { %v2646_v54 = vrot.slane %v2645_v28, 4  ;;  %v1497_v62 = vsel %vm7396_vm15, %v7993_v32, %v1496_v11  ;;  %v8095_v60 = vsel %vm1040_vm7, 65537, %v10798_v15  ;;  %v1500_v58 = vshrl.u32 %v8010_v53, 16 }
  0xd0   : > { %v1503_v43 = vshll.u32 %v8010_v53, 16  ;;  %v4219_v24 = vor.u32 %v4217_v10, %v8089_v19  ;;  %1809 = vst.msk [vmem:[#allocation3] sm:$0xf] %vm419_vm1, %v1497_v62  ;;  %v1197_v32 = vshll.u32 %v8095_v60, 16  ;;  %v1201_v3 = vshrl.u32 %v8095_v60, 16 }
  0xd1   : > { %v2651_v2 = vsel %vm7417_vm2, %v2646_v54, %v8071_v55  ;;  %2002 = vst.msk [vmem:[#allocation3] sm:$0xf] %vm10795_vm4, %v7985_v56  ;;  %v4221_v53 = vrot.slane %v8089_v19, 4  ;;  %v8112_v8 = vrot.slane %v3145_v4, 7  ;;  %v1502_v23 = vrot.slane %v1500_v58, 7  ;;  %v272_v4 = vld [vmem:[%s7293_s28 + $0x68] sm:$0xff] }
  0xd2   : > { %v1452_v35 = vsel %vm7569_vm13, 0, %v936_v41  ;;  %2890 = vrot.lane.b32.xlu1 %v2651_v2, %s7158_s15  ;;  %v4220_v48 = vsel %vm7396_vm15, %v4212_v22, %v4219_v24  ;;  %v8121_v61 = vrot.slane %v1197_v32, 5  ;;  %v1453_v56 = vsel %vm7646_vm6, 0, %v937_v9  ;;  %v3496_v41 = vld [vmem:[#allocation2 + $0x30] sm:$0xf]  ;;  %v275_v19 = vld [vmem:[%s7293_s28 + $0x80] sm:$0xff] }
  0xd3   : > { %v1509_v1 = vshrl.u32 %v1452_v35, 16  ;;  %4444 = vrot.lane.b32.xlu0 %v4220_v48, %s7158_s15  ;;  %v3150_v16 = vor.u32 %v3148_v27, %v8112_v8  ;;  %v1505_v44 = vor.u32 %v1503_v43, %v1502_v23  ;;  %v3152_v5 = vrot.slane %v8112_v8, 4  ;;  %v2873_v27 = vpop.permute.xlu0 %2872  ;;  %3528 = vst.msk [vmem:[#allocation3 + $0x64] sm:$0xf] %vm419_vm1, %v3496_v41  ;;  %v273_v2 = vld [vmem:[%s7293_s28 + $0x70] sm:$0xff]  ;;  %v276_v41 = vld [vmem:[%s7293_s28 + $0x88] sm:$0xff] }
  0xd4   : > { %v1518_v50 = vshrl.u32 %v1453_v56, 16  ;;  %v1200_v22 = vsel %vm7417_vm2, %v7410_v29, %v8121_v61  ;;  %v1521_v17 = vshll.u32 %v1453_v56, 16  ;;  %v1507_v52 = vrot.slane %v1502_v23, 4  ;;  %v4564_v24 = vld [vmem:[#allocation2 + $0x38] sm:$0xf] }
  0xd5   : > { %v1511_v28 = vrot.slane %v1509_v1, 7  ;;  %vm8132_vm13 = vcmp.ne.s16.totalorder %v1200_v22, 0  ;;  %v3151_v11 = vsel %vm7396_vm15, %v3143_v0, %v3150_v16  ;;  %v1506_v18 = vsel %vm7396_vm15, %v1498_v25, %v1505_v44  ;;  %v3497_v16 = vld [vmem:[#allocation2 + $0x34] sm:$0xf] }
  0xd6   : > { %v8142_v54 = vrot.slane %v1518_v50, 7  ;;  %v4113_v20 = vsel %vm8132_vm13, 0, %v4080_v7  ;;  %1810 = vst.msk [vmem:[#allocation3 + $0xc] sm:$0xf] %vm419_vm1, %v1506_v18  ;;  %v3044_v33 = vsel %vm8132_vm13, 0, %v3011_v21  ;;  %v1512_v58 = vshll.u32 %v1452_v35, 16 }
  0xd7   : > { %v1516_v62 = vrot.slane %v1511_v28, 4  ;;  %v4223_v0 = vshrl.u32 %v4113_v20, 16  ;;  %v4226_v25 = vshll.u32 %v4113_v20, 16  ;;  %3375 = vrot.lane.b32.xlu0 %v3151_v11, %s7157_s14  ;;  %2003 = vst.msk [vmem:[#allocation3 + $0xc] sm:$0xf] %vm10795_vm4, %v8032_v59  ;;  %v3154_v43 = vshrl.u32 %v3044_v33, 16 }
  0xd8   : > { %v3157_v9 = vshll.u32 %v3044_v33, 16  ;;  %v1523_v32 = vor.u32 %v1521_v17, %v8142_v54  ;;  %v1514_v23 = vor.u32 %v1512_v58, %v1511_v28  ;;  %v6689_v48 = vpack.c.bf16 %v272_v4, %v272_v4  ;;  %3529 = vst.msk [vmem:[#allocation3 + $0x70] sm:$0xf] %vm419_vm1, %v3497_v16  ;;  %v7006_v4 = vld [vmem:[#allocation3 + $0x8] ss:$12 sps:$4 sm:$0xff]  }
  0xd9   : > { %v464_v7 = vadd.s32 88, %v7307_v12  ;;  %v8157_v35 = vrot.slane %v4223_v0, 7  ;;  %v8159_v56 = vrot.slane %v3154_v43, 7  ;;  %v3724_v1 = vrot.slane %v3722_v63, 4  ;;  %v1851_v63 = vld [vmem:[#allocation2 + $0x30] sm:$0xf] }
  0xda   : > { %vm10800_vm6 = vcmask 781824   ;;  %v1524_v59 = vsel %vm7396_vm15, %v1516_v62, %v1523_v32  ;;  %v1515_v44 = vsel %vm7396_vm15, %v1507_v52, %v1514_v23  ;;  %433 = vst.msk [vmem:[#allocation2 + $0x44] sm:$0xf] %vm419_vm1, %v6689_v48  ;;  %v6690_v50 = vpack.c.bf16 %v273_v2, %v273_v2  ;;  %v277_v20 = vld [vmem:[%s7293_s28 + $0x90] sm:$0xff]  ;;  %v278_v43 = vld [vmem:[%s7293_s28 + $0x98] sm:$0xff]  ;;  %v279_v32 = vld [vmem:[%s7293_s28 + $0xa0] sm:$0xff] }
  0xdb   : > { %v566_v21 = vand.u32 15, %v464_v7  ;;  %2969 = vst.msk [vmem:[#allocation3] sm:$0xf] %vm10800_vm6, %v2873_v27  ;;  %v4228_v22 = vor.u32 %v4226_v25, %v8157_v35  ;;  %v3159_v36 = vor.u32 %v3157_v9, %v8159_v56  ;;  %4636 = vrot.lane.b32.xlu0 %v4564_v24, %s7157_s14  ;;  %v3725_v28 = vor.u32 %v3724_v1, %v8038_v13  ;;  %v8178_v52 = vpop.permute.xlu1 %4430  ;;  %v4429_v11 = vpop.permute.xlu0 %4428  ;;  %v7007_v25 = vld [vmem:[#allocation3 + $0x20] ss:$12 sps:$4 sm:$0xff]  }
  0xdc   : > { %1812 = vst.msk [vmem:[#allocation3 + $0x24] sm:$0xf] %vm419_vm1, %v1524_v59  ;;  %1811 = vst.msk [vmem:[#allocation3 + $0x18] sm:$0xf] %vm419_vm1, %v1515_v44  ;;  %v2654_v17 = vrot.slane %v2652_v45, 4  ;;  %vm10797_vm3 = vcmask 1044224   ;;  %v6692_v24 = vpack.c.bf16 %v275_v19, %v275_v19  ;;  %v6693_v16 = vpack.c.bf16 %v276_v41, %v276_v41 }
  0xdd   : > { %2005 = vst.msk [vmem:[#allocation3 + $0x24] sm:$0xf] %vm10795_vm4, %v8053_v37  ;;  %2004 = vst.msk [vmem:[#allocation3 + $0x18] sm:$0xf] %vm10795_vm4, %v8099_v31  ;;  %vm8184_vm8 = vcmp.eq.s32.totalorder %v566_v21, 15  ;;  %v1203_v13 = vrot.slane %v1201_v3, 4  ;;  %v4229_v45 = vsel %vm7396_vm15, %v4221_v53, %v4228_v22  ;;  %v3160_v31 = vsel %vm7396_vm15, %v3152_v5, %v3159_v36 }
  0xde   : > { %434 = vst.msk [vmem:[#allocation2 + $0x48] sm:$0xf] %vm419_vm1, %v6690_v50  ;;  %v4230_v51 = vrot.slane %v8157_v35, 4  ;;  %v274_v37 = vld [vmem:[%s7293_s28 + $0x78] sm:$0xff]  ;;  %vm2142_vm5 = vmpackc.low %vm8184_vm8, %vm8184_vm8  ;;  %v8205_v60 = vrot.slane %v3725_v28, 4  ;;  %v2655_v3 = vor.u32 %v2654_v17, %v8071_v55  ;;  %4446 = vrot.lane.b32.xlu1 %v4229_v45, %s7158_s15  ;;  %v465_v5 = vadd.s32 96, %v7307_v12 }
  0xdf   : > { %4524 = vst.msk [vmem:[#allocation3 + $0x4] sm:$0xf] %vm10800_vm6, %v4429_v11  ;;  %v2174_v53 = vsel %vm2142_vm5, 65537, %v10798_v15  ;;  %v1204_v8 = vor.u32 %v1203_v13, %v8121_v61  ;;  %v3161_v27 = vrot.slane %v8159_v56, 4  ;;  %1925 = vrot.lane.b32.xlu0 %v1851_v63, %s7154_s29  ;;  %v8221_v62 = vpop.permute.xlu1 %3361  ;;  %v3360_v58 = vpop.permute.xlu0 %3359  ;;  %v6691_v0 = vpack.c.bf16 %v274_v37, %v274_v37  ;;  %v7012_v23 = vld [vmem:[#allocation3 + $0x38] ss:$12 sps:$4 sm:$0xff]  }
  0xe0   : > { %4716 = vst.msk [vmem:[#allocation3 + $0x4] sm:$0xf] %vm10797_vm3, %v8057_v46  ;;  %v2294_v55 = vshrl.u32 %v2174_v53, 16  ;;  %v2297_v46 = vshll.u32 %v2174_v53, 16  ;;  %v8219_v33 = vrot.slane %v2655_v3, 4  ;;  %v573_v9 = vand.u32 15, %v465_v5 }
  0xe1   : > { %v1205_v61 = vrot.slane %v1204_v8, 4  ;;  %3456 = vst.msk [vmem:[#allocation3] sm:$0xf] %vm10797_vm3, %v3360_v58  ;;  %v466_v2 = vadd.s32 104, %v7307_v12  ;;  %v4081_v7 = vld [vmem:[#allocation2 + $0x40] sm:$0xf]  ;;  %v6694_v59 = vpack.c.bf16 %v277_v20, %v277_v20  ;;  %v6695_v63 = vpack.c.bf16 %v278_v43, %v278_v43 }
  0xe2   : > { %v2296_v48 = vrot.slane %v2294_v55, 7  ;;  %v3012_v1 = vld [vmem:[#allocation2 + $0x38] sm:$0xf]  ;;  %435 = vst.msk [vmem:[#allocation2 + $0x4c] sm:$0xf] %vm419_vm1, %v6691_v0  ;;  %vm10796_vm14 = vcmask 261120   ;;  %3377 = vrot.lane.b32.xlu1 %v3160_v31, %s7157_s14  ;;  %v6696_v45 = vpack.c.bf16 %v279_v32, %v279_v32 }
  0xe3   : > { %v4565_v44 = vld [vmem:[#allocation2 + $0x3c] sm:$0xf]  ;;  %v1210_v50 = vsel %vm7417_vm2, %v1205_v61, %v7324_v26  ;;  %vm8232_vm7 = vcmp.eq.s32.totalorder %v573_v9, 0  ;;  %v580_v36 = vand.u32 15, %v466_v2  ;;  %436 = vst.msk [vmem:[#allocation2 + $0x50] sm:$0xf] %vm419_vm1, %v6692_v24  ;;  %6861 = vmatprep.mubr.msk.bf16.mxu1 %vm10796_vm14, %v7006_v4  ;;  %v3945_v37 = vpop.permute.xlu1 %3944 }
  0xe4   : > { %v3563_v21 = vld [vmem:[#allocation2 + $0x3c] sm:$0xf]  ;;  %v2299_v28 = vor.u32 %v2297_v46, %v2296_v48  ;;  %v4759_v17 = vld [vmem:[#allocation2 + $0x44] sm:$0xf]  ;;  %v2301_v11 = vrot.slane %v2296_v48, 4  ;;  %vm8238_vm8 = vcmp.ne.s16.totalorder %v1210_v50, 0  ;;  %vm1042_vm5 = vmpackc.low %vm8232_vm7, %vm8232_vm7  ;;  %6862 = vmatmul.mubr.msk.bf16.vlgmr.msra.gmra.mxu1 %vm10796_vm14, %v7007_v25 }
  0xe5   : > { %v3564_v18 = vld [vmem:[#allocation2 + $0x40] sm:$0xf]  ;;  %437 = vst.msk [vmem:[#allocation2 + $0x54] sm:$0xf] %vm419_vm1, %v6693_v16  ;;  %438 = vst.msk [vmem:[#allocation2 + $0x58] sm:$0xf] %vm419_vm1, %v6694_v59  ;;  %6865 = vmatprep.mubr.msk.bf16.mxu1 %vm10796_vm14, %v7012_v23 }
  0xe6   : > { %v4760_v31 = vld [vmem:[#allocation2 + $0x48] sm:$0xf]  ;;  %v8250_v3 = vsel %vm8238_vm8, 0, %v4081_v7  ;;  %v8253_v19 = vsel %vm1042_vm5, 65537, %v10798_v15  ;;  %v8257_v4 = vsel %vm8238_vm8, 0, %v3012_v1  ;;  %vm8260_vm7 = vcmp.eq.s32.totalorder %v580_v36, 15  ;;  %4638 = vrot.lane.b32.xlu1 %v4565_v44, %s7157_s14 }
  0xe7   : > { %4039 = vst.msk [vmem:[#allocation3 + $0x10] sm:$0xf] %vm10795_vm4, %v3945_v37  ;;  %v1852_v8 = vld [vmem:[#allocation2 + $0x34] sm:$0xf]  ;;  %v2300_v5 = vsel %vm7396_vm15, %v7350_v40, %v2299_v28  ;;  %v2309_v41 = vsel %vm7396_vm15, %v2301_v11, %v7348_v39  ;;  %v4232_v20 = vshrl.u32 %v8250_v3, 16  ;;  %v4235_v55 = vshll.u32 %v8250_v3, 16  ;;  %v2875_v2 = vpop.permute.xlu1 %2874 }
  0xe8   : > { %439 = vst.msk [vmem:[#allocation2 + $0x5c] sm:$0xf] %vm419_vm1, %v6695_v63  ;;  %440 = vst.msk [vmem:[#allocation2 + $0x60] sm:$0xf] %vm419_vm1, %v6696_v45  ;;  %vm8278_vm5 = vcmp.ne.s16.totalorder %v2300_v5, 0  ;;  %vm2494_vm4 = vcmp.ne.s16.totalorder %v2309_v41, 0 }
  0xe9   : > { %4525 = vst.msk [vmem:[#allocation3 + $0x10] sm:$0xf] %vm10800_vm6, %v8178_v52  ;;  %v1217_v58 = vshll.u32 %v8253_v19, 16  ;;  %v1221_v0 = vshrl.u32 %v8253_v19, 16  ;;  %v7013_v25 = vld [vmem:[#allocation3 + $0x50] ss:$12 sps:$4 sm:$0xff]  }
  0xea   : > { %4717 = vst.msk [vmem:[#allocation3 + $0x10] sm:$0xf] %vm10797_vm3, %v8030_v34  ;;  %v3596_v52 = vsel %vm8278_vm5, 0, %v3563_v21  ;;  %v4792_v43 = vsel %vm8278_vm5, 0, %v4759_v17  ;;  %v8291_v61 = vsel %vm2494_vm4, 0, %v3564_v18  ;;  %v4793_v9 = vsel %vm2494_vm4, 0, %v4760_v31  ;;  %1927 = vrot.lane.b32.xlu1 %v1852_v8, %s7154_s29 }
  0xeb   : > { %v3728_v24 = vshll.u32 %v3596_v52, 16  ;;  %v3732_v32 = vshrl.u32 %v3596_v52, 16  ;;  %v4924_v23 = vshll.u32 %v4792_v43, 16  ;;  %v4928_v48 = vshrl.u32 %v4792_v43, 16  ;;  %v2045_v7 = vld [vmem:[#allocation2 + $0x34] sm:$0xf] }
  0xec   : > { %2970 = vst.msk [vmem:[#allocation3 + $0xc] sm:$0xf] %vm10800_vm6, %v2875_v2  ;;  %v3738_v34 = vshll.u32 %v8291_v61, 16  ;;  %v3742_v1 = vshrl.u32 %v8291_v61, 16  ;;  %v4934_v16 = vshll.u32 %v4793_v9, 16  ;;  %v4938_v59 = vshrl.u32 %v4793_v9, 16  ;;  %6866 = vmatmul.mubr.msk.bf16.gmra.mxu1 %vm10796_vm14, %v7013_v25  ;;  %vm2144_vm14 = vmpackc.low %vm8260_vm7, %vm8260_vm7 }
  0xed   : > { %3457 = vst.msk [vmem:[#allocation3 + $0xc] sm:$0xf] %vm10797_vm3, %v8221_v62  ;;  %v3730_v44 = vrot.slane %v3728_v24, 5  ;;  %v4926_v21 = vrot.slane %v4924_v23, 5  ;;  %v4930_v50 = vrot.slane %v4928_v48, 4  ;;  %v3734_v22 = vrot.slane %v3732_v32, 4  ;;  %v3947_v25 = vpop.permute.xlu0 %3946 }
  0xee   : > { %v2046_v36 = vld [vmem:[#allocation2 + $0x38] sm:$0xf]  ;;  %v8300_v63 = vrot.slane %v3738_v34, 5  ;;  %v4936_v28 = vrot.slane %v4934_v16, 5  ;;  %v4940_v17 = vrot.slane %v4938_v59, 4  ;;  %v2526_v11 = vsel %vm8278_vm5, 0, %v2045_v7 }
  0xef   : > { %v3731_v62 = vsel %vm7417_vm2, %v8205_v60, %v3730_v44  ;;  %v4927_v18 = vsel %vm7417_vm2, %v8060_v57, %v4926_v21  ;;  %v4931_v37 = vor.u32 %v4930_v50, %v4926_v21  ;;  %v3735_v45 = vor.u32 %v3734_v22, %v3730_v44  ;;  %v3013_v23 = vld [vmem:[#allocation2 + $0x3c] sm:$0xf]  ;;  %v4082_v21 = vld [vmem:[#allocation2 + $0x44] sm:$0xf]  ;;  %v4085_v49 = vld [vmem:[#allocation2 + $0x50] sm:$0xf] }
  0xf0   : > { %5180 = vst.msk [vmem:[#allocation3 + $0x80] sm:$0xf] %vm419_vm1, %v4927_v18  ;;  %3962 = vrot.lane.b32.xlu0 %v3731_v62, %s7154_s29  ;;  %v4941_v31 = vor.u32 %v4940_v17, %v4936_v28  ;;  %v2658_v8 = vshll.u32 %v2526_v11, 16  ;;  %v2662_v5 = vshrl.u32 %v2526_v11, 16  ;;  %v2527_v46 = vsel %vm2494_vm4, 0, %v2046_v36 }
  0xf1   : > { %v4932_v52 = vrot.slane %v4931_v37, 4  ;;  %v3736_v43 = vrot.slane %v3735_v45, 4  ;;  %v2668_v9 = vshll.u32 %v2527_v46, 16  ;;  %v2672_v60 = vshrl.u32 %v2527_v46, 16  ;;  %v3949_v22 = vpop.permute.xlu1 %3948  ;;  %v2047_v56 = vld [vmem:[#allocation2 + $0x3c] sm:$0xf] }
  0xf2   : > { %vm10859_vm5 = vcmask 519424   ;;  %v8315_v2 = vrot.slane %v4941_v31, 4  ;;  %v2660_v57 = vrot.slane %v2658_v8, 5  ;;  %v2664_v24 = vrot.slane %v2662_v5, 4  ;;  %v2877_v3 = vpop.permute.xlu0 %2876  ;;  %v3020_v62 = vld [vmem:[#allocation2 + $0x58] sm:$0xf] }
  0xf3   : > { %4040 = vst.msk [vmem:[#allocation3 + $0x1c] sm:$0xf] %vm10859_vm5, %v3947_v25  ;;  %v8317_v32 = vrot.slane %v4232_v20, 7  ;;  %v3741_v41 = vsel %vm7417_vm2, %v3736_v43, %v8300_v63  ;;  %v4937_v48 = vsel %vm7417_vm2, %v4932_v52, %v4936_v28  ;;  %v8327_v7 = vrot.slane %v2668_v9, 5  ;;  %vm10860_vm4 = vmmov %vm10859_vm5 }
  0xf4   : > { %v8329_v34 = vrot.slane %v1217_v58, 5  ;;  %v7002_v16 = vld [vmem:[#allocation3] ss:$12 sps:$4 sm:$0xff]   ;;  %5181 = vst.msk [vmem:[#allocation3 + $0x8c] sm:$0xf] %vm419_vm1, %v4937_v48  ;;  %3964 = vrot.lane.b32.xlu1 %v3741_v41, %s7154_s29  ;;  %v2661_v20 = vsel %vm7417_vm2, %v8219_v33, %v2660_v57  ;;  %v2665_v59 = vor.u32 %v2664_v24, %v2660_v57  ;;  %v3163_v28 = vshrl.u32 %v8257_v4, 16 }
  0xf5   : > { %v4237_v44 = vor.u32 %v4235_v55, %v8317_v32  ;;  %v4239_v50 = vrot.slane %v8317_v32, 4  ;;  %v7004_v58 = vld [vmem:[#allocation3 + $0x4] ss:$12 sps:$4 sm:$0xff]   ;;  %2892 = vrot.lane.b32.xlu0 %v2661_v20, %s7158_s15  ;;  %v3166_v33 = vshll.u32 %v8257_v4, 16  ;;  %4041 = vst.msk [vmem:[#allocation3 + $0x28] sm:$0xf] %vm10860_vm4, %v3949_v22 }
  0xf6   : > { %v1220_v36 = vsel %vm7417_vm2, %v7410_v29, %v8329_v34  ;;  %v2176_v55 = vsel %vm2144_vm14, 65537, %v10798_v15  ;;  %v2666_v17 = vrot.slane %v2665_v59, 4  ;;  %2971 = vst.msk [vmem:[#allocation3 + $0x18] sm:$0xf] %vm10800_vm6, %v2877_v3  ;;  %5738 = vmatprep.mubr.bf16.mxu0 %v7004_v58  ;;  %v3165_v53 = vrot.slane %v3163_v28, 7  ;;  %v2879_v43 = vpop.permute.xlu1 %2878 }
  0xf7   : > { %v4238_v11 = vsel %vm7396_vm15, %v4230_v51, %v4237_v44  ;;  %vm8358_vm5 = vcmp.ne.s16.totalorder %v1220_v36, 0  ;;  %v2312_v4 = vshrl.u32 %v2176_v55, 16  ;;  %v2315_v45 = vshll.u32 %v2176_v55, 16  ;;  %5739 = vmatmul.mubr.bf16.vlgmr.msra.gmra.mxu0 %v7002_v16  ;;  %2972 = vst.msk [vmem:[#allocation3 + $0x24] sm:$0xf] %vm10800_vm6, %v2879_v43  ;;  %v4433_v32 = vpop.permute.xlu0 %4432 }
  0xf8   : > { %v4115_v18 = vsel %vm8358_vm5, 0, %v4082_v21  ;;  %v3046_v37 = vsel %vm8358_vm5, 0, %v3013_v23  ;;  %v2671_v35 = vsel %vm7417_vm2, %v2666_v17, %v8327_v7  ;;  %v3168_v5 = vor.u32 %v3166_v33, %v3165_v53  ;;  %4526 = vst.msk [vmem:[#allocation3 + $0x1c] sm:$0xf] %vm10800_vm6, %v4433_v32  ;;  %v3565_v59 = vld [vmem:[#allocation2 + $0x44] sm:$0xf] }
  0xf9   : > { %v4241_v51 = vshrl.u32 %v4115_v18, 16  ;;  %v4244_v31 = vshll.u32 %v4115_v18, 16  ;;  %v3172_v8 = vshrl.u32 %v3046_v37, 16  ;;  %2894 = vrot.lane.b32.xlu1 %v2671_v35, %s7158_s15  ;;  %4448 = vrot.lane.b32.xlu0 %v4238_v11, %s7158_s15  ;;  %v3170_v46 = vrot.slane %v3165_v53, 4  ;;  %v4761_v44 = vld [vmem:[#allocation2 + $0x4c] sm:$0xf] }
  0xfa   : > { %v3175_v25 = vshll.u32 %v3046_v37, 16  ;;  %v2314_v52 = vrot.slane %v2312_v4, 7  ;;  %v3744_v24 = vrot.slane %v3742_v1, 4  ;;  %v2674_v23 = vrot.slane %v2672_v60, 4  ;;  %v3566_v28 = vld [vmem:[#allocation2 + $0x48] sm:$0xf] }
  0xfb   : > { %v8372_v9 = vrot.slane %v4241_v51, 7  ;;  %v8374_v57 = vrot.slane %v3172_v8, 7  ;;  %v3169_v41 = vsel %vm7396_vm15, %v3161_v27, %v3168_v5  ;;  %v8386_v20 = vrot.slane %v1221_v0, 4  ;;  %v4566_v27 = vld [vmem:[#allocation2 + $0x40] sm:$0xf]  ;;  %v3364_v3 = vpop.permute.xlu0 %3363 }
  0xfc   : > { %v2317_v48 = vor.u32 %v2315_v45, %v2314_v52  ;;  %v2319_v16 = vrot.slane %v2314_v52, 4  ;;  %v3745_v60 = vor.u32 %v3744_v24, %v8300_v63  ;;  %v2675_v21 = vor.u32 %v2674_v23, %v8327_v7  ;;  %v4762_v33 = vld [vmem:[#allocation2 + $0x50] sm:$0xf]  ;;  %3458 = vst.msk [vmem:[#allocation3 + $0x18] sm:$0xf] %vm10797_vm3, %v3364_v3 }
  0xfd   : > { %v4246_v61 = vor.u32 %v4244_v31, %v8372_v9  ;;  %v3177_v1 = vor.u32 %v3175_v25, %v8374_v57  ;;  %3379 = vrot.lane.b32.xlu0 %v3169_v41, %s7157_s14  ;;  %v1224_v22 = vor.u32 %v8386_v20, %v8329_v34  ;;  %v4248_v63 = vrot.slane %v8372_v9, 4  ;;  %v4435_v37 = vpop.permute.xlu1 %4434  ;;  %v1853_v8 = vld [vmem:[#allocation2 + $0x38] sm:$0xf] }
  0xfe   : > { %v2318_v19 = vsel %vm7396_vm15, %v7350_v40, %v2317_v48  ;;  %v2327_v0 = vsel %vm7396_vm15, %v2319_v16, %v7348_v39  ;;  %v8406_v36 = vrot.slane %v3745_v60, 4  ;;  %v8415_v51 = vrot.slane %v2675_v21, 4  ;;  %4527 = vst.msk [vmem:[#allocation3 + $0x28] sm:$0xf] %vm10800_vm6, %v4435_v37  ;;  %v2048_v48 = vld [vmem:[#allocation2 + $0x40] sm:$0xf] }
  0xff   : > { %v4247_v58 = vsel %vm7396_vm15, %v4239_v50, %v4246_v61  ;;  %v3178_v7 = vsel %vm7396_vm15, %v3170_v46, %v3177_v1  ;;  %vm2495_vm14 = vcmp.ne.s16.totalorder %v2318_v19, 0  ;;  %vm2496_vm7 = vcmp.ne.s16.totalorder %v2327_v0, 0  ;;  %v4625_v43 = vpop.permute.xlu0 %4624  ;;  %v4567_v16 = vld [vmem:[#allocation2 + $0x44] sm:$0xf]  ;;  %v3014_v37 = vld [vmem:[#allocation2 + $0x40] sm:$0xf] }
 0x100   : > { %4450 = vrot.lane.b32.xlu1 %v4247_v58, %s7158_s15  ;;  %v3598_v55 = vsel %vm2495_vm14, 0, %v3565_v59  ;;  %v4794_v17 = vsel %vm2495_vm14, 0, %v4761_v44  ;;  %v2528_v11 = vsel %vm2495_vm14, 0, %v2047_v56  ;;  %v8412_v45 = vsel %vm2496_vm7, 0, %v3566_v28  ;;  %4718 = vst.msk [vmem:[#allocation3 + $0x1c] sm:$0xf] %vm10797_vm3, %v4625_v43 }
 0x101   : > { %v3748_v4 = vshll.u32 %v3598_v55, 16  ;;  %v3752_v18 = vshrl.u32 %v3598_v55, 16  ;;  %v4944_v50 = vshll.u32 %v4794_v17, 16  ;;  %v4948_v53 = vshrl.u32 %v4794_v17, 16  ;;  %4640 = vrot.lane.b32.xlu0 %v4566_v27, %s7157_s14  ;;  %v3366_v44 = vpop.permute.xlu1 %3365 }
 0x102   : > { %v4795_v35 = vsel %vm2496_vm7, 0, %v4762_v33  ;;  %v2678_v31 = vshll.u32 %v2528_v11, 16  ;;  %v3758_v24 = vshll.u32 %v8412_v45, 16  ;;  %v3762_v32 = vshrl.u32 %v8412_v45, 16  ;;  %3459 = vst.msk [vmem:[#allocation3 + $0x24] sm:$0xf] %vm10797_vm3, %v3366_v44 }
 0x103   : > { %v3750_v5 = vrot.slane %v3748_v4, 5  ;;  %v4946_v46 = vrot.slane %v4944_v50, 5  ;;  %v4950_v25 = vrot.slane %v4948_v53, 4  ;;  %v3754_v52 = vrot.slane %v3752_v18, 4  ;;  %v1854_v33 = vld [vmem:[#allocation2 + $0x3c] sm:$0xf] }
 0x104   : > { %3381 = vrot.lane.b32.xlu1 %v3178_v7, %s7157_s14  ;;  %v4954_v23 = vshll.u32 %v4795_v35, 16  ;;  %v4958_v41 = vshrl.u32 %v4795_v35, 16  ;;  %v8430_v56 = vrot.slane %v3758_v24, 5  ;;  %v2680_v19 = vrot.slane %v2678_v31, 5  ;;  %v938_v18 = vld [vmem:[#allocation2 + $0x18] sm:$0xf] }
 0x105   : > { %v3751_v61 = vsel %vm7417_vm2, %v8406_v36, %v3750_v5  ;;  %v4947_v1 = vsel %vm7417_vm2, %v8315_v2, %v4946_v46  ;;  %v4951_v59 = vor.u32 %v4950_v25, %v4946_v46  ;;  %v3755_v60 = vor.u32 %v3754_v52, %v3750_v5  ;;  %1929 = vrot.lane.b32.xlu0 %v1853_v8, %s7154_s29  ;;  %v8436_v2 = vpop.permute.xlu0 %1913  ;;  %v4627_v35 = vpop.permute.xlu1 %4626  ;;  %v4083_v5 = vld [vmem:[#allocation2 + $0x48] sm:$0xf] }
 0x106   : > { %5182 = vst.msk [vmem:[#allocation3 + $0x98] sm:$0xf] %vm419_vm1, %v4947_v1  ;;  %v4956_v21 = vrot.slane %v4954_v23, 5  ;;  %v4960_v27 = vrot.slane %v4958_v41, 4  ;;  %v2682_v36 = vshrl.u32 %v2528_v11, 16  ;;  %v8434_v28 = vsel %vm2496_vm7, 0, %v2048_v48 }
 0x107   : > { %v4952_v58 = vrot.slane %v4951_v59, 4  ;;  %v3756_v7 = vrot.slane %v3755_v60, 4  ;;  %v2681_v55 = vsel %vm7417_vm2, %v8415_v51, %v2680_v19  ;;  %v2688_v17 = vshll.u32 %v8434_v28, 16  ;;  %v939_v51 = vld [vmem:[#allocation2 + $0x1c] sm:$0xf] }
 0x108   : > { %4642 = vrot.lane.b32.xlu1 %v4567_v16, %s7157_s14  ;;  %v4961_v3 = vor.u32 %v4960_v27, %v4956_v21  ;;  %v2692_v4 = vshrl.u32 %v8434_v28, 16  ;;  %v2684_v50 = vrot.slane %v2682_v36, 4  ;;  %v1225_v53 = vrot.slane %v1224_v22, 4  ;;  %4719 = vst.msk [vmem:[#allocation3 + $0x28] sm:$0xf] %vm10797_vm3, %v4627_v35 }
 0x109   : > { %v3761_v0 = vsel %vm7417_vm2, %v3756_v7, %v8430_v56  ;;  %v4957_v11 = vsel %vm7417_vm2, %v4952_v58, %v4956_v21  ;;  %3966 = vrot.lane.b32.xlu0 %v3751_v61, %s7154_s29  ;;  %v8456_v8 = vrot.slane %v2688_v17, 5  ;;  %v467_v46 = vadd.s32 112, %v7307_v12  ;;  %v3951_v43 = vpop.permute.xlu0 %3950  ;;  %v3498_v48 = vld [vmem:[#allocation2 + $0x38] sm:$0xf]  ;;  %v8479_v1 = vpop.permute.xlu1 %1915  ;;  %v3499_v21 = vld [vmem:[#allocation2 + $0x3c] sm:$0xf] }
 0x10a   : > { %v8453_v31 = vrot.slane %v4961_v3, 4  ;;  %5183 = vst.msk [vmem:[#allocation3 + $0xa4] sm:$0xf] %vm419_vm1, %v4957_v11  ;;  %v3179_v25 = vrot.slane %v8374_v57, 4  ;;  %v2685_v34 = vor.u32 %v2684_v50, %v2680_v19  ;;  %v1230_v20 = vsel %vm7417_vm2, %v1225_v53, %v7324_v26  ;;  %3530 = vst.msk [vmem:[#allocation3 + $0x7c] sm:$0xf] %vm419_vm1, %v3498_v48 }
 0x10b   : > { %v1454_v22 = vsel %vm7771_vm11, 0, %v938_v18  ;;  %v1525_v52 = vrot.slane %v8142_v54, 4  ;;  %vm8468_vm4 = vcmp.ne.s16.totalorder %v1230_v20, 0  ;;  %v587_v57 = vand.u32 15, %v467_v46  ;;  %3531 = vst.msk [vmem:[#allocation3 + $0x88] sm:$0xf] %vm419_vm1, %v3499_v21 }
 0x10c   : > { %1931 = vrot.lane.b32.xlu1 %v1854_v33, %s7154_s29  ;;  %v1527_v23 = vshrl.u32 %v1454_v22, 16  ;;  %v1530_v41 = vshll.u32 %v1454_v22, 16  ;;  %vm10865_vm14 = vcmask 519424   ;;  %v2686_v16 = vrot.slane %v2685_v34, 4  ;;  %v3015_v46 = vld [vmem:[#allocation2 + $0x44] sm:$0xf] }
 0x10d   : > { %4042 = vst.msk [vmem:[#allocation3 + $0x34] sm:$0xf] %vm10865_vm14, %v3951_v43  ;;  %v4116_v47 = vsel %vm8468_vm4, 0, %v4083_v5  ;;  %v3047_v54 = vsel %vm8468_vm4, 0, %v3014_v37  ;;  %v1455_v61 = vsel %vm7799_vm12, 0, %v939_v51  ;;  %2896 = vrot.lane.b32.xlu0 %v2681_v55, %s7158_s15  ;;  %vm883_vm11 = vcmp.eq.s32.totalorder %v587_v57, 0  ;;  %v2881_v7 = vpop.permute.xlu0 %2880  ;;  %v3953_v53 = vpop.permute.xlu1 %3952  ;;  %vm10866_vm12 = vmmov %vm10865_vm14 }
 0x10e   : > { %v4250_v59 = vshrl.u32 %v4116_v47, 16  ;;  %v4253_v60 = vshll.u32 %v4116_v47, 16  ;;  %v3181_v44 = vshrl.u32 %v3047_v54, 16  ;;  %v2691_v27 = vsel %vm7417_vm2, %v2686_v16, %v8456_v8  ;;  %vm1044_vm7 = vmpackc.low %vm883_vm11, %vm883_vm11  ;;  %4043 = vst.msk [vmem:[#allocation3 + $0x40] sm:$0xf] %vm10866_vm12, %v3953_v53 }
 0x10f   : > { %v3184_v19 = vshll.u32 %v3047_v54, 16  ;;  %v1529_v58 = vrot.slane %v1527_v23, 7  ;;  %v1536_v14 = vshrl.u32 %v1455_v61, 16  ;;  %v1076_v33 = vsel %vm1044_vm7, 65537, %v10798_v15  ;;  %v5208_v37 = vld [vmem:[#allocation3 + $0x24] sm:$0xff]  ;;  %vm10868_vm11 = vmmov %vm10866_vm12 }
 0x110   : > { %3968 = vrot.lane.b32.xlu1 %v3761_v0, %s7154_s29  ;;  %v8488_v36 = vrot.slane %v4250_v59, 7  ;;  %v8491_v3 = vrot.slane %v3181_v44, 7  ;;  %v1539_v55 = vshll.u32 %v1455_v61, 16  ;;  %v1237_v17 = vshll.u32 %v1076_v33, 16  ;;  %v7008_v35 = vld [vmem:[#allocation3 + $0x1c] ss:$12 sps:$4 sm:$0xff]  }
 0x111   : > { %v1241_v18 = vshrl.u32 %v1076_v33, 16  ;;  %v1532_v11 = vor.u32 %v1530_v41, %v1529_v58  ;;  %v1534_v50 = vrot.slane %v1529_v58, 4  ;;  %v7018_v20 = vld [vmem:[#allocation3 + $0x68] ss:$12 sps:$4 sm:$0xff]   ;;  %v8500_v57 = vrot.slane %v1536_v14, 7  ;;  %v5206_v41 = vld [vmem:[#allocation3 + $0x18] sm:$0xff]  ;;  %5746 = vmatprep.mubr.bf16.mxu0 %v7008_v35  ;;  %v2883_v59 = vpop.permute.xlu1 %2882 }
 0x112   : > { %v4255_v51 = vor.u32 %v4253_v60, %v8488_v36  ;;  %v4257_v5 = vrot.slane %v8488_v36, 4  ;;  %v3186_v0 = vor.u32 %v3184_v19, %v8491_v3  ;;  %v3188_v34 = vrot.slane %v8491_v3, 4  ;;  %v4084_v16 = vld [vmem:[#allocation2 + $0x4c] sm:$0xf]  ;;  %v4437_v60 = vpop.permute.xlu0 %4436  ;;  %v4764_v36 = vld [vmem:[#allocation2 + $0x58] sm:$0xf] }
 0x113   : > { %v1239_v22 = vrot.slane %v1237_v17, 5  ;;  %v1533_v43 = vsel %vm7396_vm15, %v1525_v52, %v1532_v11  ;;  %v468_v23 = vadd.s32 120, %v7307_v12  ;;  %v3764_v52 = vrot.slane %v3762_v32, 4  ;;  %v7019_v61 = vld [vmem:[#allocation3 + $0x80] ss:$12 sps:$4 sm:$0xff]  }
 0x114   : > { %2898 = vrot.lane.b32.xlu1 %v2691_v27, %s7158_s15  ;;  %v4256_v48 = vsel %vm7396_vm15, %v4248_v63, %v4255_v51  ;;  %v3187_v47 = vsel %vm7396_vm15, %v3179_v25, %v3186_v0  ;;  %1813 = vst.msk [vmem:[#allocation3 + $0x30] sm:$0xf] %vm419_vm1, %v1533_v43  ;;  %v6572_v54 = vcombine.low %v5206_v41, %v5208_v37  ;;  %vm10867_vm14 = vcmask 261120   ;;  %v940_v27 = vld [vmem:[#allocation2 + $0x20] sm:$0xf] }
 0x115   : > { %6869 = vmatprep.mubr.msk.bf16.mxu1 %vm10867_vm14, %v7018_v20  ;;  %4452 = vrot.lane.b32.xlu0 %v4256_v48, %s7158_s15  ;;  %v1240_v9 = vsel %vm7417_vm2, %v7410_v29, %v1239_v22  ;;  %2006 = vst.msk [vmem:[#allocation3 + $0x30] sm:$0xf] %vm10868_vm11, %v8436_v2  ;;  %v1541_v63 = vor.u32 %v1539_v55, %v8500_v57  ;;  %v594_v25 = vand.u32 15, %v468_v23  ;;  %v2694_v45 = vrot.slane %v2692_v4, 4  ;;  %vm10871_vm12 = vmmov %vm10867_vm14  ;;  %v4568_v55 = vld [vmem:[#allocation2 + $0x48] sm:$0xf] }
 0x116   : > { %vm8523_vm7 = vcmp.ne.s16.totalorder %v1240_v9, 0  ;;  %2973 = vst.msk [vmem:[#allocation3 + $0x30] sm:$0xf] %vm10800_vm6, %v2881_v7  ;;  %v3765_v44 = vor.u32 %v3764_v52, %v8430_v56  ;;  %4528 = vst.msk [vmem:[#allocation3 + $0x34] sm:$0xf] %vm10800_vm6, %v4437_v60  ;;  %5747 = vmatmul.mubr.bf16.gmra.mxu0 %v6572_v54  ;;  %v1243_v2 = vrot.slane %v1241_v18, 4  ;;  %6870 = vmatmul.mubr.msk.bf16.gmra.mxu1 %vm10871_vm12, %v7019_v61  ;;  %v4439_v20 = vpop.permute.xlu1 %4438 }
 0x117   : > { %v469_v21 = vadd.s32 128, %v7307_v12  ;;  %v4117_v28 = vsel %vm8523_vm7, 0, %v4084_v16  ;;  %v3048_v4 = vsel %vm8523_vm7, 0, %v3015_v46  ;;  %v1542_v19 = vsel %vm7396_vm15, %v1534_v50, %v1541_v63  ;;  %v3500_v56 = vld [vmem:[#allocation2 + $0x40] sm:$0xf]  ;;  %v3368_v50 = vpop.permute.xlu0 %3367 }
 0x118   : > { %vm916_vm14 = vcmp.eq.s32.totalorder %v594_v25, 15  ;;  %v4259_v58 = vshrl.u32 %v4117_v28, 16  ;;  %v4262_v14 = vshll.u32 %v4117_v28, 16  ;;  %v3190_v7 = vshrl.u32 %v3048_v4, 16  ;;  %1814 = vst.msk [vmem:[#allocation3 + $0x3c] sm:$0xf] %vm419_vm1, %v1542_v19 }
 0x119   : > { %v3193_v33 = vshll.u32 %v3048_v4, 16  ;;  %vm2146_vm11 = vmpackc.low %vm916_vm14, %vm916_vm14  ;;  %3532 = vst.msk [vmem:[#allocation3 + $0x94] sm:$0xf] %vm419_vm1, %v3500_v56  ;;  %3383 = vrot.lane.b32.xlu0 %v3187_v47, %s7157_s14  ;;  %vm10872_vm12 = vcmask 519424   ;;  %v8544_v18 = vrot.slane %v3765_v44, 4  ;;  %v2695_v11 = vor.u32 %v2694_v45, %v8456_v8 }
 0x11a   : > { %2007 = vst.msk [vmem:[#allocation3 + $0x3c] sm:$0xf] %vm10872_vm12, %v8479_v1  ;;  %v2178_v17 = vsel %vm2146_vm11, 65537, %v10798_v15  ;;  %v1244_v53 = vor.u32 %v1243_v2, %v1239_v22  ;;  %v3501_v37 = vld [vmem:[#allocation2 + $0x44] sm:$0xf]  ;;  %v8547_v35 = vrot.slane %v4259_v58, 7  ;;  %v3370_v3 = vpop.permute.xlu1 %3369 }
 0x11b   : > { %v8549_v51 = vrot.slane %v3190_v7, 7  ;;  %v2330_v0 = vshrl.u32 %v2178_v17, 16  ;;  %v2333_v46 = vshll.u32 %v2178_v17, 16  ;;  %2974 = vst.msk [vmem:[#allocation3 + $0x3c] sm:$0xf] %vm10800_vm6, %v2883_v59  ;;  %v8554_v1 = vrot.slane %v2695_v11, 4  ;;  %v4629_v61 = vpop.permute.xlu0 %4628 }
 0x11c   : > { %3460 = vst.msk [vmem:[#allocation3 + $0x30] sm:$0xf] %vm10797_vm3, %v3368_v50  ;;  %v1245_v43 = vrot.slane %v1244_v53, 4  ;;  %v601_v8 = vand.u32 15, %v469_v21  ;;  %v8558_v22 = vsel %vm7871_vm9, 0, %v940_v27  ;;  %v4264_v23 = vor.u32 %v4262_v14, %v8547_v35 }
 0x11d   : > { %3533 = vst.msk [vmem:[#allocation3 + $0xa0] sm:$0xf] %vm419_vm1, %v3501_v37  ;;  %v3195_v41 = vor.u32 %v3193_v33, %v8549_v51  ;;  %v1855_v48 = vld [vmem:[#allocation2 + $0x40] sm:$0xf]  ;;  %v2332_v16 = vrot.slane %v2330_v0, 7  ;;  %v4266_v47 = vrot.slane %v8547_v35, 4  ;;  %4644 = vrot.lane.b32.xlu0 %v4568_v55, %s7157_s14 }
 0x11e   : > { %4529 = vst.msk [vmem:[#allocation3 + $0x40] sm:$0xf] %vm10800_vm6, %v4439_v20  ;;  %v3567_v52 = vld [vmem:[#allocation2 + $0x4c] sm:$0xf]  ;;  %v1250_v54 = vsel %vm7417_vm2, %v1245_v43, %v7324_v26  ;;  %vm8568_vm9 = vcmp.eq.s32.totalorder %v601_v8, 0  ;;  %v3197_v63 = vrot.slane %v8549_v51, 4  ;;  %v4265_v59 = vsel %vm7396_vm15, %v4257_v5, %v4264_v23  ;;  %v4631_v8 = vpop.permute.xlu1 %4630 }
 0x11f   : > { %v1543_v25 = vrot.slane %v8500_v57, 4  ;;  %v3196_v60 = vsel %vm7396_vm15, %v3188_v34, %v3195_v41  ;;  %v2335_v45 = vor.u32 %v2333_v46, %v2332_v16  ;;  %v4763_v44 = vld [vmem:[#allocation2 + $0x54] sm:$0xf]  ;;  %v2337_v2 = vrot.slane %v2332_v16, 4  ;;  %v3568_v21 = vld [vmem:[#allocation2 + $0x50] sm:$0xf]  ;;  %vm1046_vm14 = vmpackc.low %vm8568_vm9, %vm8568_vm9  ;;  %4454 = vrot.lane.b32.xlu1 %v4265_v59, %s7158_s15  ;;  %v8615_v55 = vpop.permute.xlu0 %1917 }
 0x120   : > { %4720 = vst.msk [vmem:[#allocation3 + $0x34] sm:$0xf] %vm10797_vm3, %v4629_v61  ;;  %vm8587_vm11 = vcmp.ne.s16.totalorder %v1250_v54, 0  ;;  %v8592_v34 = vsel %vm1046_vm14, 65537, %v10798_v15  ;;  %v1545_v27 = vshrl.u32 %v8558_v22, 16  ;;  %v1548_v28 = vshll.u32 %v8558_v22, 16 }
 0x121   : > { %v2336_v4 = vsel %vm7396_vm15, %v7350_v40, %v2335_v45  ;;  %v2345_v19 = vsel %vm7396_vm15, %v2337_v2, %v7348_v39  ;;  %v8604_v56 = vsel %vm8587_vm11, 0, %v4085_v49  ;;  %3461 = vst.msk [vmem:[#allocation3 + $0x3c] sm:$0xf] %vm10797_vm3, %v3370_v3  ;;  %v1257_v58 = vshll.u32 %v8592_v34, 16  ;;  %1933 = vrot.lane.b32.xlu0 %v1855_v48, %s7154_s29  ;;  %v4569_v37 = vld [vmem:[#allocation2 + $0x4c] sm:$0xf] }
 0x122   : > { %vm8609_vm12 = vcmp.ne.s16.totalorder %v2336_v4, 0  ;;  %vm2498_vm9 = vcmp.ne.s16.totalorder %v2345_v19, 0  ;;  %v4268_v7 = vshrl.u32 %v8604_v56, 16  ;;  %v4271_v33 = vshll.u32 %v8604_v56, 16  ;;  %4721 = vst.msk [vmem:[#allocation3 + $0x40] sm:$0xf] %vm10797_vm3, %v4631_v8 }
 0x123   : > { %v3600_v17 = vsel %vm8609_vm12, 0, %v3567_v52  ;;  %v4796_v11 = vsel %vm8609_vm12, 0, %v4763_v44  ;;  %v3601_v50 = vsel %vm2498_vm9, 0, %v3568_v21  ;;  %v4797_v53 = vsel %vm2498_vm9, 0, %v4764_v36  ;;  %3385 = vrot.lane.b32.xlu1 %v3196_v60, %s7157_s14  ;;  %v2049_v52 = vld [vmem:[#allocation2 + $0x44] sm:$0xf]  ;;  %v3955_v45 = vpop.permute.xlu0 %3954 }
 0x124   : > { %v3768_v0 = vshll.u32 %v3600_v17, 16  ;;  %v3772_v46 = vshrl.u32 %v3600_v17, 16  ;;  %v4964_v20 = vshll.u32 %v4796_v11, 16  ;;  %v4968_v43 = vshrl.u32 %v4796_v11, 16  ;;  %v2050_v59 = vld [vmem:[#allocation2 + $0x48] sm:$0xf]  ;;  %v8637_v11 = vpop.permute.xlu1 %1919 }
 0x125   : > { %v3778_v23 = vshll.u32 %v3601_v50, 16  ;;  %v3782_v41 = vshrl.u32 %v3601_v50, 16  ;;  %v4974_v48 = vshll.u32 %v4797_v53, 16  ;;  %v4978_v16 = vshrl.u32 %v4797_v53, 16  ;;  %v1856_v50 = vld [vmem:[#allocation2 + $0x44] sm:$0xf] }
 0x126   : > { %v3770_v54 = vrot.slane %v3768_v0, 5  ;;  %v4966_v49 = vrot.slane %v4964_v20, 5  ;;  %v4970_v61 = vrot.slane %v4968_v43, 4  ;;  %v3774_v9 = vrot.slane %v3772_v46, 4 }
 0x127   : > { %v8625_v60 = vrot.slane %v3778_v23, 5  ;;  %v8627_v44 = vrot.slane %v3782_v41, 4  ;;  %v4976_v2 = vrot.slane %v4974_v48, 5  ;;  %v4980_v21 = vrot.slane %v4978_v16, 4  ;;  %4646 = vrot.lane.b32.xlu1 %v4569_v37, %s7157_s14  ;;  %v8646_v8 = vpop.permute.xlu0 %2884 }
 0x128   : > { %vm10879_vm14 = vcmask 519424   ;;  %v3771_v36 = vsel %vm7417_vm2, %v8544_v18, %v3770_v54  ;;  %v4967_v3 = vsel %vm7417_vm2, %v8453_v31, %v4966_v49  ;;  %v4971_v4 = vor.u32 %v4970_v61, %v4966_v49  ;;  %v3016_v49 = vld [vmem:[#allocation2 + $0x48] sm:$0xf]  ;;  %v3957_v61 = vpop.permute.xlu1 %3956 }
 0x129   : > { %4044 = vst.msk [vmem:[#allocation3 + $0x4c] sm:$0xf] %vm10879_vm14, %v3955_v45  ;;  %v3775_v17 = vor.u32 %v3774_v9, %v3770_v54  ;;  %3970 = vrot.lane.b32.xlu0 %v3771_v36, %s7154_s29  ;;  %v3785_v53 = vor.u32 %v8627_v44, %v8625_v60  ;;  %v4981_v37 = vor.u32 %v4980_v21, %v4976_v2  ;;  %v2530_v18 = vsel %vm8609_vm12, 0, %v2049_v52  ;;  %v7010_v9 = vld [vmem:[#allocation3 + $0x34] ss:$12 sps:$4 sm:$0xff]   ;;  %vm10880_vm12 = vmmov %vm10879_vm14 }
 0x12a   : > { %5184 = vst.msk [vmem:[#allocation3 + $0xb0] sm:$0xf] %vm419_vm1, %v4967_v3  ;;  %v2531_v0 = vsel %vm2498_vm9, 0, %v2050_v59  ;;  %v4972_v46 = vrot.slane %v4971_v4, 4  ;;  %v2698_v20 = vshll.u32 %v2530_v18, 16  ;;  %v2702_v43 = vshrl.u32 %v2530_v18, 16  ;;  %5754 = vmatprep.mubr.bf16.mxu0 %v7010_v9 }
 0x12b   : > { %v3776_v31 = vrot.slane %v3775_v17, 4  ;;  %v8648_v23 = vrot.slane %v4981_v37, 4  ;;  %v2708_v41 = vshll.u32 %v2531_v0, 16  ;;  %v2712_v48 = vshrl.u32 %v2531_v0, 16  ;;  %1935 = vrot.lane.b32.xlu1 %v1856_v50, %s7154_s29  ;;  %4045 = vst.msk [vmem:[#allocation3 + $0x58] sm:$0xf] %vm10880_vm12, %v3957_v61  ;;  %v4441_v56 = vpop.permute.xlu0 %4440 }
 0x12c   : > { %v8650_v16 = vrot.slane %v4268_v7, 7  ;;  %v4977_v19 = vsel %vm7417_vm2, %v4972_v46, %v4976_v2  ;;  %v2700_v52 = vrot.slane %v2698_v20, 5  ;;  %v2704_v54 = vrot.slane %v2702_v43, 4  ;;  %v4086_v4 = vld [vmem:[#allocation2 + $0x54] sm:$0xf]  ;;  %v5212_v61 = vld [vmem:[#allocation3 + $0x3c] sm:$0xff] }
 0x12d   : > { %v3781_v14 = vsel %vm7417_vm2, %v3776_v31, %v8625_v60  ;;  %5185 = vst.msk [vmem:[#allocation3 + $0xbc] sm:$0xf] %vm419_vm1, %v4977_v19  ;;  %v8659_v59 = vrot.slane %v2708_v41, 5  ;;  %v8661_v7 = vrot.slane %v2712_v48, 4  ;;  %v8668_v21 = vrot.slane %v1257_v58, 5 }
 0x12e   : > { %v4273_v45 = vor.u32 %v4271_v33, %v8650_v16  ;;  %v2701_v2 = vsel %vm7417_vm2, %v8554_v1, %v2700_v52  ;;  %v2705_v36 = vor.u32 %v2704_v54, %v2700_v52  ;;  %v1261_v3 = vshrl.u32 %v8592_v34, 16  ;;  %v3017_v50 = vld [vmem:[#allocation2 + $0x4c] sm:$0xf]  ;;  %4530 = vst.msk [vmem:[#allocation3 + $0x4c] sm:$0xf] %vm10800_vm6, %v4441_v56 }
 0x12f   : > { %v4275_v17 = vrot.slane %v8650_v16, 4  ;;  %2900 = vrot.lane.b32.xlu0 %v2701_v2, %s7158_s15  ;;  %v2715_v58 = vor.u32 %v8661_v7, %v8659_v59  ;;  %v1260_v1 = vsel %vm7417_vm2, %v7410_v29, %v8668_v21  ;;  %v3049_v34 = vsel %vm8587_vm11, 0, %v3016_v49  ;;  %3972 = vrot.lane.b32.xlu1 %v3781_v14, %s7154_s29  ;;  %v941_v41 = vld [vmem:[#allocation2 + $0x24] sm:$0xf]  ;;  %v3372_v9 = vpop.permute.xlu0 %3371  ;;  %v4087_v44 = vld [vmem:[#allocation2 + $0x58] sm:$0xf] }
 0x130   : > { %v4274_v33 = vsel %vm7396_vm15, %v4266_v47, %v4273_v45  ;;  %v2706_v37 = vrot.slane %v2705_v36, 4  ;;  %v1263_v18 = vrot.slane %v1261_v3, 4  ;;  %vm8691_vm9 = vcmp.ne.s16.totalorder %v1260_v1, 0  ;;  %v8695_v47 = vpop.permute.xlu1 %2886  ;;  %v5210_v1 = vld [vmem:[#allocation3 + $0x30] sm:$0xff] }
 0x131   : > { %v3199_v35 = vshrl.u32 %v3049_v34, 16  ;;  %v4119_v46 = vsel %vm8691_vm9, 0, %v4086_v4  ;;  %v3202_v31 = vshll.u32 %v3049_v34, 16  ;;  %v8701_v20 = vrot.slane %v1545_v27, 7  ;;  %v3502_v4 = vld [vmem:[#allocation2 + $0x48] sm:$0xf] }
 0x132   : > { %v3050_v43 = vsel %vm8691_vm9, 0, %v3017_v50  ;;  %v2711_v48 = vsel %vm7417_vm2, %v2706_v37, %v8659_v59  ;;  %v1264_v16 = vor.u32 %v1263_v18, %v8668_v21  ;;  %v4277_v14 = vshrl.u32 %v4119_v46, 16  ;;  %3534 = vst.msk [vmem:[#allocation3 + $0xac] sm:$0xf] %vm419_vm1, %v3502_v4  ;;  %v4570_v34 = vld [vmem:[#allocation2 + $0x50] sm:$0xf] }
 0x133   : > { %v4280_v19 = vshll.u32 %v4119_v46, 16  ;;  %4456 = vrot.lane.b32.xlu0 %v4274_v33, %s7158_s15  ;;  %v3201_v52 = vrot.slane %v3199_v35, 7  ;;  %v1550_v27 = vor.u32 %v1548_v28, %v8701_v20  ;;  %v3208_v54 = vshrl.u32 %v3050_v43, 16  ;;  %2902 = vrot.lane.b32.xlu1 %v2711_v48, %s7158_s15  ;;  %v4633_v35 = vpop.permute.xlu0 %4632  ;;  %v942_v46 = vld [vmem:[#allocation2 + $0x28] sm:$0xf] }
 0x134   : > { %v3211_v49 = vshll.u32 %v3050_v43, 16  ;;  %v8714_v7 = vrot.slane %v4277_v14, 7  ;;  %v1457_v59 = vsel %vm7937_vm0, 0, %v941_v41  ;;  %v1552_v45 = vrot.slane %v8701_v20, 4  ;;  %v4443_v3 = vpop.permute.xlu1 %4442  ;;  %vm10883_vm0 = vmmov %vm10880_vm12  ;;  %4722 = vst.msk [vmem:[#allocation3 + $0x4c] sm:$0xf] %vm10797_vm3, %v4633_v35 }
 0x135   : > { %v470_v21 = vadd.s32 136, %v7307_v12  ;;  %v3204_v2 = vor.u32 %v3202_v31, %v3201_v52  ;;  %v1551_v22 = vsel %vm7396_vm15, %v1543_v25, %v1550_v27  ;;  %v3206_v28 = vrot.slane %v3201_v52, 4  ;;  %4531 = vst.msk [vmem:[#allocation3 + $0x58] sm:$0xf] %vm10800_vm6, %v4443_v3  ;;  %v3503_v20 = vld [vmem:[#allocation2 + $0x4c] sm:$0xf] }
 0x136   : > { %v8724_v36 = vrot.slane %v3208_v54, 7  ;;  %v4282_v50 = vor.u32 %v4280_v19, %v8714_v7  ;;  %1815 = vst.msk [vmem:[#allocation3 + $0x48] sm:$0xf] %vm419_vm1, %v1551_v22  ;;  %v1554_v30 = vshrl.u32 %v1457_v59, 16  ;;  %v1557_v56 = vshll.u32 %v1457_v59, 16 }
 0x137   : > { %v608_v33 = vand.u32 15, %v470_v21  ;;  %v3205_v57 = vsel %vm7396_vm15, %v3197_v63, %v3204_v2  ;;  %2008 = vst.msk [vmem:[#allocation3 + $0x48] sm:$0xf] %vm10883_vm0, %v8615_v55  ;;  %v8740_v37 = vrot.slane %v3785_v53, 4  ;;  %v6575_v18 = vcombine.low %v5210_v1, %v5212_v61  ;;  %v3018_v48 = vld [vmem:[#allocation2 + $0x50] sm:$0xf] }
 0x138   : > { %v3213_v25 = vor.u32 %v3211_v49, %v8724_v36  ;;  %v4283_v51 = vsel %vm7396_vm15, %v4275_v17, %v4282_v50  ;;  %3387 = vrot.lane.b32.xlu0 %v3205_v57, %s7157_s14  ;;  %v8745_v63 = vrot.slane %v1554_v30, 7  ;;  %2975 = vst.msk [vmem:[#allocation3 + $0x48] sm:$0xf] %vm10800_vm6, %v8646_v8  ;;  %v8753_v60 = vrot.slane %v2715_v58, 4  ;;  %v3374_v58 = vpop.permute.xlu1 %3373  ;;  %v8776_v49 = vpop.permute.xlu0 %1921  ;;  %v943_v2 = vld [vmem:[#allocation2 + $0x2c] sm:$0xf] }
 0x139   : > { %vm8749_vm14 = vcmp.eq.s32.totalorder %v608_v33, 15  ;;  %4458 = vrot.lane.b32.xlu1 %v4283_v51, %s7158_s15  ;;  %5755 = vmatmul.mubr.bf16.gmra.mxu0 %v6575_v18  ;;  %3462 = vst.msk [vmem:[#allocation3 + $0x48] sm:$0xf] %vm10797_vm3, %v3372_v9  ;;  %v1265_v8 = vrot.slane %v1264_v16, 4  ;;  %v4284_v17 = vrot.slane %v8714_v7, 4  ;;  %v471_v31 = vadd.s32 144, %v7307_v12 }
 0x13a   : > { %v3214_v53 = vsel %vm7396_vm15, %v3206_v28, %v3213_v25  ;;  %vm2148_vm12 = vmpackc.low %vm8749_vm14, %vm8749_vm14  ;;  %v1559_v43 = vor.u32 %v1557_v56, %v8745_v63  ;;  %v3215_v14 = vrot.slane %v8724_v36, 4  ;;  %v8770_v19 = vsel %vm8062_vm10, 0, %v942_v46  ;;  %3535 = vst.msk [vmem:[#allocation3 + $0xb8] sm:$0xf] %vm419_vm1, %v3503_v20  ;;  %v4571_v9 = vld [vmem:[#allocation2 + $0x54] sm:$0xf] }
 0x13b   : > { %v2180_v41 = vsel %vm2148_vm12, 65537, %v10798_v15  ;;  %v1270_v27 = vsel %vm7417_vm2, %v1265_v8, %v7324_v26  ;;  %v615_v54 = vand.u32 15, %v471_v31  ;;  %v1561_v59 = vrot.slane %v8745_v63, 4  ;;  %v1857_v22 = vld [vmem:[#allocation2 + $0x48] sm:$0xf] }
 0x13c   : > { %v2348_v16 = vshrl.u32 %v2180_v41, 16  ;;  %v2351_v52 = vshll.u32 %v2180_v41, 16  ;;  %4648 = vrot.lane.b32.xlu0 %v4570_v34, %s7157_s14  ;;  %v1560_v61 = vsel %vm7396_vm15, %v1552_v45, %v1559_v43  ;;  %vm8781_vm0 = vcmp.ne.s16.totalorder %v1270_v27, 0  ;;  %v4635_v50 = vpop.permute.xlu1 %4634  ;;  %v3569_v30 = vld [vmem:[#allocation2 + $0x54] sm:$0xf]  ;;  %v3959_v51 = vpop.permute.xlu0 %3958 }
 0x13d   : > { %v1563_v21 = vshrl.u32 %v8770_v19, 16  ;;  %3389 = vrot.lane.b32.xlu1 %v3214_v53, %s7157_s14  ;;  %1816 = vst.msk [vmem:[#allocation3 + $0x54] sm:$0xf] %vm419_vm1, %v1560_v61  ;;  %v4120_v3 = vsel %vm8781_vm0, 0, %v4087_v44  ;;  %vm8791_vm10 = vcmp.eq.s32.totalorder %v615_v54, 0  ;;  %v8797_v4 = vsel %vm8781_vm0, 0, %v3018_v48 }
 0x13e   : > { %v2350_v28 = vrot.slane %v2348_v16, 7  ;;  %vm10890_vm14 = vcmask 519424   ;;  %v4765_v56 = vld [vmem:[#allocation2 + $0x5c] sm:$0xf]  ;;  %v4286_v33 = vshrl.u32 %v4120_v3, 16  ;;  %v4289_v1 = vshll.u32 %v4120_v3, 16  ;;  %vm1048_vm12 = vmpackc.low %vm8791_vm10, %vm8791_vm10 }
 0x13f   : > { %2009 = vst.msk [vmem:[#allocation3 + $0x54] sm:$0xf] %vm10890_vm14, %v8637_v11  ;;  %v3217_v57 = vshrl.u32 %v8797_v4, 16  ;;  %v3220_v25 = vshll.u32 %v8797_v4, 16  ;;  %v3570_v11 = vld [vmem:[#allocation2 + $0x58] sm:$0xf]  ;;  %vm10891_vm10 = vmmov %vm10890_vm14 }
 0x140   : > { %4723 = vst.msk [vmem:[#allocation3 + $0x58] sm:$0xf] %vm10797_vm3, %v4635_v50  ;;  %v2353_v34 = vor.u32 %v2351_v52, %v2350_v28  ;;  %v2355_v18 = vrot.slane %v2350_v28, 4  ;;  %v8810_v35 = vsel %vm1048_vm12, 65537, %v10798_v15  ;;  %v8812_v46 = vrot.slane %v1563_v21, 7  ;;  %1937 = vrot.lane.b32.xlu0 %v1857_v22, %s7154_s29  ;;  %v8835_v48 = vpop.permute.xlu1 %1923 }
 0x141   : > { %2976 = vst.msk [vmem:[#allocation3 + $0x54] sm:$0xf] %vm10800_vm6, %v8695_v47  ;;  %v4766_v55 = vld [vmem:[#allocation2 + $0x60] sm:$0xf]  ;;  %v8815_v44 = vrot.slane %v4286_v33, 7  ;;  %v1277_v53 = vshll.u32 %v8810_v35, 16  ;;  %4650 = vrot.lane.b32.xlu1 %v4571_v9, %s7157_s14  ;;  %v8852_v33 = vpop.permute.xlu0 %2888 }
 0x142   : > { %3463 = vst.msk [vmem:[#allocation3 + $0x54] sm:$0xf] %vm10797_vm3, %v3374_v58  ;;  %v1281_v8 = vshrl.u32 %v8810_v35, 16  ;;  %v8820_v47 = vrot.slane %v3217_v57, 7  ;;  %v1858_v31 = vld [vmem:[#allocation2 + $0x4c] sm:$0xf]  ;;  %v2354_v20 = vsel %vm7396_vm15, %v7350_v40, %v2353_v34  ;;  %v2363_v43 = vsel %vm7396_vm15, %v2355_v18, %v7348_v39 }
 0x143   : > { %4046 = vst.msk [vmem:[#allocation3 + $0x64] sm:$0xf] %vm10891_vm10, %v3959_v51  ;;  %v1566_v58 = vshll.u32 %v8770_v19, 16  ;;  %v8833_v41 = vsel %vm8132_vm13, 0, %v943_v2  ;;  %vm8837_vm14 = vcmp.ne.s16.totalorder %v2354_v20, 0  ;;  %vm2500_vm12 = vcmp.ne.s16.totalorder %v2363_v43, 0 }
 0x144   : > { %v4291_v52 = vor.u32 %v4289_v1, %v8815_v44  ;;  %v8842_v27 = vrot.slane %v1277_v53, 5  ;;  %v7024_v54 = vld [vmem:[#allocation3 + $0x98] ss:$12 sps:$4 sm:$0xff]   ;;  %v3602_v61 = vsel %vm8837_vm14, 0, %v3569_v30  ;;  %v4798_v10 = vsel %vm8837_vm14, 0, %v4765_v56  ;;  %v3961_v34 = vpop.permute.xlu1 %3960 }
 0x145   : > { %v8849_v9 = vsel %vm2500_vm12, 0, %v3570_v11  ;;  %v4799_v21 = vsel %vm2500_vm12, 0, %v4766_v55  ;;  %v7025_v2 = vld [vmem:[#allocation3 + $0xb0] ss:$12 sps:$4 sm:$0xff]   ;;  %v3788_v22 = vshll.u32 %v3602_v61, 16  ;;  %v3792_v28 = vshrl.u32 %v3602_v61, 16  ;;  %1939 = vrot.lane.b32.xlu1 %v1858_v31, %s7154_s29 }
 0x146   : > { %v4984_v3 = vshll.u32 %v4798_v10, 16  ;;  %v4988_v45 = vshrl.u32 %v4798_v10, 16  ;;  %v2051_v50 = vld [vmem:[#allocation2 + $0x4c] sm:$0xf]  ;;  %vm10894_vm13 = vcmask 261120   ;;  %v3798_v30 = vshll.u32 %v8849_v9, 16 }
 0x147   : > { %6873 = vmatprep.mubr.msk.bf16.mxu1 %vm10894_vm13, %v7024_v54  ;;  %v3802_v56 = vshrl.u32 %v8849_v9, 16  ;;  %v4994_v1 = vshll.u32 %v4799_v21, 16  ;;  %v4998_v57 = vshrl.u32 %v4799_v21, 16  ;;  %vm10895_vm10 = vmmov %vm10894_vm13  ;;  %v3790_v18 = vrot.slane %v3788_v22, 5  ;;  %v2052_v53 = vld [vmem:[#allocation2 + $0x50] sm:$0xf] }
 0x148   : > { %6874 = vmatmul.mubr.msk.bf16.gmra.mxu1 %vm10895_vm10, %v7025_v2  ;;  %v4986_v11 = vrot.slane %v4984_v3, 5  ;;  %v4990_v51 = vrot.slane %v4988_v45, 4  ;;  %v3794_v55 = vrot.slane %v3792_v28, 4  ;;  %vm10896_vm3 = vcmask 519424   ;;  %v7014_v28 = vld [vmem:[#allocation3 + $0x4c] ss:$12 sps:$4 sm:$0xff]  }
 0x149   : > { %4047 = vst.msk [vmem:[#allocation3 + $0x70] sm:$0xf] %vm10896_vm3, %v3961_v34  ;;  %v8860_v20 = vrot.slane %v3798_v30, 5  ;;  %v4996_v54 = vrot.slane %v4994_v1, 5  ;;  %v5000_v31 = vrot.slane %v4998_v57, 4  ;;  %v2532_v61 = vsel %vm8837_vm14, 0, %v2051_v50  ;;  %5762 = vmatprep.mubr.bf16.mxu0 %v7014_v28  ;;  %v4445_v34 = vpop.permute.xlu0 %4444 }
 0x14a   : > { %v3791_v10 = vsel %vm7417_vm2, %v8740_v37, %v3790_v18  ;;  %v4987_v21 = vsel %vm7417_vm2, %v8648_v23, %v4986_v11  ;;  %v4991_v2 = vor.u32 %v4990_v51, %v4986_v11  ;;  %v3795_v22 = vor.u32 %v3794_v55, %v3790_v18  ;;  %v4088_v23 = vld [vmem:[#allocation2 + $0x5c] sm:$0xf]  ;;  %v3019_v55 = vld [vmem:[#allocation2 + $0x54] sm:$0xf]  ;;  %4532 = vst.msk [vmem:[#allocation3 + $0x64] sm:$0xf] %vm10800_vm6, %v4445_v34 }
 0x14b   : > { %5186 = vst.msk [vmem:[#allocation3 + $0xc8] sm:$0xf] %vm419_vm1, %v4987_v21  ;;  %3974 = vrot.lane.b32.xlu0 %v3791_v10, %s7154_s29  ;;  %v5001_v3 = vor.u32 %v5000_v31, %v4996_v54  ;;  %v2718_v45 = vshll.u32 %v2532_v61, 16  ;;  %v2722_v30 = vshrl.u32 %v2532_v61, 16  ;;  %v8873_v16 = vsel %vm2500_vm12, 0, %v2052_v53 }
 0x14c   : > { %v4992_v50 = vrot.slane %v4991_v2, 4  ;;  %v3796_v1 = vrot.slane %v3795_v22, 4  ;;  %v2728_v37 = vshll.u32 %v8873_v16, 16  ;;  %v2732_v57 = vshrl.u32 %v8873_v16, 16  ;;  %v280_v16 = vld [vmem:[%s7293_s28 + $0xa8] sm:$0xff] }
 0x14d   : > { %v8877_v18 = vrot.slane %v5001_v3, 4  ;;  %v2720_v11 = vrot.slane %v2718_v45, 5  ;;  %v2724_v51 = vrot.slane %v2722_v30, 4  ;;  %v4292_v43 = vsel %vm7396_vm15, %v4284_v17, %v4291_v52  ;;  %v3376_v28 = vpop.permute.xlu0 %3375 }
 0x14e   : > { %v3801_v53 = vsel %vm7417_vm2, %v3796_v1, %v8860_v20  ;;  %v4997_v31 = vsel %vm7417_vm2, %v4992_v50, %v4996_v54  ;;  %v8889_v61 = vrot.slane %v2728_v37, 5  ;;  %v1280_v7 = vsel %vm7417_vm2, %v7410_v29, %v8842_v27  ;;  %v8918_v50 = vpop.permute.xlu1 %2890  ;;  %v5216_v1 = vld [vmem:[#allocation3 + $0x54] sm:$0xff] }
 0x14f   : > { %5187 = vst.msk [vmem:[#allocation3 + $0xd4] sm:$0xf] %vm419_vm1, %v4997_v31  ;;  %3976 = vrot.lane.b32.xlu1 %v3801_v53, %s7154_s29  ;;  %v2721_v17 = vsel %vm7417_vm2, %v8753_v60, %v2720_v11  ;;  %v2725_v52 = vor.u32 %v2724_v51, %v2720_v11  ;;  %vm8900_vm3 = vcmp.ne.s16.totalorder %v1280_v7, 0  ;;  %v4293_v54 = vrot.slane %v8815_v44, 4  ;;  %v5214_v51 = vld [vmem:[#allocation3 + $0x48] sm:$0xff] }
 0x150   : > { %2904 = vrot.lane.b32.xlu0 %v2721_v17, %s7158_s15  ;;  %v4121_v21 = vsel %vm8900_vm3, 0, %v4088_v23  ;;  %v3222_v2 = vor.u32 %v3220_v25, %v8820_v47  ;;  %v1568_v60 = vor.u32 %v1566_v58, %v8812_v46  ;;  %v3052_v22 = vsel %vm8900_vm3, 0, %v3019_v55  ;;  %v281_v23 = vld [vmem:[%s7293_s28 + $0xb0] sm:$0xff] }
 0x151   : > { %v2726_v3 = vrot.slane %v2725_v52, 4  ;;  %v4295_v44 = vshrl.u32 %v4121_v21, 16  ;;  %v4298_v45 = vshll.u32 %v4121_v21, 16  ;;  %v3224_v30 = vrot.slane %v8820_v47, 4  ;;  %v4637_v55 = vpop.permute.xlu0 %4636 }
 0x152   : > { %v3223_v4 = vsel %vm7396_vm15, %v3215_v14, %v3222_v2  ;;  %v1569_v19 = vsel %vm7396_vm15, %v1561_v59, %v1568_v60  ;;  %v3226_v25 = vshrl.u32 %v3052_v22, 16  ;;  %v3229_v58 = vshll.u32 %v3052_v22, 16  ;;  %v944_v2 = vld [vmem:[#allocation2 + $0x30] sm:$0xf] }
 0x153   : > { %v2731_v47 = vsel %vm7417_vm2, %v2726_v3, %v8889_v61  ;;  %v8931_v37 = vrot.slane %v4295_v44, 7  ;;  %1817 = vst.msk [vmem:[#allocation3 + $0x60] sm:$0xf] %vm419_vm1, %v1569_v19  ;;  %v1570_v36 = vrot.slane %v8812_v46, 4  ;;  %v1572_v14 = vshrl.u32 %v8833_v41, 16 }
 0x154   : > { %2906 = vrot.lane.b32.xlu1 %v2731_v47, %s7158_s15  ;;  %4460 = vrot.lane.b32.xlu0 %v4292_v43, %s7158_s15  ;;  %vm10899_vm14 = vcmask 519424   ;;  %v8941_v63 = vrot.slane %v3226_v25, 7  ;;  %v1575_v59 = vshll.u32 %v8833_v41, 16  ;;  %v6697_v34 = vpack.c.bf16 %v280_v16, %v280_v16  ;;  %v3504_v60 = vld [vmem:[#allocation2 + $0x50] sm:$0xf] }
 0x155   : > { %2010 = vst.msk [vmem:[#allocation3 + $0x60] sm:$0xf] %vm10899_vm14, %v8776_v49  ;;  %v472_v11 = vadd.s32 152, %v7307_v12  ;;  %v4300_v46 = vor.u32 %v4298_v45, %v8931_v37  ;;  %v8946_v53 = vrot.slane %v1572_v14, 7  ;;  %v3804_v43 = vrot.slane %v3802_v56, 4  ;;  %v4447_v56 = vpop.permute.xlu1 %4446 }
 0x156   : > { %2977 = vst.msk [vmem:[#allocation3 + $0x60] sm:$0xf] %vm10800_vm6, %v8852_v33  ;;  %v6578_v49 = vcombine.low %v5214_v51, %v5216_v1  ;;  %vm10900_vm12 = vcmask 1044224   ;;  %v3231_v41 = vor.u32 %v3229_v58, %v8941_v63  ;;  %v6698_v7 = vpack.c.bf16 %v281_v23, %v281_v23  ;;  %4533 = vst.msk [vmem:[#allocation3 + $0x70] sm:$0xf] %vm10800_vm6, %v4447_v56 }
 0x157   : > { %4724 = vst.msk [vmem:[#allocation3 + $0x64] sm:$0xf] %vm10900_vm12, %v4637_v55  ;;  %v622_v31 = vand.u32 15, %v472_v11  ;;  %v2734_v17 = vrot.slane %v2732_v57, 4  ;;  %vm10901_vm13 = vmmov %vm10900_vm12  ;;  %v4301_v52 = vsel %vm7396_vm15, %v4293_v54, %v4300_v46  ;;  %v1577_v33 = vor.u32 %v1575_v59, %v8946_v53  ;;  %v945_v44 = vld [vmem:[#allocation2 + $0x34] sm:$0xf] }
 0x158   : > { %441 = vst.msk [vmem:[#allocation2 + $0x64] sm:$0xf] %vm419_vm1, %v6697_v34  ;;  %v3805_v9 = vor.u32 %v3804_v43, %v8860_v20  ;;  %5763 = vmatmul.mubr.bf16.gmra.mxu0 %v6578_v49  ;;  %v1283_v21 = vrot.slane %v1281_v8, 4  ;;  %4462 = vrot.lane.b32.xlu1 %v4301_v52, %s7158_s15  ;;  %v3232_v57 = vsel %vm7396_vm15, %v3224_v30, %v3231_v41  ;;  %442 = vst.msk [vmem:[#allocation2 + $0x68] sm:$0xf] %vm419_vm1, %v6698_v7  ;;  %vm10902_vm12 = vcmask 519424  }
 0x159   : > { %3464 = vst.msk [vmem:[#allocation3 + $0x60] sm:$0xf] %vm10901_vm13, %v3376_v28  ;;  %3391 = vrot.lane.b32.xlu0 %v3223_v4, %s7157_s14  ;;  %vm920_vm10 = vcmp.eq.s32.totalorder %v622_v31, 15  ;;  %v2735_v54 = vor.u32 %v2734_v17, %v8889_v61  ;;  %v4302_v35 = vrot.slane %v8931_v37, 4  ;;  %v4572_v8 = vld [vmem:[#allocation2 + $0x58] sm:$0xf]  ;;  %v1578_v20 = vsel %vm7396_vm15, %v1570_v36, %v1577_v33  ;;  %v3378_v58 = vpop.permute.xlu1 %3377 }
 0x15a   : > { %3536 = vst.msk [vmem:[#allocation3 + $0xc4] sm:$0xf] %vm419_vm1, %v3504_v60  ;;  %vm2150_vm14 = vmpackc.low %vm920_vm10, %vm920_vm10  ;;  %v8973_v22 = vrot.slane %v3805_v9, 4  ;;  %v1284_v28 = vor.u32 %v1283_v21, %v8842_v27  ;;  %v473_v3 = vadd.s32 160, %v7307_v12  ;;  %v3233_v30 = vrot.slane %v8941_v63, 4  ;;  %v282_v4 = vld [vmem:[%s7293_s28 + $0xb8] sm:$0xff] }
 0x15b   : > { %1818 = vst.msk [vmem:[#allocation3 + $0x6c] sm:$0xf] %vm419_vm1, %v1578_v20  ;;  %v2182_v61 = vsel %vm2150_vm14, 65537, %v10798_v15  ;;  %v8979_v45 = vrot.slane %v2735_v54, 4  ;;  %v1460_v16 = vsel %vm8238_vm8, 0, %v944_v2  ;;  %v1579_v13 = vrot.slane %v8946_v53, 4  ;;  %vm10903_vm8 = vmmov %vm10901_vm13 }
 0x15c   : > { %2011 = vst.msk [vmem:[#allocation3 + $0x6c] sm:$0xf] %vm10902_vm12, %v8835_v48  ;;  %v2366_v19 = vshrl.u32 %v2182_v61, 16  ;;  %v2369_v27 = vshll.u32 %v2182_v61, 16  ;;  %v1285_v25 = vrot.slane %v1284_v28, 4  ;;  %v629_v1 = vand.u32 15, %v473_v3  ;;  %3393 = vrot.lane.b32.xlu1 %v3232_v57, %s7157_s14  ;;  %vm10906_vm14 = vmmov %vm10903_vm8 }
 0x15d   : > { %v3505_v47 = vld [vmem:[#allocation2 + $0x54] sm:$0xf]  ;;  %4652 = vrot.lane.b32.xlu0 %v4572_v8, %s7157_s14  ;;  %2978 = vst.msk [vmem:[#allocation3 + $0x6c] sm:$0xf] %vm10800_vm6, %v8918_v50  ;;  %v4089_v36 = vld [vmem:[#allocation2 + $0x60] sm:$0xf]  ;;  %v6699_v50 = vpack.c.bf16 %v282_v4, %v282_v4  ;;  %v4639_v56 = vpop.permute.xlu1 %4638  ;;  %v9024_v8 = vpop.permute.xlu0 %1925 }
 0x15e   : > { %v1581_v14 = vshrl.u32 %v1460_v16, 16  ;;  %v1584_v23 = vshll.u32 %v1460_v16, 16  ;;  %v8994_v48 = vsel %vm8358_vm5, 0, %v945_v44  ;;  %3537 = vst.msk [vmem:[#allocation3 + $0xd0] sm:$0xf] %vm419_vm1, %v3505_v47  ;;  %v2368_v11 = vrot.slane %v2366_v19, 7 }
 0x15f   : > { %v4573_v59 = vld [vmem:[#allocation2 + $0x5c] sm:$0xf]  ;;  %v1859_v34 = vld [vmem:[#allocation2 + $0x50] sm:$0xf]  ;;  %v1290_v51 = vsel %vm7417_vm2, %v1285_v25, %v7324_v26  ;;  %3465 = vst.msk [vmem:[#allocation3 + $0x6c] sm:$0xf] %vm10903_vm8, %v3378_v58 }
 0x160   : > { %vm889_vm13 = vcmp.eq.s32.totalorder %v629_v1, 0  ;;  %v3571_v55 = vld [vmem:[#allocation2 + $0x5c] sm:$0xf]  ;;  %v3572_v46 = vld [vmem:[#allocation2 + $0x60] sm:$0xf]  ;;  %vm9001_vm10 = vcmp.ne.s16.totalorder %v1290_v51, 0  ;;  %v2371_v7 = vor.u32 %v2369_v27, %v2368_v11  ;;  %4654 = vrot.lane.b32.xlu1 %v4573_v59, %s7157_s14 }
 0x161   : > { %vm1050_vm5 = vmpackc.low %vm889_vm13, %vm889_vm13  ;;  %v9005_v49 = vrot.slane %v1581_v14, 7  ;;  %v1590_v41 = vshrl.u32 %v8994_v48, 16  ;;  %v1593_v31 = vshll.u32 %v8994_v48, 16  ;;  %v4767_v17 = vld [vmem:[#allocation2 + $0x64] sm:$0xf]  ;;  %v2373_v52 = vrot.slane %v2368_v11, 4  ;;  %1941 = vrot.lane.b32.xlu0 %v1859_v34, %s7154_s29  ;;  %v9056_v34 = vpop.permute.xlu1 %1927 }
 0x162   : > { %v9011_v33 = vsel %vm9001_vm10, 0, %v4089_v36  ;;  %v9014_v9 = vsel %vm1050_vm5, 65537, %v10798_v15  ;;  %443 = vst.msk [vmem:[#allocation2 + $0x6c] sm:$0xf] %vm419_vm1, %v6699_v50  ;;  %v4768_v21 = vld [vmem:[#allocation2 + $0x68] sm:$0xf]  ;;  %v2372_v28 = vsel %vm7396_vm15, %v7350_v40, %v2371_v7 }
 0x163   : > { %v4304_v2 = vshrl.u32 %v9011_v33, 16  ;;  %v4307_v60 = vshll.u32 %v9011_v33, 16  ;;  %v1297_v57 = vshll.u32 %v9014_v9, 16  ;;  %v1301_v54 = vshrl.u32 %v9014_v9, 16  ;;  %4725 = vst.msk [vmem:[#allocation3 + $0x70] sm:$0xf] %vm10906_vm14, %v4639_v56  ;;  %v3963_v33 = vpop.permute.xlu0 %3962 }
 0x164   : > { %v1860_v20 = vld [vmem:[#allocation2 + $0x54] sm:$0xf]  ;;  %v2381_v3 = vsel %vm7396_vm15, %v2373_v52, %v7348_v39  ;;  %v9034_v44 = vsel %vm9001_vm10, 0, %v3020_v62  ;;  %v9037_v61 = vor.u32 %v1584_v23, %v9005_v49  ;;  %vm9039_vm12 = vcmp.ne.s16.totalorder %v2372_v28, 0  ;;  %v2054_v52 = vld [vmem:[#allocation2 + $0x58] sm:$0xf] }
 0x165   : > { %vm2502_vm8 = vcmp.ne.s16.totalorder %v2381_v3, 0  ;;  %v9043_v4 = vrot.slane %v4304_v2, 7  ;;  %v9045_v19 = vrot.slane %v1297_v57, 5  ;;  %v3604_v27 = vsel %vm9039_vm12, 0, %v3571_v55  ;;  %1943 = vrot.lane.b32.xlu1 %v1860_v20, %s7154_s29  ;;  %v2053_v59 = vld [vmem:[#allocation2 + $0x54] sm:$0xf] }
 0x166   : > { %v4800_v25 = vsel %vm9039_vm12, 0, %v4767_v17  ;;  %v9052_v58 = vsel %vm2502_vm8, 0, %v3572_v46  ;;  %v4801_v1 = vsel %vm2502_vm8, 0, %v4768_v21  ;;  %v3808_v47 = vshll.u32 %v3604_v27, 16  ;;  %v4575_v24 = vld [vmem:[#allocation2 + $0x64] sm:$0xf] }
 0x167   : > { %v3812_v36 = vshrl.u32 %v3604_v27, 16  ;;  %v5004_v14 = vshll.u32 %v4800_v25, 16  ;;  %v5008_v23 = vshrl.u32 %v4800_v25, 16  ;;  %v3818_v11 = vshll.u32 %v9052_v58, 16  ;;  %v2893_v3 = vpop.permute.xlu0 %2892 }
 0x168   : > { %v3822_v51 = vshrl.u32 %v9052_v58, 16  ;;  %v5014_v50 = vshll.u32 %v4801_v1, 16  ;;  %v5018_v55 = vshrl.u32 %v4801_v1, 16  ;;  %v3810_v62 = vrot.slane %v3808_v47, 5 }
 0x169   : > { %v5006_v46 = vrot.slane %v5004_v14, 5  ;;  %v5010_v7 = vrot.slane %v5008_v23, 4  ;;  %v3814_v17 = vrot.slane %v3812_v36, 4  ;;  %v9060_v56 = vrot.slane %v3818_v11, 5  ;;  %v3575_v5 = vld [vmem:[#allocation2 + $0x6c] sm:$0xf] }
 0x16a   : > { %v5016_v21 = vrot.slane %v5014_v50, 5  ;;  %v5020_v2 = vrot.slane %v5018_v55, 4  ;;  %v2534_v57 = vsel %vm9039_vm12, 0, %v2053_v59  ;;  %vm10909_vm13 = vcmask 519424   ;;  %v7016_v1 = vld [vmem:[#allocation3 + $0x64] ss:$12 sps:$4 sm:$0xff]  }
 0x16b   : > { %4048 = vst.msk [vmem:[#allocation3 + $0x7c] sm:$0xf] %vm10909_vm13, %v3963_v33  ;;  %v3811_v20 = vsel %vm7417_vm2, %v8973_v22, %v3810_v62  ;;  %v5007_v28 = vsel %vm7417_vm2, %v8877_v18, %v5006_v46  ;;  %v5011_v27 = vor.u32 %v5010_v7, %v5006_v46  ;;  %v3815_v25 = vor.u32 %v3814_v17, %v3810_v62  ;;  %v3965_v18 = vpop.permute.xlu1 %3964  ;;  %v4090_v7 = vld [vmem:[#allocation2 + $0x64] sm:$0xf]  ;;  %vm10910_vm5 = vmmov %vm10909_vm13 }
 0x16c   : > { %5188 = vst.msk [vmem:[#allocation3 + $0xe0] sm:$0xf] %vm419_vm1, %v5007_v28  ;;  %3978 = vrot.lane.b32.xlu0 %v3811_v20, %s7154_s29  ;;  %v5021_v47 = vor.u32 %v5020_v2, %v5016_v21  ;;  %v2738_v16 = vshll.u32 %v2534_v57, 16  ;;  %v2742_v36 = vshrl.u32 %v2534_v57, 16  ;;  %v9074_v14 = vsel %vm2502_vm8, 0, %v2054_v52  ;;  %5770 = vmatprep.mubr.bf16.mxu0 %v7016_v1  ;;  %vm10913_vm12 = vmmov %vm10910_vm5 }
 0x16d   : > { %v5012_v23 = vrot.slane %v5011_v27, 4  ;;  %v3816_v59 = vrot.slane %v3815_v25, 4  ;;  %v2748_v22 = vshll.u32 %v9074_v14, 16  ;;  %v2752_v11 = vshrl.u32 %v9074_v14, 16  ;;  %4049 = vst.msk [vmem:[#allocation3 + $0x88] sm:$0xf] %vm10910_vm5, %v3965_v18  ;;  %vm10915_vm13 = vmmov %vm10910_vm5 }
 0x16e   : > { %v9078_v50 = vrot.slane %v5021_v47, 4  ;;  %v2740_v55 = vrot.slane %v2738_v16, 5  ;;  %v2744_v62 = vrot.slane %v2742_v36, 4  ;;  %v4309_v46 = vor.u32 %v4307_v60, %v9043_v4  ;;  %v3021_v28 = vld [vmem:[#allocation2 + $0x5c] sm:$0xf]  ;;  %v5220_v36 = vld [vmem:[#allocation3 + $0x6c] sm:$0xff] }
 0x16f   : > { %v3821_v17 = vsel %vm7417_vm2, %v3816_v59, %v9060_v56  ;;  %v5017_v52 = vsel %vm7417_vm2, %v5012_v23, %v5016_v21  ;;  %v9087_v33 = vrot.slane %v2748_v22, 5  ;;  %v1300_v2 = vsel %vm7417_vm2, %v7410_v29, %v9045_v19  ;;  %v2895_v23 = vpop.permute.xlu1 %2894  ;;  %v4449_v59 = vpop.permute.xlu0 %4448 }
 0x170   : > { %5189 = vst.msk [vmem:[#allocation3 + $0xec] sm:$0xf] %vm419_vm1, %v5017_v52  ;;  %3980 = vrot.lane.b32.xlu1 %v3821_v17, %s7154_s29  ;;  %v2741_v60 = vsel %vm7417_vm2, %v8979_v45, %v2740_v55  ;;  %v2745_v57 = vor.u32 %v2744_v62, %v2740_v55  ;;  %v4310_v21 = vsel %vm7396_vm15, %v4302_v35, %v4309_v46  ;;  %vm9102_vm14 = vcmp.ne.s16.totalorder %v1300_v2, 0  ;;  %v283_v62 = vld [vmem:[%s7293_s28 + $0xc0] sm:$0xff] }
 0x171   : > { %2908 = vrot.lane.b32.xlu0 %v2741_v60, %s7158_s15  ;;  %v4123_v27 = vsel %vm9102_vm14, 0, %v4090_v7  ;;  %v4311_v25 = vrot.slane %v9043_v4, 4  ;;  %v3235_v45 = vshrl.u32 %v9034_v44, 16  ;;  %v3238_v1 = vshll.u32 %v9034_v44, 16  ;;  %4534 = vst.msk [vmem:[#allocation3 + $0x7c] sm:$0xf] %vm10800_vm6, %v4449_v59 }
 0x172   : > { %v2746_v37 = vrot.slane %v2745_v57, 4  ;;  %v4313_v47 = vshrl.u32 %v4123_v27, 16  ;;  %v4316_v16 = vshll.u32 %v4123_v27, 16  ;;  %v1587_v35 = vsel %vm7396_vm15, %v1579_v13, %v9037_v61  ;;  %v5218_v17 = vld [vmem:[#allocation3 + $0x60] sm:$0xff] }
 0x173   : > { %v3237_v22 = vrot.slane %v3235_v45, 7  ;;  %1819 = vst.msk [vmem:[#allocation3 + $0x78] sm:$0xf] %vm419_vm1, %v1587_v35  ;;  %v3054_v4 = vsel %vm9102_vm14, 0, %v3021_v28  ;;  %v1588_v44 = vrot.slane %v9005_v49, 4  ;;  %v9123_v18 = vrot.slane %v1590_v41, 7  ;;  %v3380_v57 = vpop.permute.xlu0 %3379  ;;  %v4451_v45 = vpop.permute.xlu1 %4450 }
 0x174   : > { %v2751_v53 = vsel %vm7417_vm2, %v2746_v37, %v9087_v33  ;;  %v9129_v13 = vrot.slane %v4313_v47, 7  ;;  %2012 = vst.msk [vmem:[#allocation3 + $0x78] sm:$0xf] %vm10913_vm12, %v9024_v8  ;;  %v3244_v61 = vshrl.u32 %v3054_v4, 16  ;;  %v3247_v55 = vshll.u32 %v3054_v4, 16 }
 0x175   : > { %2910 = vrot.lane.b32.xlu1 %v2751_v53, %s7158_s15  ;;  %4464 = vrot.lane.b32.xlu0 %v4310_v21, %s7158_s15  ;;  %v3240_v49 = vor.u32 %v3238_v1, %v3237_v22  ;;  %v3242_v41 = vrot.slane %v3237_v22, 4  ;;  %v1595_v46 = vor.u32 %v1593_v31, %v9123_v18  ;;  %2979 = vst.msk [vmem:[#allocation3 + $0x78] sm:$0xf] %vm10800_vm6, %v2893_v3  ;;  %v474_v7 = vadd.s32 168, %v7307_v12  ;;  %v3506_v21 = vld [vmem:[#allocation2 + $0x58] sm:$0xf] }
 0x176   : > { %v4318_v8 = vor.u32 %v4316_v16, %v9129_v13  ;;  %v9142_v52 = vrot.slane %v3244_v61, 7  ;;  %v3824_v2 = vrot.slane %v3822_v51, 4  ;;  %v6581_v60 = vcombine.low %v5218_v17, %v5220_v36  ;;  %3538 = vst.msk [vmem:[#allocation3 + $0xdc] sm:$0xf] %vm419_vm1, %v3506_v21  ;;  %v4574_v27 = vld [vmem:[#allocation2 + $0x60] sm:$0xf] }
 0x177   : > { %v3241_v48 = vsel %vm7396_vm15, %v3233_v30, %v3240_v49  ;;  %v1596_v31 = vsel %vm7396_vm15, %v1588_v44, %v1595_v46  ;;  %v636_v3 = vand.u32 15, %v474_v7  ;;  %v6700_v28 = vpack.c.bf16 %v283_v62, %v283_v62  ;;  %v946_v1 = vld [vmem:[#allocation2 + $0x38] sm:$0xf]  ;;  %4535 = vst.msk [vmem:[#allocation3 + $0x88] sm:$0xf] %vm10800_vm6, %v4451_v45  ;;  %v284_v61 = vld [vmem:[%s7293_s28 + $0xc8] sm:$0xff]  ;;  %v3382_v49 = vpop.permute.xlu1 %3381 }
 0x178   : > { %vm10914_vm8 = vcmask 1044224   ;;  %v4319_v58 = vsel %vm7396_vm15, %v4311_v25, %v4318_v8  ;;  %v3249_v51 = vor.u32 %v3247_v55, %v9142_v52  ;;  %1820 = vst.msk [vmem:[#allocation3 + $0x84] sm:$0xf] %vm419_vm1, %v1596_v31  ;;  %v3825_v63 = vor.u32 %v3824_v2, %v9060_v56  ;;  %5771 = vmatmul.mubr.bf16.gmra.mxu0 %v6581_v60  ;;  %v7028_v37 = vld [vmem:[#allocation3 + $0xc8] ss:$12 sps:$4 sm:$0xff]  }
 0x179   : > { %3466 = vst.msk [vmem:[#allocation3 + $0x78] sm:$0xf] %vm10914_vm8, %v3380_v57  ;;  %v2754_v30 = vrot.slane %v2752_v11, 4  ;;  %4466 = vrot.lane.b32.xlu1 %v4319_v58, %s7158_s15  ;;  %3395 = vrot.lane.b32.xlu0 %v3241_v48, %s7157_s14  ;;  %vm9165_vm5 = vcmp.eq.s32.totalorder %v636_v3, 15  ;;  %v1303_v56 = vrot.slane %v1301_v54, 4  ;;  %v4320_v14 = vrot.slane %v9129_v13, 4  ;;  %v4641_v54 = vpop.permute.xlu0 %4640 }
 0x17a   : > { %2013 = vst.msk [vmem:[#allocation3 + $0x84] sm:$0xf] %vm10915_vm13, %v9056_v34  ;;  %v475_v11 = vadd.s32 176, %v7307_v12  ;;  %v3250_v34 = vsel %vm7396_vm15, %v3242_v41, %v3249_v51  ;;  %vm2152_vm12 = vmpackc.low %vm9165_vm5, %vm9165_vm5  ;;  %v9180_v47 = vrot.slane %v3825_v63, 4  ;;  %v3251_v16 = vrot.slane %v9142_v52, 4 }
 0x17b   : > { %444 = vst.msk [vmem:[#allocation2 + $0x70] sm:$0xf] %vm419_vm1, %v6700_v28  ;;  %v2755_v9 = vor.u32 %v2754_v30, %v9087_v33  ;;  %v3507_v35 = vld [vmem:[#allocation2 + $0x5c] sm:$0xf]  ;;  %v7029_v36 = vld [vmem:[#allocation3 + $0xe0] ss:$12 sps:$4 sm:$0xff]   ;;  %v1304_v22 = vor.u32 %v1303_v56, %v9045_v19  ;;  %v6701_v21 = vpack.c.bf16 %v284_v61, %v284_v61  ;;  %v4643_v25 = vpop.permute.xlu1 %4642 }
 0x17c   : > { %2980 = vst.msk [vmem:[#allocation3 + $0x84] sm:$0xf] %vm10800_vm6, %v2895_v23  ;;  %v2184_v59 = vsel %vm2152_vm12, 65537, %v10798_v15  ;;  %v643_v4 = vand.u32 15, %v475_v11  ;;  %v1462_v44 = vsel %vm8468_vm4, 0, %v946_v1  ;;  %vm10918_vm13 = vcmask 261120   ;;  %vm10920_vm4 = vmmov %vm10914_vm8 }
 0x17d   : > { %4726 = vst.msk [vmem:[#allocation3 + $0x7c] sm:$0xf] %vm10914_vm8, %v4641_v54  ;;  %v947_v53 = vld [vmem:[#allocation2 + $0x3c] sm:$0xf]  ;;  %6877 = vmatprep.mubr.msk.bf16.mxu1 %vm10918_vm13, %v7028_v37  ;;  %v1861_v33 = vld [vmem:[#allocation2 + $0x58] sm:$0xf]  ;;  %vm10919_vm5 = vmmov %vm10918_vm13  ;;  %3397 = vrot.lane.b32.xlu1 %v3250_v34, %s7157_s14  ;;  %v9200_v60 = vpop.permute.xlu0 %1929 }
 0x17e   : > { %3539 = vst.msk [vmem:[#allocation3 + $0xe8] sm:$0xf] %vm419_vm1, %v3507_v35  ;;  %v2384_v23 = vshrl.u32 %v2184_v59, 16  ;;  %v2387_v55 = vshll.u32 %v2184_v59, 16  ;;  %v9193_v62 = vrot.slane %v2755_v9, 4  ;;  %v1597_v19 = vrot.slane %v9123_v18, 4  ;;  %6878 = vmatmul.mubr.msk.bf16.gmra.mxu1 %vm10919_vm5, %v7029_v36  ;;  %4656 = vrot.lane.b32.xlu0 %v4574_v27, %s7157_s14  ;;  %vm10923_vm13 = vmmov %vm10920_vm4 }
 0x17f   : > { %v3022_v41 = vld [vmem:[#allocation2 + $0x60] sm:$0xf]  ;;  %v1305_v46 = vrot.slane %v1304_v22, 4  ;;  %3467 = vst.msk [vmem:[#allocation3 + $0x84] sm:$0xf] %vm10920_vm4, %v3382_v49  ;;  %vm891_vm12 = vcmp.eq.s32.totalorder %v643_v4, 0 }
 0x180   : > { %v1599_v7 = vshrl.u32 %v1462_v44, 16  ;;  %v1602_v17 = vshll.u32 %v1462_v44, 16  ;;  %v2386_v8 = vrot.slane %v2384_v23, 7  ;;  %v4091_v2 = vld [vmem:[#allocation2 + $0x68] sm:$0xf]  ;;  %vm1052_vm8 = vmpackc.low %vm891_vm12, %vm891_vm12  ;;  %v9204_v57 = vsel %vm8523_vm7, 0, %v947_v53 }
 0x181   : > { %v9207_v48 = vadd.s32 184, %v7307_v12  ;;  %v3573_v31 = vld [vmem:[#allocation2 + $0x64] sm:$0xf]  ;;  %v3574_v3 = vld [vmem:[#allocation2 + $0x68] sm:$0xf]  ;;  %v1310_v28 = vsel %vm7417_vm2, %v1305_v46, %v7324_v26  ;;  %v9213_v58 = vsel %vm1052_vm8, 65537, %v10798_v15  ;;  %4658 = vrot.lane.b32.xlu1 %v4575_v24, %s7157_s14  ;;  %v3967_v4 = vpop.permute.xlu0 %3966 }
 0x182   : > { %v9215_v51 = vrot.slane %v1599_v7, 7  ;;  %v1608_v27 = vshrl.u32 %v9204_v57, 16  ;;  %v2389_v32 = vor.u32 %v2387_v55, %v2386_v8  ;;  %v4769_v63 = vld [vmem:[#allocation2 + $0x6c] sm:$0xf]  ;;  %v2391_v30 = vrot.slane %v2386_v8, 4  ;;  %1945 = vrot.lane.b32.xlu0 %v1861_v33, %s7154_s29 }
 0x183   : > { %vm9218_vm7 = vcmp.ne.s16.totalorder %v1310_v28, 0  ;;  %v1317_v1 = vshll.u32 %v9213_v58, 16  ;;  %445 = vst.msk [vmem:[#allocation2 + $0x74] sm:$0xf] %vm419_vm1, %v6701_v21  ;;  %v4770_v56 = vld [vmem:[#allocation2 + $0x70] sm:$0xf] }
 0x184   : > { %v9228_v11 = vsel %vm9218_vm7, 0, %v4091_v2  ;;  %v1321_v37 = vshrl.u32 %v9213_v58, 16  ;;  %v9233_v34 = vsel %vm9218_vm7, 0, %v3022_v41  ;;  %4727 = vst.msk [vmem:[#allocation3 + $0x88] sm:$0xf] %vm10923_vm13, %v4643_v25  ;;  %v9237_v9 = vor.u32 %v1602_v17, %v9215_v51  ;;  %v9263_v41 = vpop.permute.xlu1 %1931 }
 0x185   : > { %v1862_v54 = vld [vmem:[#allocation2 + $0x5c] sm:$0xf]  ;;  %v2390_v35 = vsel %vm7396_vm15, %v7350_v40, %v2389_v32  ;;  %v2399_v36 = vsel %vm7396_vm15, %v2391_v30, %v7348_v39  ;;  %v4322_v59 = vshrl.u32 %v9228_v11, 16  ;;  %v4325_v22 = vshll.u32 %v9228_v11, 16  ;;  %v9268_v25 = vpop.permute.xlu0 %2896 }
 0x186   : > { %vm9247_vm5 = vcmp.ne.s16.totalorder %v2390_v35, 0  ;;  %vm2504_vm4 = vcmp.ne.s16.totalorder %v2399_v36, 0  ;;  %v9251_v53 = vrot.slane %v1317_v1, 5  ;;  %v3253_v61 = vshrl.u32 %v9233_v34, 16  ;;  %1947 = vrot.lane.b32.xlu1 %v1862_v54, %s7154_s29  ;;  %v2055_v8 = vld [vmem:[#allocation2 + $0x5c] sm:$0xf] }
 0x187   : > { %vm10926_vm12 = vcmask 519424   ;;  %v3606_v33 = vsel %vm9247_vm5, 0, %v3573_v31  ;;  %v4802_v23 = vsel %vm9247_vm5, 0, %v4769_v63  ;;  %v9260_v55 = vsel %vm2504_vm4, 0, %v3574_v3  ;;  %v2056_v1 = vld [vmem:[#allocation2 + $0x60] sm:$0xf] }
 0x188   : > { %4050 = vst.msk [vmem:[#allocation3 + $0x94] sm:$0xf] %vm10926_vm12, %v3967_v4  ;;  %v4803_v49 = vsel %vm2504_vm4, 0, %v4770_v56  ;;  %v3828_v24 = vshll.u32 %v3606_v33, 16  ;;  %v3832_v46 = vshrl.u32 %v3606_v33, 16  ;;  %v5024_v7 = vshll.u32 %v4802_v23, 16  ;;  %v3969_v33 = vpop.permute.xlu1 %3968  ;;  %vm10927_vm8 = vmmov %vm10926_vm12 }
 0x189   : > { %v5028_v17 = vshrl.u32 %v4802_v23, 16  ;;  %v3838_v2 = vshll.u32 %v9260_v55, 16  ;;  %v3842_v21 = vshrl.u32 %v9260_v55, 16  ;;  %v5034_v31 = vshll.u32 %v4803_v49, 16  ;;  %4051 = vst.msk [vmem:[#allocation3 + $0xa0] sm:$0xf] %vm10927_vm8, %v3969_v33 }
 0x18a   : > { %v5038_v28 = vshrl.u32 %v4803_v49, 16  ;;  %v3830_v32 = vrot.slane %v3828_v24, 5  ;;  %v5026_v3 = vrot.slane %v5024_v7, 5  ;;  %v3834_v30 = vrot.slane %v3832_v46, 4 }
 0x18b   : > { %v5030_v63 = vrot.slane %v5028_v17, 4  ;;  %v9270_v56 = vrot.slane %v3838_v2, 5  ;;  %v5036_v54 = vrot.slane %v5034_v31, 5  ;;  %v2536_v4 = vsel %vm9247_vm5, 0, %v2055_v8  ;;  %v7020_v7 = vld [vmem:[#allocation3 + $0x7c] ss:$12 sps:$4 sm:$0xff]   ;;  %vm10930_vm5 = vmmov %vm10927_vm8 }
 0x18c   : > { %v5040_v35 = vrot.slane %v5038_v28, 4  ;;  %v3831_v23 = vsel %vm7417_vm2, %v9180_v47, %v3830_v32  ;;  %v5027_v49 = vsel %vm7417_vm2, %v9078_v50, %v5026_v3  ;;  %v3835_v46 = vor.u32 %v3834_v30, %v3830_v32  ;;  %5778 = vmatprep.mubr.bf16.mxu0 %v7020_v7  ;;  %v4092_v30 = vld [vmem:[#allocation2 + $0x6c] sm:$0xf]  ;;  %v5224_v18 = vld [vmem:[#allocation3 + $0x84] sm:$0xff] }
 0x18d   : > { %v5031_v24 = vor.u32 %v5030_v63, %v5026_v3  ;;  %5190 = vst.msk [vmem:[#allocation3 + $0xf8] sm:$0xf] %vm419_vm1, %v5027_v49  ;;  %3982 = vrot.lane.b32.xlu0 %v3831_v23, %s7154_s29  ;;  %v2758_v17 = vshll.u32 %v2536_v4, 16  ;;  %v2762_v8 = vshrl.u32 %v2536_v4, 16  ;;  %v2537_v2 = vsel %vm2504_vm4, 0, %v2056_v1  ;;  %v4453_v4 = vpop.permute.xlu0 %4452 }
 0x18e   : > { %v5041_v44 = vor.u32 %v5040_v35, %v5036_v54  ;;  %v3836_v47 = vrot.slane %v3835_v46, 4  ;;  %v2768_v28 = vshll.u32 %v2537_v2, 16  ;;  %v2772_v15 = vshrl.u32 %v2537_v2, 16  ;;  %4536 = vst.msk [vmem:[#allocation3 + $0x94] sm:$0xf] %vm10800_vm6, %v4453_v4 }
 0x18f   : > { %v5032_v31 = vrot.slane %v5031_v24, 4  ;;  %v2760_v32 = vrot.slane %v2758_v17, 5  ;;  %v2764_v3 = vrot.slane %v2762_v8, 4  ;;  %v4324_v63 = vrot.slane %v4322_v59, 7  ;;  %v3023_v24 = vld [vmem:[#allocation2 + $0x64] sm:$0xf] }
 0x190   : > { %v9284_v50 = vrot.slane %v5041_v44, 4  ;;  %v3841_v33 = vsel %vm7417_vm2, %v3836_v47, %v9270_v56  ;;  %v9291_v36 = vrot.slane %v2768_v28, 5  ;;  %v1320_v1 = vsel %vm7417_vm2, %v7410_v29, %v9251_v53  ;;  %v2899_v47 = vpop.permute.xlu1 %2898 }
 0x191   : > { %v5037_v35 = vsel %vm7417_vm2, %v5032_v31, %v5036_v54  ;;  %3984 = vrot.lane.b32.xlu1 %v3841_v33, %s7154_s29  ;;  %v2761_v59 = vsel %vm7417_vm2, %v9193_v62, %v2760_v32  ;;  %v2765_v23 = vor.u32 %v2764_v3, %v2760_v32  ;;  %v4327_v54 = vor.u32 %v4325_v22, %v4324_v63  ;;  %v3384_v28 = vpop.permute.xlu0 %3383 }
 0x192   : > { %5191 = vst.msk [vmem:[#allocation3 + $0x104] sm:$0xf] %vm419_vm1, %v5037_v35  ;;  %vm9304_vm13 = vcmp.ne.s16.totalorder %v1320_v1, 0  ;;  %2912 = vrot.lane.b32.xlu0 %v2761_v59, %s7158_s15  ;;  %v4329_v7 = vrot.slane %v4324_v63, 4  ;;  %v3255_v62 = vrot.slane %v3253_v61, 7  ;;  %v3256_v44 = vshll.u32 %v9233_v34, 16 }
 0x193   : > { %v4125_v46 = vsel %vm9304_vm13, 0, %v4092_v30  ;;  %v2766_v11 = vrot.slane %v2765_v23, 4  ;;  %v4328_v22 = vsel %vm7396_vm15, %v4320_v14, %v4327_v54  ;;  %v1605_v31 = vsel %vm7396_vm15, %v1597_v19, %v9237_v9  ;;  %v285_v63 = vld [vmem:[%s7293_s28 + $0xd0] sm:$0xff] }
 0x194   : > { %v4331_v17 = vshrl.u32 %v4125_v46, 16  ;;  %v4334_v8 = vshll.u32 %v4125_v46, 16  ;;  %v3258_v2 = vor.u32 %v3256_v44, %v3255_v62  ;;  %v3056_v61 = vsel %vm9304_vm13, 0, %v3023_v24  ;;  %1821 = vst.msk [vmem:[#allocation3 + $0x90] sm:$0xf] %vm419_vm1, %v1605_v31  ;;  %v4455_v24 = vpop.permute.xlu1 %4454 }
 0x195   : > { %v3260_v34 = vrot.slane %v3255_v62, 4  ;;  %v2771_v13 = vsel %vm7417_vm2, %v2766_v11, %v9291_v36  ;;  %v3262_v32 = vshrl.u32 %v3056_v61, 16  ;;  %v3265_v3 = vshll.u32 %v3056_v61, 16  ;;  %2014 = vst.msk [vmem:[#allocation3 + $0x90] sm:$0xf] %vm10930_vm5, %v9200_v60  ;;  %v5222_v60 = vld [vmem:[#allocation3 + $0x78] sm:$0xff] }
 0x196   : > { %v9329_v14 = vrot.slane %v4331_v17, 7  ;;  %2914 = vrot.lane.b32.xlu1 %v2771_v13, %s7158_s15  ;;  %4468 = vrot.lane.b32.xlu0 %v4328_v22, %s7158_s15  ;;  %v3259_v19 = vsel %vm7396_vm15, %v3251_v16, %v3258_v2  ;;  %v1606_v9 = vrot.slane %v9215_v51, 4  ;;  %v9344_v30 = vrot.slane %v1608_v27, 7  ;;  %2981 = vst.msk [vmem:[#allocation3 + $0x90] sm:$0xf] %vm10800_vm6, %v9268_v25  ;;  %v286_v61 = vld [vmem:[%s7293_s28 + $0xd8] sm:$0xff] }
 0x197   : > { %v1611_v33 = vshll.u32 %v9204_v57, 16  ;;  %v9348_v1 = vrot.slane %v3262_v32, 7  ;;  %v650_v52 = vand.u32 15, %v9207_v48  ;;  %v3844_v16 = vrot.slane %v3842_v21, 4  ;;  %v4645_v57 = vpop.permute.xlu0 %4644  ;;  %v4576_v44 = vld [vmem:[#allocation2 + $0x68] sm:$0xf] }
 0x198   : > { %v4336_v35 = vor.u32 %v4334_v8, %v9329_v14  ;;  %v6584_v4 = vcombine.low %v5222_v60, %v5224_v18  ;;  %v6702_v27 = vpack.c.bf16 %v285_v63, %v285_v63  ;;  %v2774_v59 = vrot.slane %v2772_v15, 4  ;;  %4537 = vst.msk [vmem:[#allocation3 + $0xa0] sm:$0xf] %vm10800_vm6, %v4455_v24  ;;  %v949_v31 = vld [vmem:[#allocation2 + $0x44] sm:$0xf] }
 0x199   : > { %v1613_v51 = vor.u32 %v1611_v33, %v9344_v30  ;;  %vm10931_vm4 = vcmask 1044224   ;;  %v7032_v23 = vld [vmem:[#allocation3 + $0xf8] ss:$12 sps:$4 sm:$0xff]   ;;  %v3267_v25 = vor.u32 %v3265_v3, %v9348_v1  ;;  %vm9360_vm12 = vcmp.eq.s32.totalorder %v650_v52, 15  ;;  %v3508_v18 = vld [vmem:[#allocation2 + $0x60] sm:$0xf] }
 0x19a   : > { %3468 = vst.msk [vmem:[#allocation3 + $0x90] sm:$0xf] %vm10931_vm4, %v3384_v28  ;;  %v4337_v54 = vsel %vm7396_vm15, %v4329_v7, %v4336_v35  ;;  %v3845_v55 = vor.u32 %v3844_v16, %v9270_v56  ;;  %vm10934_vm8 = vmmov %vm10931_vm4  ;;  %3399 = vrot.lane.b32.xlu0 %v3259_v19, %s7157_s14  ;;  %v2775_v21 = vor.u32 %v2774_v59, %v9291_v36  ;;  %v1323_v56 = vrot.slane %v1321_v37, 4  ;;  %v948_v7 = vld [vmem:[#allocation2 + $0x40] sm:$0xf] }
 0x19b   : > { %4728 = vst.msk [vmem:[#allocation3 + $0x94] sm:$0xf] %vm10934_vm8, %v4645_v57  ;;  %4470 = vrot.lane.b32.xlu1 %v4337_v54, %s7158_s15  ;;  %v1614_v15 = vsel %vm7396_vm15, %v1606_v9, %v1613_v51  ;;  %vm2154_vm5 = vmpackc.low %vm9360_vm12, %vm9360_vm12  ;;  %v4338_v46 = vrot.slane %v9329_v14, 4  ;;  %v3268_v62 = vsel %vm7396_vm15, %v3260_v34, %v3267_v25  ;;  %v10935_v11 = vmov 0   ;;  %5779 = vmatmul.mubr.bf16.gmra.mxu0 %v6584_v4  ;;  %v1863_v34 = vld [vmem:[#allocation2 + $0x60] sm:$0xf]  ;;  %v9400_v3 = vpop.permute.xlu0 %1933 }
 0x19c   : > { %446 = vst.msk [vmem:[#allocation2 + $0x78] sm:$0xf] %vm419_vm1, %v6702_v27  ;;  %1822 = vst.msk [vmem:[#allocation3 + $0x9c] sm:$0xf] %vm419_vm1, %v1614_v15  ;;  %v2186_v22 = vsel %vm2154_vm5, 65537, %v10935_v11  ;;  %v9382_v17 = vrot.slane %v3845_v55, 4  ;;  %v1324_v2 = vor.u32 %v1323_v56, %v9251_v53  ;;  %v6703_v16 = vpack.c.bf16 %v286_v61, %v286_v61 }
 0x19d   : > { %v477_v58 = vadd.s32 192, %v7307_v12  ;;  %vm10936_vm4 = vcmask 261120   ;;  %vm10937_vm12 = vcmask 519424   ;;  %v2402_v37 = vshrl.u32 %v2186_v22, 16  ;;  %v4577_v53 = vld [vmem:[#allocation2 + $0x6c] sm:$0xf] }
 0x19e   : > { %6881 = vmatprep.mubr.msk.bf16.mxu1 %vm10936_vm4, %v7032_v23  ;;  %2015 = vst.msk [vmem:[#allocation3 + $0x9c] sm:$0xf] %vm10937_vm12, %v9263_v41  ;;  %v2405_v36 = vshll.u32 %v2186_v22, 16  ;;  %v9389_v8 = vrot.slane %v2775_v21, 4  ;;  %v3269_v13 = vrot.slane %v9348_v1, 4  ;;  %v9397_v32 = vsel %vm8587_vm11, 0, %v948_v7  ;;  %4660 = vrot.lane.b32.xlu0 %v4576_v44, %s7157_s14  ;;  %vm10938_vm11 = vmmov %vm10934_vm8 }
 0x19f   : > { %2982 = vst.msk [vmem:[#allocation3 + $0x9c] sm:$0xf] %vm10800_vm6, %v2899_v47  ;;  %v657_v28 = vand.u32 15, %v477_v58  ;;  %v1615_v41 = vrot.slane %v9344_v30, 4  ;;  %3401 = vrot.lane.b32.xlu1 %v3268_v62, %s7157_s14  ;;  %v2404_v63 = vrot.slane %v2402_v37, 7  ;;  %v1325_v19 = vrot.slane %v1324_v2, 4  ;;  %v3386_v47 = vpop.permute.xlu1 %3385  ;;  %v3971_v37 = vpop.permute.xlu0 %3970 }
 0x1a0   : > { %v1617_v9 = vshrl.u32 %v9397_v32, 16  ;;  %v1620_v33 = vshll.u32 %v9397_v32, 16  ;;  %3540 = vst.msk [vmem:[#allocation3 + $0xf4] sm:$0xf] %vm419_vm1, %v3508_v18  ;;  %v4093_v35 = vld [vmem:[#allocation2 + $0x70] sm:$0xf] }
 0x1a1   : > { %3469 = vst.msk [vmem:[#allocation3 + $0x9c] sm:$0xf] %vm10938_vm11, %v3386_v47  ;;  %vm893_vm8 = vcmp.eq.s32.totalorder %v657_v28, 0  ;;  %v9410_v52 = vsel %vm8691_vm9, 0, %v949_v31  ;;  %v9413_v60 = vadd.s32 200, %v7307_v12  ;;  %v2407_v51 = vor.u32 %v2405_v36, %v2404_v63  ;;  %v7041_v30 = vld [vmem:[%s10790_s3] sm:$0xff]  }
 0x1a2   : > { %v4771_v4 = vld [vmem:[#allocation2 + $0x74] sm:$0xf]  ;;  %v2409_v27 = vrot.slane %v2404_v63, 4  ;;  %v3576_v59 = vld [vmem:[#allocation2 + $0x70] sm:$0xf]  ;;  %v1330_v57 = vsel %vm7417_vm2, %v1325_v19, %v7324_v26  ;;  %vm1054_vm5 = vmpackc.low %vm893_vm8, %vm893_vm8  ;;  %v9418_v23 = vrot.slane %v1617_v9, 7  ;;  %1949 = vrot.lane.b32.xlu0 %v1863_v34, %s7154_s29 }
 0x1a3   : > { %v4772_v54 = vld [vmem:[#allocation2 + $0x78] sm:$0xf]  ;;  %vm9420_vm4 = vcmp.ne.s16.totalorder %v1330_v57, 0  ;;  %v9425_v25 = vsel %vm1054_vm5, 65537, %v10935_v11  ;;  %v1626_v48 = vshrl.u32 %v9410_v52, 16  ;;  %v1629_v55 = vshll.u32 %v9410_v52, 16  ;;  %4662 = vrot.lane.b32.xlu1 %v4577_v53, %s7157_s14  ;;  %v4647_v7 = vpop.permute.xlu1 %4646 }
 0x1a4   : > { %447 = vst.msk [vmem:[#allocation2 + $0x7c] sm:$0xf] %vm419_vm1, %v6703_v16  ;;  %v2408_v15 = vsel %vm7396_vm15, %v7350_v40, %v2407_v51  ;;  %v2417_v21 = vsel %vm7396_vm15, %v2409_v27, %v7348_v39  ;;  %v9440_v24 = vsel %vm9420_vm4, 0, %v4093_v35  ;;  %v1337_v56 = vshll.u32 %v9425_v25, 16  ;;  %v1864_v62 = vld [vmem:[#allocation2 + $0x64] sm:$0xf] }
 0x1a5   : > { %vm9443_vm9 = vcmp.ne.s16.totalorder %v2408_v15, 0  ;;  %vm2506_vm12 = vcmp.ne.s16.totalorder %v2417_v21, 0  ;;  %v4340_v22 = vshrl.u32 %v9440_v24, 16  ;;  %v4343_v58 = vshll.u32 %v9440_v24, 16  ;;  %4729 = vst.msk [vmem:[#allocation3 + $0xa0] sm:$0xf] %vm10938_vm11, %v4647_v7 }
 0x1a6   : > { %v3608_v36 = vsel %vm9443_vm9, 0, %v3575_v5  ;;  %v4804_v2 = vsel %vm9443_vm9, 0, %v4771_v4  ;;  %v9455_v31 = vsel %vm2506_vm12, 0, %v3576_v59  ;;  %v4805_v61 = vsel %vm2506_vm12, 0, %v4772_v54  ;;  %v2057_v63 = vld [vmem:[#allocation2 + $0x64] sm:$0xf] }
 0x1a7   : > { %vm10943_vm8 = vcmask 519424   ;;  %v3848_v34 = vshll.u32 %v3608_v36, 16  ;;  %v3852_v28 = vshrl.u32 %v3608_v36, 16  ;;  %v5044_v18 = vshll.u32 %v4804_v2, 16  ;;  %1951 = vrot.lane.b32.xlu1 %v1864_v62, %s7154_s29  ;;  %v2058_v35 = vld [vmem:[#allocation2 + $0x68] sm:$0xf]  ;;  %v9462_v16 = vpop.permute.xlu1 %1935 }
 0x1a8   : > { %4052 = vst.msk [vmem:[#allocation3 + $0xac] sm:$0xf] %vm10943_vm8, %v3971_v37  ;;  %v5048_v53 = vshrl.u32 %v4804_v2, 16  ;;  %v3858_v19 = vshll.u32 %v9455_v31, 16  ;;  %v3862_v47 = vshrl.u32 %v9455_v31, 16  ;;  %v5054_v9 = vshll.u32 %v4805_v61, 16  ;;  %vm10944_vm5 = vmmov %vm10943_vm8 }
 0x1a9   : > { %v5058_v5 = vshrl.u32 %v4805_v61, 16  ;;  %v3850_v51 = vrot.slane %v3848_v34, 5  ;;  %v5046_v4 = vrot.slane %v5044_v18, 5  ;;  %v3854_v59 = vrot.slane %v3852_v28, 4  ;;  %v3509_v57 = vld [vmem:[#allocation2 + $0x64] sm:$0xf]  ;;  %v9475_v34 = vpop.permute.xlu0 %2900 }
 0x1aa   : > { %v5050_v27 = vrot.slane %v5048_v53, 4  ;;  %v9464_v54 = vrot.slane %v3858_v19, 5  ;;  %v5056_v15 = vrot.slane %v5054_v9, 5  ;;  %v2538_v62 = vsel %vm9443_vm9, 0, %v2057_v63  ;;  %3541 = vst.msk [vmem:[#allocation3 + $0x100] sm:$0xf] %vm419_vm1, %v3509_v57 }
 0x1ab   : > { %v5060_v7 = vrot.slane %v5058_v5, 4  ;;  %v3851_v37 = vsel %vm7417_vm2, %v9382_v17, %v3850_v51  ;;  %v5047_v36 = vsel %vm7417_vm2, %v9284_v50, %v5046_v4  ;;  %v3855_v61 = vor.u32 %v3854_v59, %v3850_v51  ;;  %v3973_v63 = vpop.permute.xlu1 %3972  ;;  %v3024_v57 = vld [vmem:[#allocation2 + $0x68] sm:$0xf] }
 0x1ac   : > { %v5051_v2 = vor.u32 %v5050_v27, %v5046_v4  ;;  %5192 = vst.msk [vmem:[#allocation3 + $0x110] sm:$0xf] %vm419_vm1, %v5047_v36  ;;  %3986 = vrot.lane.b32.xlu0 %v3851_v37, %s7154_s29  ;;  %v2778_v28 = vshll.u32 %v2538_v62, 16  ;;  %v2782_v18 = vshrl.u32 %v2538_v62, 16  ;;  %v9480_v53 = vsel %vm2506_vm12, 0, %v2058_v35  ;;  %vm10947_vm12 = vmmov %vm10944_vm5 }
 0x1ad   : > { %v5061_v44 = vor.u32 %v5060_v7, %v5056_v15  ;;  %v7022_v17 = vld [vmem:[#allocation3 + $0x94] ss:$12 sps:$4 sm:$0xff]   ;;  %v3856_v9 = vrot.slane %v3855_v61, 4  ;;  %v2788_v50 = vshll.u32 %v9480_v53, 16  ;;  %v2792_v5 = vshrl.u32 %v9480_v53, 16  ;;  %v4457_v37 = vpop.permute.xlu0 %4456 }
 0x1ae   : > { %v5052_v19 = vrot.slane %v5051_v2, 4  ;;  %4053 = vst.msk [vmem:[#allocation3 + $0xb8] sm:$0xf] %vm10944_vm5, %v3973_v63  ;;  %v2780_v4 = vrot.slane %v2778_v28, 5  ;;  %v2784_v27 = vrot.slane %v2782_v18, 4  ;;  %v9487_v59 = vrot.slane %v4340_v22, 7  ;;  %5786 = vmatprep.mubr.bf16.mxu0 %v7022_v17 }
 0x1af   : > { %v9485_v51 = vrot.slane %v5061_v44, 4  ;;  %v3861_v21 = vsel %vm7417_vm2, %v3856_v9, %v9464_v54  ;;  %v9494_v7 = vrot.slane %v2788_v50, 5  ;;  %v9498_v62 = vrot.slane %v1337_v56, 5  ;;  %v4094_v61 = vld [vmem:[#allocation2 + $0x74] sm:$0xf]  ;;  %v9509_v56 = vpop.permute.xlu1 %2902  ;;  %v7040_v28 = vld [vmem:[%s10790_s3 + $0x8] sm:$0xff]  }
 0x1b0   : > { %v5057_v35 = vsel %vm7417_vm2, %v5052_v19, %v5056_v15  ;;  %3988 = vrot.lane.b32.xlu1 %v3861_v21, %s7154_s29  ;;  %v2781_v22 = vsel %vm7417_vm2, %v9389_v8, %v2780_v4  ;;  %v2785_v36 = vor.u32 %v2784_v27, %v2780_v4  ;;  %v4345_v15 = vor.u32 %v4343_v58, %v9487_v59  ;;  %v3025_v44 = vld [vmem:[#allocation2 + $0x6c] sm:$0xf]  ;;  %v5228_v21 = vld [vmem:[#allocation3 + $0x9c] sm:$0xff]  ;;  %v3510_v31 = vld [vmem:[#allocation2 + $0x68] sm:$0xf] }
 0x1b1   : > { %5193 = vst.msk [vmem:[#allocation3 + $0x11c] sm:$0xf] %vm419_vm1, %v5057_v35  ;;  %v1341_v2 = vshrl.u32 %v9425_v25, 16  ;;  %2916 = vrot.lane.b32.xlu0 %v2781_v22, %s7158_s15  ;;  %v1340_v8 = vsel %vm7417_vm2, %v7410_v29, %v9498_v62  ;;  %v4347_v24 = vrot.slane %v9487_v59, 4  ;;  %v3057_v58 = vsel %vm9420_vm4, 0, %v3024_v57  ;;  %6893 = vmatprep.subr.bf16.mxu1 %v7040_v28  ;;  %v3388_v35 = vpop.permute.xlu0 %3387 }
 0x1b2   : > { %4538 = vst.msk [vmem:[#allocation3 + $0xac] sm:$0xf] %vm10800_vm6, %v4457_v37  ;;  %v1622_v18 = vor.u32 %v1620_v33, %v9418_v23  ;;  %v2786_v63 = vrot.slane %v2785_v36, 4  ;;  %v4346_v17 = vsel %vm7396_vm15, %v4338_v46, %v4345_v15  ;;  %vm9530_vm9 = vcmp.ne.s16.totalorder %v1340_v8, 0  ;;  %6894 = vmatpush3.bf16.msra.mxu1 %v7040_v28  ;;  %v287_v15 = vld [vmem:[%s7293_s28 + $0xe0] sm:$0xff] }
 0x1b3   : > { %v3271_v9 = vshrl.u32 %v3057_v58, 16  ;;  %v4127_v50 = vsel %vm9530_vm9, 0, %v4094_v61  ;;  %v3274_v4 = vshll.u32 %v3057_v58, 16  ;;  %v3058_v14 = vsel %vm9530_vm9, 0, %v3025_v44  ;;  %v4459_v61 = vpop.permute.xlu1 %4458  ;;  %6895 = vmatprep.subr.bf16.mxu1 %v7041_v30  ;;  %3542 = vst.msk [vmem:[#allocation3 + $0x10c] sm:$0xf] %vm419_vm1, %v3510_v31 }
 0x1b4   : > { %v1623_v32 = vsel %vm7396_vm15, %v1615_v41, %v1622_v18  ;;  %v2791_v46 = vsel %vm7417_vm2, %v2786_v63, %v9494_v7  ;;  %v4349_v33 = vshrl.u32 %v4127_v50, 16  ;;  %v4352_v27 = vshll.u32 %v4127_v50, 16  ;;  %4539 = vst.msk [vmem:[#allocation3 + $0xb8] sm:$0xf] %vm10800_vm6, %v4459_v61  ;;  %v3577_v61 = vld [vmem:[#allocation2 + $0x74] sm:$0xf] }
 0x1b5   : > { %v3273_v57 = vrot.slane %v3271_v9, 7  ;;  %1823 = vst.msk [vmem:[#allocation3 + $0xa8] sm:$0xf] %vm419_vm1, %v1623_v32  ;;  %2918 = vrot.lane.b32.xlu1 %v2791_v46, %s7158_s15  ;;  %4472 = vrot.lane.b32.xlu0 %v4346_v17, %s7158_s15  ;;  %v3280_v41 = vshrl.u32 %v3058_v14, 16  ;;  %v3283_v37 = vshll.u32 %v3058_v14, 16  ;;  %v1624_v22 = vrot.slane %v9418_v23, 4 }
 0x1b6   : > { %2016 = vst.msk [vmem:[#allocation3 + $0xa8] sm:$0xf] %vm10947_vm12, %v9400_v3  ;;  %v9556_v36 = vrot.slane %v1626_v48, 7  ;;  %v9559_v44 = vrot.slane %v4349_v33, 7  ;;  %v664_v58 = vand.u32 15, %v9413_v60  ;;  %v5226_v3 = vld [vmem:[#allocation3 + $0x90] sm:$0xff]  ;;  %6896 = vmatpush3.bf16.msra.mxu1 %v7041_v30  ;;  %v6704_v52 = vpack.c.bf16 %v287_v15, %v287_v15  ;;  %vm10950_vm12 = vmmov %vm10938_vm11 }
 0x1b7   : > { %v3276_v28 = vor.u32 %v3274_v4, %v3273_v57  ;;  %v3278_v8 = vrot.slane %v3273_v57, 4  ;;  %2983 = vst.msk [vmem:[#allocation3 + $0xa8] sm:$0xf] %vm10800_vm6, %v9475_v34  ;;  %v9565_v23 = vrot.slane %v3280_v41, 7  ;;  %v3864_v18 = vrot.slane %v3862_v47, 4  ;;  %v3390_v4 = vpop.permute.xlu1 %3389 }
 0x1b8   : > { %v1631_v48 = vor.u32 %v1629_v55, %v9556_v36  ;;  %v6587_v63 = vcombine.low %v5226_v3, %v5228_v21  ;;  %3470 = vst.msk [vmem:[#allocation3 + $0xa8] sm:$0xf] %vm10938_vm11, %v3388_v35  ;;  %v7033_v17 = vld [vmem:[#allocation3 + $0x110] ss:$12 sps:$4 sm:$0xff]   ;;  %v4354_v60 = vor.u32 %v4352_v27, %v9559_v44  ;;  %vm9578_vm8 = vcmp.eq.s32.totalorder %v664_v58, 15  ;;  %v4649_v55 = vpop.permute.xlu0 %4648 }
 0x1b9   : > { %v3277_v34 = vsel %vm7396_vm15, %v3269_v13, %v3276_v28  ;;  %v3285_v47 = vor.u32 %v3283_v37, %v9565_v23  ;;  %vm2156_vm5 = vmpackc.low %vm9578_vm8, %vm9578_vm8  ;;  %v3865_v1 = vor.u32 %v3864_v18, %v9464_v54  ;;  %v2794_v13 = vrot.slane %v2792_v5, 4  ;;  %4730 = vst.msk [vmem:[#allocation3 + $0xac] sm:$0xf] %vm10950_vm12, %v4649_v55  ;;  %v950_v32 = vld [vmem:[#allocation2 + $0x48] sm:$0xf] }
 0x1ba   : > { %3403 = vrot.lane.b32.xlu0 %v3277_v34, %s7157_s14  ;;  %v1632_v50 = vsel %vm7396_vm15, %v1624_v22, %v1631_v48  ;;  %5787 = vmatmul.mubr.bf16.gmra.mxu0 %v6587_v63  ;;  %v951_v14 = vld [vmem:[#allocation2 + $0x4c] sm:$0xf]  ;;  %v4355_v46 = vsel %vm7396_vm15, %v4347_v24, %v4354_v60  ;;  %v4578_v33 = vld [vmem:[#allocation2 + $0x70] sm:$0xf]  ;;  %v2188_v54 = vsel %vm2156_vm5, 65537, %v10935_v11  ;;  %v1343_v53 = vrot.slane %v1341_v2, 4  ;;  %vm10953_vm5 = vmmov %vm10950_vm12 }
 0x1bb   : > { %1824 = vst.msk [vmem:[#allocation3 + $0xb4] sm:$0xf] %vm419_vm1, %v1632_v50  ;;  %448 = vst.msk [vmem:[#allocation2 + $0x80] sm:$0xf] %vm419_vm1, %v6704_v52  ;;  %v4356_v5 = vrot.slane %v9559_v44, 4  ;;  %vm10951_vm11 = vcmask 261120   ;;  %4474 = vrot.lane.b32.xlu1 %v4355_v46, %s7158_s15  ;;  %v3286_v59 = vsel %vm7396_vm15, %v3278_v8, %v3285_v47  ;;  %v2795_v25 = vor.u32 %v2794_v13, %v9494_v7  ;;  %v4651_v37 = vpop.permute.xlu1 %4650 }
 0x1bc   : > { %6882 = vmatmul.mubr.msk.bf16.gmra.mxu1 %vm10951_vm11, %v7033_v17  ;;  %vm10952_vm8 = vcmask 519424   ;;  %v2420_v24 = vshrl.u32 %v2188_v54, 16  ;;  %v2423_v27 = vshll.u32 %v2188_v54, 16  ;;  %v9610_v57 = vrot.slane %v3865_v1, 4  ;;  %v3511_v21 = vld [vmem:[#allocation2 + $0x6c] sm:$0xf]  ;;  %vm10954_vm12 = vmmov %vm10953_vm5  ;;  %v9637_v60 = vpop.permute.xlu0 %1937 }
 0x1bd   : > { %2017 = vst.msk [vmem:[#allocation3 + $0xb4] sm:$0xf] %vm10952_vm8, %v9462_v16  ;;  %v1865_v35 = vld [vmem:[#allocation2 + $0x68] sm:$0xf]  ;;  %v1344_v2 = vor.u32 %v1343_v53, %v9498_v62  ;;  %v479_v30 = vadd.s32 208, %v7307_v12  ;;  %v3287_v41 = vrot.slane %v9565_v23, 4 }
 0x1be   : > { %2984 = vst.msk [vmem:[#allocation3 + $0xb4] sm:$0xf] %vm10800_vm6, %v9509_v56  ;;  %4664 = vrot.lane.b32.xlu0 %v4578_v33, %s7157_s14  ;;  %v2422_v16 = vrot.slane %v2420_v24, 7  ;;  %v9623_v22 = vsel %vm8781_vm0, 0, %v950_v32  ;;  %v1633_v7 = vrot.slane %v9556_v36, 4  ;;  %v9628_v62 = vsel %vm8900_vm3, 0, %v951_v14 }
 0x1bf   : > { %3543 = vst.msk [vmem:[#allocation3 + $0x118] sm:$0xf] %vm419_vm1, %v3511_v21  ;;  %v3512_v56 = vld [vmem:[#allocation2 + $0x70] sm:$0xf]  ;;  %v4579_v15 = vld [vmem:[#allocation2 + $0x74] sm:$0xf]  ;;  %3405 = vrot.lane.b32.xlu1 %v3286_v59, %s7157_s14 }
 0x1c0   : > { %3471 = vst.msk [vmem:[#allocation3 + $0xb4] sm:$0xf] %vm10953_vm5, %v3390_v4  ;;  %v3578_v28 = vld [vmem:[#allocation2 + $0x78] sm:$0xf]  ;;  %v9630_v8 = vrot.slane %v2795_v25, 4  ;;  %v1345_v58 = vrot.slane %v1344_v2, 4  ;;  %v2425_v10 = vor.u32 %v2423_v27, %v2422_v16  ;;  %v9680_v27 = vpop.permute.xlu1 %1939 }
 0x1c1   : > { %v671_v3 = vand.u32 15, %v479_v30  ;;  %4731 = vst.msk [vmem:[#allocation3 + $0xb8] sm:$0xf] %vm10954_vm12, %v4651_v37  ;;  %v1635_v38 = vshrl.u32 %v9623_v22, 16  ;;  %v3513_v48 = vld [vmem:[#allocation2 + $0x74] sm:$0xf] }
 0x1c2   : > { %3544 = vst.msk [vmem:[#allocation3 + $0x124] sm:$0xf] %vm419_vm1, %v3512_v56  ;;  %v2427_v18 = vrot.slane %v2422_v16, 4  ;;  %v4095_v63 = vld [vmem:[#allocation2 + $0x78] sm:$0xf]  ;;  %v1638_v17 = vshll.u32 %v9623_v22, 16  ;;  %v1350_v52 = vsel %vm7417_vm2, %v1345_v58, %v7324_v26  ;;  %1953 = vrot.lane.b32.xlu0 %v1865_v35, %s7154_s29  ;;  %v2426_v47 = vsel %vm7396_vm15, %v7350_v40, %v2425_v10  ;;  %v3975_v58 = vpop.permute.xlu0 %3974 }
 0x1c3   : > { %v1644_v34 = vshrl.u32 %v9628_v62, 16  ;;  %3545 = vst.msk [vmem:[#allocation3 + $0x130] sm:$0xf] %vm419_vm1, %v3513_v48  ;;  %v4773_v9 = vld [vmem:[#allocation2 + $0x7c] sm:$0xf]  ;;  %vm895_vm0 = vcmp.eq.s32.totalorder %v671_v3, 0  ;;  %4666 = vrot.lane.b32.xlu1 %v4579_v15, %s7157_s14 }
 0x1c4   : > { %v9644_v55 = vrot.slane %v1635_v38, 7  ;;  %v1647_v31 = vshll.u32 %v9628_v62, 16  ;;  %v2435_v50 = vsel %vm7396_vm15, %v2427_v18, %v7348_v39  ;;  %v4774_v1 = vld [vmem:[#allocation2 + $0x80] sm:$0xf]  ;;  %vm9654_vm3 = vcmp.ne.s16.totalorder %v1350_v52, 0  ;;  %vm1056_vm11 = vmpackc.low %vm895_vm0, %vm895_vm0 }
 0x1c5   : > { %v9658_v4 = vrot.slane %v1644_v34, 7  ;;  %vm9660_vm8 = vcmp.ne.s16.totalorder %v2426_v47, 0  ;;  %vm2508_vm5 = vcmp.ne.s16.totalorder %v2435_v50, 0  ;;  %v9666_v14 = vsel %vm9654_vm3, 0, %v4095_v63  ;;  %v1866_v33 = vld [vmem:[#allocation2 + $0x6c] sm:$0xf] }
 0x1c6   : > { %v9669_v46 = vsel %vm1056_vm11, 65537, %v10935_v11  ;;  %v3610_v54 = vsel %vm9660_vm8, 0, %v3577_v61  ;;  %v4806_v53 = vsel %vm9660_vm8, 0, %v4773_v9  ;;  %v9677_v59 = vsel %vm2508_vm5, 0, %v3578_v28  ;;  %v2059_v30 = vld [vmem:[#allocation2 + $0x6c] sm:$0xf] }
 0x1c7   : > { %v4807_v24 = vsel %vm2508_vm5, 0, %v4774_v1  ;;  %v3868_v21 = vshll.u32 %v3610_v54, 16  ;;  %v3872_v35 = vshrl.u32 %v3610_v54, 16  ;;  %v5064_v25 = vshll.u32 %v4806_v53, 16  ;;  %v2060_v61 = vld [vmem:[#allocation2 + $0x70] sm:$0xf]  ;;  %1955 = vrot.lane.b32.xlu1 %v1866_v33, %s7154_s29 }
 0x1c8   : > { %v5068_v2 = vshrl.u32 %v4806_v53, 16  ;;  %v3878_v16 = vshll.u32 %v9677_v59, 16  ;;  %v3882_v37 = vshrl.u32 %v9677_v59, 16  ;;  %v5074_v56 = vshll.u32 %v4807_v24, 16  ;;  %v7026_v10 = vld [vmem:[#allocation3 + $0xac] ss:$12 sps:$4 sm:$0xff]  }
 0x1c9   : > { %v5078_v15 = vshrl.u32 %v4807_v24, 16  ;;  %v3870_v3 = vrot.slane %v3868_v21, 5  ;;  %v5066_v28 = vrot.slane %v5064_v25, 5  ;;  %v3874_v48 = vrot.slane %v3872_v35, 4  ;;  %5794 = vmatprep.mubr.bf16.mxu0 %v7026_v10  ;;  %v3977_v21 = vpop.permute.xlu1 %3976 }
 0x1ca   : > { %v5070_v38 = vrot.slane %v5068_v2, 4  ;;  %vm10959_vm12 = vcmask 519424   ;;  %v9686_v18 = vrot.slane %v3878_v16, 5  ;;  %v5076_v63 = vrot.slane %v5074_v56, 5  ;;  %v2905_v2 = vpop.permute.xlu0 %2904 }
 0x1cb   : > { %4054 = vst.msk [vmem:[#allocation3 + $0xc4] sm:$0xf] %vm10959_vm12, %v3975_v58  ;;  %v5080_v34 = vrot.slane %v5078_v15, 4  ;;  %v2540_v9 = vsel %vm9660_vm8, 0, %v2059_v30  ;;  %v3871_v52 = vsel %vm7417_vm2, %v9610_v57, %v3870_v3  ;;  %v5067_v47 = vsel %vm7417_vm2, %v9485_v51, %v5066_v28  ;;  %vm10960_vm0 = vmmov %vm10959_vm12  ;;  %v3026_v58 = vld [vmem:[#allocation2 + $0x70] sm:$0xf] }
 0x1cc   : > { %v5071_v1 = vor.u32 %v5070_v38, %v5066_v28  ;;  %v3875_v54 = vor.u32 %v3874_v48, %v3870_v3  ;;  %5194 = vst.msk [vmem:[#allocation3 + $0x128] sm:$0xf] %vm419_vm1, %v5067_v47  ;;  %3990 = vrot.lane.b32.xlu0 %v3871_v52, %s7154_s29  ;;  %v2798_v53 = vshll.u32 %v2540_v9, 16  ;;  %v2802_v24 = vshrl.u32 %v2540_v9, 16  ;;  %v3027_v52 = vld [vmem:[#allocation2 + $0x74] sm:$0xf]  ;;  %vm10963_vm8 = vmmov %vm10960_vm0 }
 0x1cd   : > { %v5081_v33 = vor.u32 %v5080_v34, %v5076_v63  ;;  %v9699_v32 = vsel %vm2508_vm5, 0, %v2060_v61  ;;  %4055 = vst.msk [vmem:[#allocation3 + $0xd0] sm:$0xf] %vm10960_vm0, %v3977_v21  ;;  %v4358_v15 = vshrl.u32 %v9666_v14, 16  ;;  %v4361_v28 = vshll.u32 %v9666_v14, 16  ;;  %vm10964_vm5 = vmmov %vm10960_vm0 }
 0x1ce   : > { %v5072_v35 = vrot.slane %v5071_v1, 4  ;;  %v3876_v57 = vrot.slane %v3875_v54, 4  ;;  %v2808_v25 = vshll.u32 %v9699_v32, 16  ;;  %v2812_v51 = vshrl.u32 %v9699_v32, 16  ;;  %v2907_v1 = vpop.permute.xlu1 %2906  ;;  %v4461_v54 = vpop.permute.xlu0 %4460  ;;  %v4096_v21 = vld [vmem:[#allocation2 + $0x7c] sm:$0xf] }
 0x1cf   : > { %v9704_v30 = vrot.slane %v5081_v33, 4  ;;  %v2800_v16 = vrot.slane %v2798_v53, 5  ;;  %v2804_v56 = vrot.slane %v2802_v24, 4  ;;  %v9720_v10 = vrot.slane %v4358_v15, 7  ;;  %4540 = vst.msk [vmem:[#allocation3 + $0xc4] sm:$0xf] %vm10800_vm6, %v4461_v54 }
 0x1d0   : > { %v3881_v50 = vsel %vm7417_vm2, %v3876_v57, %v9686_v18  ;;  %v5077_v61 = vsel %vm7417_vm2, %v5072_v35, %v5076_v63  ;;  %v9712_v3 = vrot.slane %v2808_v25, 5  ;;  %v1357_v34 = vshll.u32 %v9669_v46, 16  ;;  %v5230_v15 = vld [vmem:[#allocation3 + $0xa8] sm:$0xff]  ;;  %v4580_v32 = vld [vmem:[#allocation2 + $0x78] sm:$0xf] }
 0x1d1   : > { %5195 = vst.msk [vmem:[#allocation3 + $0x134] sm:$0xf] %vm419_vm1, %v5077_v61  ;;  %3992 = vrot.lane.b32.xlu1 %v3881_v50, %s7154_s29  ;;  %v2801_v38 = vsel %vm7417_vm2, %v9630_v8, %v2800_v16  ;;  %v2805_v48 = vor.u32 %v2804_v56, %v2800_v16  ;;  %v1361_v63 = vshrl.u32 %v9669_v46, 16  ;;  %v3059_v14 = vsel %vm9654_vm3, 0, %v3026_v58  ;;  %v288_v8 = vld [vmem:[%s7293_s28 + $0xe8] sm:$0xff] }
 0x1d2   : > { %2920 = vrot.lane.b32.xlu0 %v2801_v38, %s7158_s15  ;;  %v1640_v9 = vor.u32 %v1638_v17, %v9644_v55  ;;  %v1642_v47 = vrot.slane %v9644_v55, 4  ;;  %v4363_v53 = vor.u32 %v4361_v28, %v9720_v10  ;;  %v9733_v24 = vrot.slane %v1357_v34, 5  ;;  %v5232_v55 = vld [vmem:[#allocation3 + $0xb4] sm:$0xff]  ;;  %v4463_v58 = vpop.permute.xlu1 %4462  ;;  %v3392_v50 = vpop.permute.xlu0 %3391 }
 0x1d3   : > { %v2806_v33 = vrot.slane %v2805_v48, 4  ;;  %v4365_v35 = vrot.slane %v9720_v10, 4  ;;  %v3289_v57 = vshrl.u32 %v3059_v14, 16  ;;  %v3292_v25 = vshll.u32 %v3059_v14, 16  ;;  %v289_v48 = vld [vmem:[%s7293_s28 + $0xf0] sm:$0xff] }
 0x1d4   : > { %v1641_v22 = vsel %vm7396_vm15, %v1633_v7, %v1640_v9  ;;  %v1649_v17 = vor.u32 %v1647_v31, %v9658_v4  ;;  %v4364_v56 = vsel %vm7396_vm15, %v4356_v5, %v4363_v53  ;;  %v1360_v36 = vsel %vm7417_vm2, %v7410_v29, %v9733_v24  ;;  %4541 = vst.msk [vmem:[#allocation3 + $0xd0] sm:$0xf] %vm10800_vm6, %v4463_v58  ;;  %v290_v58 = vld [vmem:[%s7293_s28 + $0xf8] sm:$0xff] }
 0x1d5   : > { %v2811_v16 = vsel %vm7417_vm2, %v2806_v33, %v9712_v3  ;;  %1825 = vst.msk [vmem:[#allocation3 + $0xc0] sm:$0xf] %vm419_vm1, %v1641_v22  ;;  %v6705_v7 = vpack.c.bf16 %v288_v8, %v288_v8  ;;  %vm9758_vm11 = vcmp.ne.s16.totalorder %v1360_v36, 0  ;;  %v9762_v44 = vrot.slane %v3289_v57, 7  ;;  %v952_v22 = vld [vmem:[#allocation2 + $0x50] sm:$0xf] }
 0x1d6   : > { %2922 = vrot.lane.b32.xlu1 %v2811_v16, %s7158_s15  ;;  %4476 = vrot.lane.b32.xlu0 %v4364_v56, %s7158_s15  ;;  %2018 = vst.msk [vmem:[#allocation3 + $0xc0] sm:$0xf] %vm10963_vm8, %v9637_v60  ;;  %v1650_v5 = vsel %vm7396_vm15, %v1642_v47, %v1649_v17  ;;  %v480_v31 = vadd.s32 216, %v7307_v12  ;;  %v4129_v61 = vsel %vm9758_vm11, 0, %v4096_v21  ;;  %v3060_v28 = vsel %vm9758_vm11, 0, %v3027_v52  ;;  %v3394_v21 = vpop.permute.xlu1 %3393  ;;  %v4653_v57 = vpop.permute.xlu0 %4652 }
 0x1d7   : > { %1826 = vst.msk [vmem:[#allocation3 + $0xcc] sm:$0xf] %vm419_vm1, %v1650_v5  ;;  %449 = vst.msk [vmem:[#allocation2 + $0x84] sm:$0xf] %vm419_vm1, %v6705_v7  ;;  %v3884_v60 = vrot.slane %v3882_v37, 4  ;;  %v6590_v38 = vcombine.low %v5230_v15, %v5232_v55  ;;  %v4367_v34 = vshrl.u32 %v4129_v61, 16  ;;  %v3294_v9 = vor.u32 %v3292_v25, %v9762_v44 }
 0x1d8   : > { %2985 = vst.msk [vmem:[#allocation3 + $0xc0] sm:$0xf] %vm10800_vm6, %v2905_v2  ;;  %v4370_v14 = vshll.u32 %v4129_v61, 16  ;;  %v3296_v47 = vrot.slane %v9762_v44, 4  ;;  %vm10965_vm12 = vcmask 1044224   ;;  %v3298_v2 = vshrl.u32 %v3060_v28, 16 }
 0x1d9   : > { %2019 = vst.msk [vmem:[#allocation3 + $0xcc] sm:$0xf] %vm10964_vm5, %v9680_v27  ;;  %v3301_v52 = vshll.u32 %v3060_v28, 16  ;;  %v678_v8 = vand.u32 15, %v480_v31  ;;  %v3885_v59 = vor.u32 %v3884_v60, %v9686_v18  ;;  %5795 = vmatmul.mubr.bf16.gmra.mxu0 %v6590_v38  ;;  %v7034_v37 = vld [vmem:[#allocation3 + $0x128] ss:$12 sps:$4 sm:$0xff]   ;;  %v3295_v33 = vsel %vm7396_vm15, %v3287_v41, %v3294_v9  ;;  %vm10968_vm8 = vmmov %vm10965_vm12 }
 0x1da   : > { %3472 = vst.msk [vmem:[#allocation3 + $0xc0] sm:$0xf] %vm10965_vm12, %v3392_v50  ;;  %v9787_v54 = vrot.slane %v4367_v34, 7  ;;  %v6706_v53 = vpack.c.bf16 %v289_v48, %v289_v48  ;;  %v2814_v27 = vrot.slane %v2812_v51, 4  ;;  %3407 = vrot.lane.b32.xlu0 %v3295_v33, %s7157_s14  ;;  %v9796_v18 = vrot.slane %v3298_v2, 7  ;;  %vm10969_vm5 = vmmov %vm10968_vm8  ;;  %v4655_v15 = vpop.permute.xlu1 %4654  ;;  %v9843_v2 = vpop.permute.xlu0 %1941 }
 0x1db   : > { %2986 = vst.msk [vmem:[#allocation3 + $0xcc] sm:$0xf] %vm10800_vm6, %v2907_v1  ;;  %vm9798_vm0 = vcmp.eq.s32.totalorder %v678_v8, 15  ;;  %v9802_v25 = vrot.slane %v3885_v59, 4  ;;  %v1363_v23 = vrot.slane %v1361_v63, 4  ;;  %vm10970_vm12 = vcmask 261120  }
 0x1dc   : > { %3473 = vst.msk [vmem:[#allocation3 + $0xcc] sm:$0xf] %vm10968_vm8, %v3394_v21  ;;  %6885 = vmatprep.mubr.msk.bf16.mxu1 %vm10970_vm12, %v7034_v37  ;;  %v4372_v41 = vor.u32 %v4370_v14, %v9787_v54  ;;  %vm2158_vm6 = vmpackc.low %vm9798_vm0, %vm9798_vm0  ;;  %v2815_v51 = vor.u32 %v2814_v27, %v9712_v3  ;;  %v4374_v46 = vrot.slane %v9787_v54, 4  ;;  %v481_v63 = vadd.s32 224, %v7307_v12  ;;  %v953_v36 = vld [vmem:[#allocation2 + $0x54] sm:$0xf] }
 0x1dd   : > { %4732 = vst.msk [vmem:[#allocation3 + $0xc4] sm:$0xf] %vm10969_vm5, %v4653_v57  ;;  %v3303_v17 = vor.u32 %v3301_v52, %v9796_v18  ;;  %v2190_v55 = vsel %vm2158_vm6, 65537, %v10935_v11  ;;  %v1364_v16 = vor.u32 %v1363_v23, %v9733_v24  ;;  %v3305_v56 = vrot.slane %v9796_v18, 4  ;;  %v1867_v3 = vld [vmem:[#allocation2 + $0x70] sm:$0xf]  ;;  %vm10971_vm6 = vmmov %vm10969_vm5 }
 0x1de   : > { %450 = vst.msk [vmem:[#allocation2 + $0x88] sm:$0xf] %vm419_vm1, %v6706_v53  ;;  %v4373_v7 = vsel %vm7396_vm15, %v4365_v35, %v4372_v41  ;;  %v2438_v44 = vshrl.u32 %v2190_v55, 16  ;;  %v2441_v5 = vshll.u32 %v2190_v55, 16  ;;  %v9825_v31 = vrot.slane %v2815_v51, 4  ;;  %4668 = vrot.lane.b32.xlu0 %v4580_v32, %s7157_s14 }
 0x1df   : > { %4478 = vrot.lane.b32.xlu1 %v4373_v7, %s7158_s15  ;;  %v3304_v24 = vsel %vm7396_vm15, %v3296_v47, %v3303_v17  ;;  %v1365_v50 = vrot.slane %v1364_v16, 4  ;;  %v685_v61 = vand.u32 15, %v481_v63  ;;  %v3028_v10 = vld [vmem:[#allocation2 + $0x78] sm:$0xf]  ;;  %4733 = vst.msk [vmem:[#allocation3 + $0xd0] sm:$0xf] %vm10971_vm6, %v4655_v15  ;;  %v6707_v52 = vpack.c.bf16 %v290_v58, %v290_v58  ;;  %v9884_v16 = vpop.permute.xlu1 %1943 }
 0x1e0   : > { %v9835_v35 = vsel %vm9001_vm10, 0, %v952_v22  ;;  %v2440_v28 = vrot.slane %v2438_v44, 7  ;;  %v4097_v60 = vld [vmem:[#allocation2 + $0x80] sm:$0xf]  ;;  %v1651_v38 = vrot.slane %v9658_v4, 4  ;;  %v9847_v43 = vsel %vm9102_vm14, 0, %v953_v36 }
 0x1e1   : > { %v1653_v48 = vshrl.u32 %v9835_v35, 16  ;;  %v1656_v34 = vshll.u32 %v9835_v35, 16  ;;  %v3579_v14 = vld [vmem:[#allocation2 + $0x7c] sm:$0xf]  ;;  %v3580_v9 = vld [vmem:[#allocation2 + $0x80] sm:$0xf]  ;;  %v1370_v47 = vsel %vm7417_vm2, %v1365_v50, %v7324_v26 }
 0x1e2   : > { %vm897_vm0 = vcmp.eq.s32.totalorder %v685_v61, 0  ;;  %v2443_v8 = vor.u32 %v2441_v5, %v2440_v28  ;;  %v4775_v59 = vld [vmem:[#allocation2 + $0x84] sm:$0xf]  ;;  %v2445_v37 = vrot.slane %v2440_v28, 4  ;;  %vm9849_vm10 = vcmp.ne.s16.totalorder %v1370_v47, 0  ;;  %1957 = vrot.lane.b32.xlu0 %v1867_v3, %s7154_s29  ;;  %v3979_v61 = vpop.permute.xlu0 %3978 }
 0x1e3   : > { %vm1058_vm8 = vmpackc.low %vm897_vm0, %vm897_vm0  ;;  %v9853_v53 = vrot.slane %v1653_v48, 7  ;;  %3409 = vrot.lane.b32.xlu1 %v3304_v24, %s7157_s14  ;;  %v9859_v20 = vsel %vm9849_vm10, 0, %v4097_v60  ;;  %v9866_v57 = vsel %vm9849_vm10, 0, %v3028_v10  ;;  %v1662_v1 = vshrl.u32 %v9847_v43, 16  ;;  %451 = vst.msk [vmem:[#allocation2 + $0x8c] sm:$0xf] %vm419_vm1, %v6707_v52 }
 0x1e4   : > { %v9862_v21 = vsel %vm1058_vm8, 65537, %v10935_v11  ;;  %v4581_v23 = vld [vmem:[#allocation2 + $0x7c] sm:$0xf]  ;;  %v2444_v41 = vsel %vm7396_vm15, %v7350_v40, %v2443_v8  ;;  %v2453_v32 = vsel %vm7396_vm15, %v2445_v37, %v7348_v39  ;;  %v4376_v51 = vshrl.u32 %v9859_v20, 16  ;;  %v2061_v5 = vld [vmem:[#allocation2 + $0x74] sm:$0xf] }
 0x1e5   : > { %v4776_v27 = vld [vmem:[#allocation2 + $0x88] sm:$0xf]  ;;  %v4379_v63 = vshll.u32 %v9859_v20, 16  ;;  %vm9878_vm14 = vcmp.ne.s16.totalorder %v2444_v41, 0  ;;  %vm2510_vm5 = vcmp.ne.s16.totalorder %v2453_v32, 0  ;;  %v1377_v17 = vshll.u32 %v9862_v21, 16 }
 0x1e6   : > { %v1381_v55 = vshrl.u32 %v9862_v21, 16  ;;  %v3612_v36 = vsel %vm9878_vm14, 0, %v3579_v14  ;;  %v4808_v7 = vsel %vm9878_vm14, 0, %v4775_v59  ;;  %v9891_v3 = vsel %vm2510_vm5, 0, %v3580_v9  ;;  %v7030_v10 = vld [vmem:[#allocation3 + $0xc4] ss:$12 sps:$4 sm:$0xff]  }
 0x1e7   : > { %v4809_v44 = vsel %vm2510_vm5, 0, %v4776_v27  ;;  %4670 = vrot.lane.b32.xlu1 %v4581_v23, %s7157_s14  ;;  %v3888_v15 = vshll.u32 %v3612_v36, 16  ;;  %v3892_v58 = vshrl.u32 %v3612_v36, 16  ;;  %v5084_v24 = vshll.u32 %v4808_v7, 16  ;;  %v1868_v28 = vld [vmem:[#allocation2 + $0x74] sm:$0xf]  ;;  %5802 = vmatprep.mubr.bf16.mxu0 %v7030_v10 }
 0x1e8   : > { %v5088_v50 = vshrl.u32 %v4808_v7, 16  ;;  %v3898_v60 = vshll.u32 %v9891_v3, 16  ;;  %v3902_v48 = vshrl.u32 %v9891_v3, 16  ;;  %v5094_v14 = vshll.u32 %v4809_v44, 16  ;;  %v2062_v37 = vld [vmem:[#allocation2 + $0x78] sm:$0xf] }
 0x1e9   : > { %v5098_v47 = vshrl.u32 %v4809_v44, 16  ;;  %vm10976_vm12 = vcmask 519424   ;;  %v3890_v9 = vrot.slane %v3888_v15, 5  ;;  %v5086_v52 = vrot.slane %v5084_v24, 5  ;;  %v3981_v24 = vpop.permute.xlu1 %3980  ;;  %v3516_v21 = vld [vmem:[#allocation2 + $0x80] sm:$0xf] }
 0x1ea   : > { %4056 = vst.msk [vmem:[#allocation3 + $0xdc] sm:$0xf] %vm10976_vm12, %v3979_v61  ;;  %v5090_v8 = vrot.slane %v5088_v50, 4  ;;  %v3894_v59 = vrot.slane %v3892_v58, 4  ;;  %v9898_v27 = vrot.slane %v3898_v60, 5  ;;  %v5096_v23 = vrot.slane %v5094_v14, 5  ;;  %vm10977_vm6 = vmmov %vm10976_vm12 }
 0x1eb   : > { %v5100_v41 = vrot.slane %v5098_v47, 4  ;;  %v2542_v36 = vsel %vm9878_vm14, 0, %v2061_v5  ;;  %1959 = vrot.lane.b32.xlu1 %v1868_v28, %s7154_s29  ;;  %v3891_v7 = vsel %vm7417_vm2, %v9802_v25, %v3890_v9  ;;  %v5087_v44 = vsel %vm7417_vm2, %v9704_v30, %v5086_v52  ;;  %4057 = vst.msk [vmem:[#allocation3 + $0xe8] sm:$0xf] %vm10977_vm6, %v3981_v24  ;;  %v2909_v25 = vpop.permute.xlu0 %2908  ;;  %vm10981_vm14 = vmmov %vm10977_vm6 }
 0x1ec   : > { %v5091_v15 = vor.u32 %v5090_v8, %v5086_v52  ;;  %v3895_v58 = vor.u32 %v3894_v59, %v3890_v9  ;;  %5196 = vst.msk [vmem:[#allocation3 + $0x140] sm:$0xf] %vm419_vm1, %v5087_v44  ;;  %3994 = vrot.lane.b32.xlu0 %v3891_v7, %s7154_s29  ;;  %v2818_v22 = vshll.u32 %v2542_v36, 16  ;;  %v2822_v5 = vshrl.u32 %v2542_v36, 16  ;;  %v3514_v8 = vld [vmem:[#allocation2 + $0x78] sm:$0xf]  ;;  %v9930_v36 = vpop.f32.mrf.mxu0 }
 0x1ed   : > { %v5101_v50 = vor.u32 %v5100_v41, %v5096_v23  ;;  %v9912_v61 = vsel %vm2510_vm5, 0, %v2062_v37  ;;  %v9919_v52 = vrot.slane %v4376_v51, 7  ;;  %v9928_v41 = vrot.slane %v1377_v17, 5  ;;  %3546 = vst.msk [vmem:[#allocation3 + $0x13c] sm:$0xf] %vm419_vm1, %v3514_v8  ;;  %v9942_v24 = vpop.permute.xlu1 %2910 }
 0x1ee   : > { %v5092_v10 = vrot.slane %v5091_v15, 4  ;;  %v3896_v28 = vrot.slane %v3895_v58, 4  ;;  %v2828_v30 = vshll.u32 %v9912_v61, 16  ;;  %v2832_v60 = vshrl.u32 %v9912_v61, 16  ;;  %v3515_v7 = vld [vmem:[#allocation2 + $0x7c] sm:$0xf]  ;;  %v10021_v61 = vpop.f32.mrf.mxu1 }
 0x1ef   : > { %v9917_v14 = vrot.slane %v5101_v50, 4  ;;  %v2820_v47 = vrot.slane %v2818_v22, 5  ;;  %v2824_v9 = vrot.slane %v2822_v5, 4  ;;  %v4098_v17 = vld [vmem:[#allocation2 + $0x84] sm:$0xf]  ;;  %v4383_v15 = vrot.slane %v9919_v52, 4  ;;  %v4465_v50 = vpop.permute.xlu0 %4464 }
 0x1f0   : > { %v3901_v32 = vsel %vm7417_vm2, %v3896_v28, %v9898_v27  ;;  %v5097_v59 = vsel %vm7417_vm2, %v5092_v10, %v5096_v23  ;;  %v9926_v37 = vrot.slane %v2828_v30, 5  ;;  %v4381_v23 = vor.u32 %v4379_v63, %v9919_v52  ;;  %v3029_v58 = vld [vmem:[#allocation2 + $0x7c] sm:$0xf]  ;;  %3547 = vst.msk [vmem:[#allocation3 + $0x148] sm:$0xf] %vm419_vm1, %v3515_v7 }
 0x1f1   : > { %5197 = vst.msk [vmem:[#allocation3 + $0x14c] sm:$0xf] %vm419_vm1, %v5097_v59  ;;  %3996 = vrot.lane.b32.xlu1 %v3901_v32, %s7154_s29  ;;  %v2821_v51 = vsel %vm7417_vm2, %v9825_v31, %v2820_v47  ;;  %v2825_v44 = vor.u32 %v2824_v9, %v2820_v47  ;;  %v1380_v31 = vsel %vm7417_vm2, %v7410_v29, %v9928_v41  ;;  %v3307_v22 = vshrl.u32 %v9866_v57, 16  ;;  %v5236_v32 = vld [vmem:[#allocation3 + $0xcc] sm:$0xff]  ;;  %v4467_v59 = vpop.permute.xlu1 %4466 }
 0x1f2   : > { %2924 = vrot.lane.b32.xlu0 %v2821_v51, %s7158_s15  ;;  %v3310_v20 = vshll.u32 %v9866_v57, 16  ;;  %v1658_v63 = vor.u32 %v1656_v34, %v9853_v53  ;;  %vm10978_vm0 = vcmask 781824   ;;  %v4382_v10 = vsel %vm7396_vm15, %v4374_v46, %v4381_v23  ;;  %v9973_v34 = vpop.f32.mrf.mxu0  ;;  %3548 = vst.msk [vmem:[#allocation3 + $0x154] sm:$0xf] %vm419_vm1, %v3516_v21 }
 0x1f3   : > { %4542 = vst.msk [vmem:[#allocation3 + $0xdc] sm:$0xf] %vm10978_vm0, %v4465_v50  ;;  %v2826_v5 = vrot.slane %v2825_v44, 4  ;;  %vm9960_vm8 = vcmp.ne.s16.totalorder %v1380_v31, 0  ;;  %v1660_v30 = vrot.slane %v9853_v53, 4  ;;  %v3309_v47 = vrot.slane %v3307_v22, 7  ;;  %v3396_v4 = vpop.permute.xlu0 %3395  ;;  %vm10982_vm5 = vmmov %vm10978_vm0 }
 0x1f4   : > { %v4131_v57 = vsel %vm9960_vm8, 0, %v4098_v17  ;;  %v1659_v35 = vsel %vm7396_vm15, %v1651_v38, %v1658_v63  ;;  %v3062_v54 = vsel %vm9960_vm8, 0, %v3029_v58  ;;  %v9985_v44 = vrot.slane %v1662_v1, 7  ;;  %4543 = vst.msk [vmem:[#allocation3 + $0xe8] sm:$0xf] %vm10982_vm5, %v4467_v59  ;;  %vm10983_vm12 = vmmov %vm10978_vm0  ;;  %v5234_v31 = vld [vmem:[#allocation3 + $0xc0] sm:$0xff]  ;;  %v6728_v63 = vpop.f32.mrf.mxu0 }
 0x1f5   : > { %v2831_v46 = vsel %vm7417_vm2, %v2826_v5, %v9926_v37  ;;  %v4385_v9 = vshrl.u32 %v4131_v57, 16  ;;  %v4388_v53 = vshll.u32 %v4131_v57, 16  ;;  %1827 = vst.msk [vmem:[#allocation3 + $0xd8] sm:$0xf] %vm419_vm1, %v1659_v35  ;;  %v3316_v8 = vshrl.u32 %v3062_v54, 16  ;;  %v3398_v57 = vpop.permute.xlu1 %3397 }
 0x1f6   : > { %2926 = vrot.lane.b32.xlu1 %v2831_v46, %s7158_s15  ;;  %4480 = vrot.lane.b32.xlu0 %v4382_v10, %s7158_s15  ;;  %v3312_v38 = vor.u32 %v3310_v20, %v3309_v47  ;;  %2020 = vst.msk [vmem:[#allocation3 + $0xd8] sm:$0xf] %vm10981_vm14, %v9843_v2  ;;  %v3314_v7 = vrot.slane %v3309_v47, 4  ;;  %v3319_v51 = vshll.u32 %v3062_v54, 16  ;;  %v1665_v58 = vshll.u32 %v9847_v43, 16 }
 0x1f7   : > { %v9988_v23 = vrot.slane %v4385_v9, 7  ;;  %v9990_v17 = vrot.slane %v3316_v8, 7  ;;  %2987 = vst.msk [vmem:[#allocation3 + $0xd8] sm:$0xf] %vm10983_vm12, %v2909_v25  ;;  %v482_v50 = vadd.s32 232, %v7307_v12  ;;  %v3904_v1 = vrot.slane %v3902_v48, 4  ;;  %v4657_v47 = vpop.permute.xlu0 %4656 }
 0x1f8   : > { %v3313_v2 = vsel %vm7396_vm15, %v3305_v56, %v3312_v38  ;;  %v6593_v22 = vcombine.low %v5234_v31, %v5236_v32  ;;  %v484_v20 = vadd.s32 248, %v7307_v12  ;;  %vm10984_vm6 = vcmask 1044224   ;;  %v7035_v43 = vld [vmem:[#allocation3 + $0x140] ss:$12 sps:$4 sm:$0xff]   ;;  %v5901_v31 = vpop.f32.mrf.mxu1 }
 0x1f9   : > { %3474 = vst.msk [vmem:[#allocation3 + $0xd8] sm:$0xf] %vm10984_vm6, %v3396_v4  ;;  %v4390_v25 = vor.u32 %v4388_v53, %v9988_v23  ;;  %v3321_v5 = vor.u32 %v3319_v51, %v9990_v17  ;;  %v1667_v10 = vor.u32 %v1665_v58, %v9985_v44  ;;  %v692_v18 = vand.u32 15, %v482_v50  ;;  %vm10985_vm0 = vmmov %vm10984_vm6  ;;  %v4582_v9 = vld [vmem:[#allocation2 + $0x80] sm:$0xf] }
 0x1fa   : > { %3411 = vrot.lane.b32.xlu0 %v3313_v2, %s7157_s14  ;;  %v3905_v56 = vor.u32 %v3904_v1, %v9898_v27  ;;  %5803 = vmatmul.mubr.bf16.gmra.mxu0 %v6593_v22  ;;  %v706_v3 = vand.u32 15, %v484_v20  ;;  %v2834_v48 = vrot.slane %v2832_v60, 4  ;;  %v1383_v35 = vrot.slane %v1381_v55, 4  ;;  %4734 = vst.msk [vmem:[#allocation3 + $0xdc] sm:$0xf] %vm10985_vm0, %v4657_v47 }
 0x1fb   : > { %v4391_v54 = vsel %vm7396_vm15, %v4383_v15, %v4390_v25  ;;  %v3322_v46 = vsel %vm7396_vm15, %v3314_v7, %v3321_v5  ;;  %v1668_v27 = vsel %vm7396_vm15, %v1660_v30, %v1667_v10  ;;  %vm930_vm14 = vcmp.eq.s32.totalorder %v692_v18, 15  ;;  %v954_v30 = vld [vmem:[#allocation2 + $0x58] sm:$0xf]  ;;  %v10048_v59 = vld [vmem:[%s10789_s2] ss:$0 sm:$0xff]  ;;  %v10063_v25 = vpop.permute.xlu0 %1945 }
 0x1fc   : > { %vm10986_vm5 = vcmask 261120   ;;  %4482 = vrot.lane.b32.xlu1 %v4391_v54, %s7158_s15  ;;  %1828 = vst.msk [vmem:[#allocation3 + $0xe4] sm:$0xf] %vm419_vm1, %v1668_v27  ;;  %vm2160_vm12 = vmpackc.low %vm930_vm14, %vm930_vm14  ;;  %v10026_v55 = vrot.slane %v3905_v56, 4  ;;  %vm10028_vm6 = vcmp.eq.s32.totalorder %v706_v3, 15  ;;  %v2835_v52 = vor.u32 %v2834_v48, %v9926_v37 }
 0x1fd   : > { %6886 = vmatmul.mubr.msk.bf16.gmra.mxu1 %vm10986_vm5, %v7035_v43  ;;  %v1384_v15 = vor.u32 %v1383_v35, %v9928_v41  ;;  %vm10989_vm0 = vcmask 519424   ;;  %v2192_v53 = vsel %vm2160_vm12, 65537, %v10935_v11  ;;  %vm2162_vm14 = vmpackc.low %vm10028_vm6, %vm10028_vm6  ;;  %v4392_v8 = vrot.slane %v9988_v23, 4  ;;  %v6729_v41 = vpop.f32.mrf.mxu0  ;;  %v1869_v4 = vld [vmem:[#allocation2 + $0x78] sm:$0xf] }
 0x1fe   : > { %2021 = vst.msk [vmem:[#allocation3 + $0xe4] sm:$0xf] %vm10989_vm0, %v9884_v16  ;;  %v6727_v32 = vadd.f32 %v9973_v34, %v9930_v36  ;;  %v483_v37 = vadd.s32 240, %v7307_v12  ;;  %v4659_v16 = vpop.permute.xlu1 %4658  ;;  %4672 = vrot.lane.b32.xlu0 %v4582_v9, %s7157_s14  ;;  %v2456_v38 = vshrl.u32 %v2192_v53, 16  ;;  %v2459_v7 = vshll.u32 %v2192_v53, 16 }
 0x1ff   : > { %vm10990_vm5 = vcmask 781824   ;;  %v2194_v51 = vsel %vm2162_vm14, 65537, %v10935_v11  ;;  %v10054_v36 = vrot.slane %v2835_v52, 4  ;;  %vm10991_vm12 = vcmask 1044224   ;;  %v3517_v2 = vld [vmem:[#allocation2 + $0x84] sm:$0xf] }
 0x200   : > { %2988 = vst.msk [vmem:[#allocation3 + $0xe4] sm:$0xf] %vm10990_vm5, %v9942_v24  ;;  %v2474_v12 = vshrl.u32 %v2194_v51, 16  ;;  %v2477_v34 = vshll.u32 %v2194_v51, 16  ;;  %v1385_v58 = vrot.slane %v1384_v15, 4  ;;  %vm10992_vm6 = vmmov %vm10991_vm12  ;;  %v699_v50 = vand.u32 15, %v483_v37  ;;  %3413 = vrot.lane.b32.xlu1 %v3322_v46, %s7157_s14  ;;  %v3983_v51 = vpop.permute.xlu0 %3982 }
 0x201   : > { %4735 = vst.msk [vmem:[#allocation3 + $0xe8] sm:$0xf] %vm10991_vm12, %v4659_v16  ;;  %v2458_v1 = vrot.slane %v2456_v38, 7  ;;  %v4099_v22 = vld [vmem:[#allocation2 + $0x88] sm:$0xf]  ;;  %v3323_v24 = vrot.slane %v9990_v17, 4  ;;  %v10060_v20 = vadd.f32 %v6729_v41, %v6728_v63  ;;  %v5741_v43 = vadd.f32 %v6727_v32, %v10048_v59 }
 0x202   : > { %3475 = vst.msk [vmem:[#allocation3 + $0xe4] sm:$0xf] %vm10992_vm6, %v3398_v57  ;;  %v4583_v5 = vld [vmem:[#allocation2 + $0x84] sm:$0xf]  ;;  %v2476_v10 = vrot.slane %v2474_v12, 7  ;;  %v1390_v18 = vsel %vm7417_vm2, %v1385_v58, %v7324_v26  ;;  %vm899_vm0 = vcmp.eq.s32.totalorder %v699_v50, 0  ;;  %1961 = vrot.lane.b32.xlu0 %v1869_v4, %s7154_s29  ;;  %v10098_v32 = vpop.permute.xlu1 %1947 }
 0x203   : > { %3549 = vst.msk [vmem:[#allocation3 + $0x160] sm:$0xf] %vm419_vm1, %v3517_v2  ;;  %v10071_v57 = vsel %vm9218_vm7, 0, %v954_v30  ;;  %v2461_v63 = vor.u32 %v2459_v7, %v2458_v1  ;;  %v3581_v47 = vld [vmem:[#allocation2 + $0x84] sm:$0xf]  ;;  %v2463_v56 = vrot.slane %v2458_v1, 4  ;;  %vm1060_vm5 = vmpackc.low %vm899_vm0, %vm899_vm0  ;;  %v10078_v35 = vadd.f32 %v5901_v31, %v5741_v43 }
 0x204   : > { %v3582_v3 = vld [vmem:[#allocation2 + $0x88] sm:$0xf]  ;;  %vm10074_vm14 = vcmp.ne.s16.totalorder %v1390_v18, 0  ;;  %v4777_v54 = vld [vmem:[#allocation2 + $0x8c] sm:$0xf]  ;;  %v2479_v46 = vor.u32 %v2477_v34, %v2476_v10  ;;  %v2481_v9 = vrot.slane %v2476_v10, 4  ;;  %4674 = vrot.lane.b32.xlu1 %v4583_v5, %s7157_s14 }
 0x205   : > { %v10082_v45 = vsel %vm10074_vm14, 0, %v4099_v22  ;;  %v10085_v27 = vsel %vm1060_vm5, 65537, %v10935_v11  ;;  %v2462_v21 = vsel %vm7396_vm15, %v7350_v40, %v2461_v63  ;;  %v10094_v60 = vsel %vm7396_vm15, %v2463_v56, %v7348_v39  ;;  %v4778_v52 = vld [vmem:[#allocation2 + $0x90] sm:$0xf]  ;;  %v4779_v15 = vld [vmem:[#allocation2 + $0x94] sm:$0xf] }
 0x206   : > { %v4394_v30 = vshrl.u32 %v10082_v45, 16  ;;  %v4397_v53 = vshll.u32 %v10082_v45, 16  ;;  %v1870_v11 = vld [vmem:[#allocation2 + $0x7c] sm:$0xf]  ;;  %vm10100_vm7 = vcmp.ne.s16.totalorder %v2462_v21, 0  ;;  %v2480_v41 = vsel %vm7396_vm15, %v7350_v40, %v2479_v46 }
 0x207   : > { %vm2512_vm12 = vcmp.ne.s16.totalorder %v10094_v60, 0  ;;  %vm10108_vm6 = vcmp.ne.s16.totalorder %v2481_v9, 0  ;;  %v3614_v16 = vsel %vm10100_vm7, 0, %v3581_v47  ;;  %v4810_v4 = vsel %vm10100_vm7, 0, %v4777_v54  ;;  %v4780_v40 = vld [vmem:[#allocation2 + $0x98] sm:$0x1]  ;;  %v3985_v9 = vpop.permute.xlu1 %3984 }
 0x208   : > { %vm10116_vm0 = vcmp.ne.s16.totalorder %v2480_v41, 0  ;;  %v10122_v7 = vsel %vm2512_vm12, 0, %v3582_v3  ;;  %v3908_v12 = vshll.u32 %v3614_v16, 16  ;;  %v3912_v34 = vshrl.u32 %v3614_v16, 16  ;;  %v7038_v31 = vld [vmem:[#allocation3 + $0xdc] ss:$12 sps:$4 sm:$0xff]   ;;  %1963 = vrot.lane.b32.xlu1 %v1870_v11, %s7154_s29  ;;  %v10143_v41 = vpop.permute.xlu0 %2912 }
 0x209   : > { %v5104_v58 = vshll.u32 %v4810_v4, 16  ;;  %v5108_v50 = vshrl.u32 %v4810_v4, 16  ;;  %vm11001_vm5 = vcmask 519424   ;;  %v3918_v2 = vshll.u32 %v10122_v7, 16  ;;  %5810 = vmatprep.mubr.bf16.mxu0 %v7038_v31  ;;  %v2063_v46 = vld [vmem:[#allocation2 + $0x7c] sm:$0xf] }
 0x20a   : > { %4058 = vst.msk [vmem:[#allocation3 + $0xf4] sm:$0xf] %vm11001_vm5, %v3983_v51  ;;  %v3922_v1 = vshrl.u32 %v10122_v7, 16  ;;  %v4811_v22 = vsel %vm2512_vm12, 0, %v4778_v52  ;;  %v4812_v43 = vsel %vm10116_vm0, 0, %v4779_v15  ;;  %v3910_v5 = vrot.slane %v3908_v12, 5 }
 0x20b   : > { %v5106_v10 = vrot.slane %v5104_v58, 5  ;;  %v5110_v18 = vrot.slane %v5108_v50, 4  ;;  %v3914_v63 = vrot.slane %v3912_v34, 4  ;;  %v10132_v47 = vrot.slane %v3918_v2, 5  ;;  %4059 = vst.msk [vmem:[#allocation3 + $0x100] sm:$0xf] %vm11001_vm5, %v3985_v9 }
 0x20c   : > { %v4813_v56 = vsel %vm10108_vm6, 0, %v4780_v40  ;;  %v5114_v3 = vshll.u32 %v4811_v22, 16  ;;  %v5118_v54 = vshrl.u32 %v4811_v22, 16  ;;  %v3911_v21 = vsel %vm7417_vm2, %v10026_v55, %v3910_v5  ;;  %v2064_v58 = vld [vmem:[#allocation2 + $0x80] sm:$0xf]  ;;  %v4469_v37 = vpop.permute.xlu0 %4468 }
 0x20d   : > { %v5107_v52 = vsel %vm7417_vm2, %v9917_v14, %v5106_v10  ;;  %v5111_v15 = vor.u32 %v5110_v18, %v5106_v10  ;;  %v3915_v11 = vor.u32 %v3914_v63, %v3910_v5  ;;  %3998 = vrot.lane.b32.xlu0 %v3911_v21, %s7154_s29  ;;  %v5124_v40 = vshll.u32 %v4812_v43, 16  ;;  %v10149_v5 = vpop.f32.mrf.mxu0 }
 0x20e   : > { %5198 = vst.msk [vmem:[#allocation3 + $0x158] sm:$0xf] %vm419_vm1, %v5107_v52  ;;  %v5116_v16 = vrot.slane %v5114_v3, 5  ;;  %v5120_v4 = vrot.slane %v5118_v54, 4  ;;  %v5128_v51 = vshrl.u32 %v4812_v43, 16  ;;  %v5134_v34 = vshll.u32 %v4813_v56, 16  ;;  %v10156_v56 = vpop.permute.xlu1 %2914 }
 0x20f   : > { %v5112_v12 = vrot.slane %v5111_v15, 4  ;;  %v3916_v55 = vrot.slane %v3915_v11, 4  ;;  %v2544_v14 = vsel %vm10100_vm7, 0, %v2063_v46  ;;  %v5126_v31 = vrot.slane %v5124_v40, 5 }
 0x210   : > { %v5121_v50 = vor.u32 %v5120_v4, %v5116_v16  ;;  %v5130_v2 = vrot.slane %v5128_v51, 4  ;;  %v2838_v22 = vshll.u32 %v2544_v14, 16  ;;  %v5136_v18 = vrot.slane %v5134_v34, 5 }
 0x211   : > { %v3921_v10 = vsel %vm7417_vm2, %v3916_v55, %v10132_v47  ;;  %v5117_v43 = vsel %vm7417_vm2, %v5112_v12, %v5116_v16  ;;  %v2842_v63 = vshrl.u32 %v2544_v14, 16  ;;  %v10162_v9 = vsel %vm2512_vm12, 0, %v2064_v58  ;;  %v3030_v16 = vld [vmem:[#allocation2 + $0x80] sm:$0xf]  ;;  %v10177_v12 = vpop.f32.mrf.mxu1  ;;  %v10179_v55 = vpop.f32.mrf.mxu0 }
 0x212   : > { %v5122_v3 = vrot.slane %v5121_v50, 4  ;;  %v5131_v54 = vor.u32 %v5130_v2, %v5126_v31  ;;  %5199 = vst.msk [vmem:[#allocation3 + $0x164] sm:$0xf] %vm419_vm1, %v5117_v43  ;;  %4000 = vrot.lane.b32.xlu1 %v3921_v10, %s7154_s29  ;;  %v2840_v46 = vrot.slane %v2838_v22, 5  ;;  %vm11002_vm7 = vcmask 781824   ;;  %v10189_v50 = vpop.permute.xlu0 %3399 }
 0x213   : > { %4544 = vst.msk [vmem:[#allocation3 + $0xf4] sm:$0xf] %vm11002_vm7, %v4469_v37  ;;  %v2844_v21 = vrot.slane %v2842_v63, 4  ;;  %v2848_v52 = vshll.u32 %v10162_v9, 16  ;;  %v2852_v15 = vshrl.u32 %v10162_v9, 16  ;;  %v10169_v11 = vrot.slane %v4394_v30, 7  ;;  %vm11003_vm12 = vmmov %vm11002_vm7  ;;  %v10211_v23 = vpop.f32.mrf.mxu0 }
 0x214   : > { %v5127_v4 = vsel %vm7417_vm2, %v5122_v3, %v5126_v31  ;;  %v5132_v40 = vrot.slane %v5131_v54, 4  ;;  %v2841_v60 = vsel %vm7417_vm2, %v10054_v36, %v2840_v46  ;;  %v1397_v51 = vshll.u32 %v10085_v27, 16  ;;  %v4471_v36 = vpop.permute.xlu1 %4470  ;;  %v3031_v43 = vld [vmem:[#allocation2 + $0x84] sm:$0xf]  ;;  %v4100_v63 = vld [vmem:[#allocation2 + $0x8c] sm:$0xf] }
 0x215   : > { %5200 = vst.msk [vmem:[#allocation3 + $0x170] sm:$0xf] %vm419_vm1, %v5127_v4  ;;  %2928 = vrot.lane.b32.xlu0 %v2841_v60, %s7158_s15  ;;  %v2845_v30 = vor.u32 %v2844_v21, %v2840_v46  ;;  %v10183_v34 = vrot.slane %v2848_v52, 5  ;;  %v4399_v14 = vor.u32 %v4397_v53, %v10169_v11  ;;  %v4401_v22 = vrot.slane %v10169_v11, 4  ;;  %v5904_v52 = vpop.f32.mrf.mxu1  ;;  %v10236_v58 = vpop.f32.mrf.mxu0 }
 0x216   : > { %v5137_v31 = vsel %vm7417_vm2, %v5132_v40, %v5136_v18  ;;  %v10193_v2 = vrot.slane %v1397_v51, 5  ;;  %v3063_v10 = vsel %vm10074_vm14, 0, %v3030_v16  ;;  %4545 = vst.msk [vmem:[#allocation3 + $0x100] sm:$0xf] %vm11003_vm12, %v4471_v36  ;;  %v6028_v54 = vmax.f32 %v10078_v35, 0.0  ;;  %v4661_v60 = vpop.permute.xlu0 %4660 }
 0x217   : > { %5201 = vst.msk [vmem:[#allocation3 + $0x17c] sm:$0xf] %vm419_vm1, %v5137_v31  ;;  %v2846_v45 = vrot.slane %v2845_v30, 4  ;;  %v4400_v53 = vsel %vm7396_vm15, %v4392_v8, %v4399_v14  ;;  %v3325_v18 = vshrl.u32 %v3063_v10, 16  ;;  %v3328_v37 = vshll.u32 %v3063_v10, 16 }
 0x218   : > { %v1400_v3 = vsel %vm7417_vm2, %v7410_v29, %v10193_v2  ;;  %v1669_v46 = vrot.slane %v9985_v44, 4  ;;  %v1671_v21 = vshrl.u32 %v10071_v57, 16  ;;  %v955_v16 = vld [vmem:[#allocation2 + $0x5c] sm:$0xf]  ;;  %v1674_v35 = vshll.u32 %v10071_v57, 16  ;;  %v10222_v44 = vpop.permute.xlu1 %3401 }
 0x219   : > { %v2851_v8 = vsel %vm7417_vm2, %v2846_v45, %v10183_v34  ;;  %4484 = vrot.lane.b32.xlu0 %v4400_v53, %s7158_s15  ;;  %vm10217_vm5 = vcmp.ne.s16.totalorder %v1400_v3, 0  ;;  %v3327_v40 = vrot.slane %v3325_v18, 7  ;;  %v5744_v36 = vadd.f32 %v10060_v20, %v10048_v59  ;;  %v7036_v31 = vld [vmem:[#allocation3 + $0x158] ss:$12 sps:$4 sm:$0xff]  }
 0x21a   : > { %2930 = vrot.lane.b32.xlu1 %v2851_v8, %s7158_s15  ;;  %v4133_v51 = vsel %vm10217_vm5, 0, %v4100_v63  ;;  %v10227_v30 = vrot.slane %v1671_v21, 7  ;;  %v3064_v14 = vsel %vm10217_vm5, 0, %v3031_v43  ;;  %vm11006_vm7 = vcmask 1044224   ;;  %v3583_v21 = vld [vmem:[#allocation2 + $0x8c] sm:$0xf] }
 0x21b   : > { %4736 = vst.msk [vmem:[#allocation3 + $0xf4] sm:$0xf] %vm11006_vm7, %v4661_v60  ;;  %v4403_v57 = vshrl.u32 %v4133_v51, 16  ;;  %v4406_v10 = vshll.u32 %v4133_v51, 16  ;;  %v3330_v45 = vor.u32 %v3328_v37, %v3327_v40  ;;  %v3332_v53 = vrot.slane %v3327_v40, 4 }
 0x21c   : > { %v1676_v18 = vor.u32 %v1674_v35, %v10227_v30  ;;  %v3334_v3 = vshrl.u32 %v3064_v14, 16  ;;  %v3337_v8 = vshll.u32 %v3064_v14, 16  ;;  %v5905_v63 = vadd.f32 %v5904_v52, %v5744_v36  ;;  %v4584_v60 = vld [vmem:[#allocation2 + $0x88] sm:$0xf]  ;;  %v3584_v35 = vld [vmem:[#allocation2 + $0x90] sm:$0x1]  ;;  %v4663_v52 = vpop.permute.xlu1 %4662 }
 0x21d   : > { %vm11007_vm12 = vcmask 261120   ;;  %v10238_v43 = vrot.slane %v4403_v57, 7  ;;  %v3331_v20 = vsel %vm7396_vm15, %v3323_v24, %v3330_v45  ;;  %v1471_v37 = vsel %vm9304_vm13, 0, %v955_v16  ;;  %4737 = vst.msk [vmem:[#allocation3 + $0x100] sm:$0xf] %vm11006_vm7, %v4663_v52  ;;  %v10253_v24 = vpop.f32.mrf.mxu0  ;;  %v10261_v45 = vpop.permute.xlu0 %1949 }
 0x21e   : > { %6889 = vmatprep.mubr.msk.bf16.mxu1 %vm11007_vm12, %v7036_v31  ;;  %v1678_v40 = vrot.slane %v10227_v30, 4  ;;  %3415 = vrot.lane.b32.xlu0 %v3331_v20, %s7157_s14  ;;  %v1677_v51 = vsel %vm7396_vm15, %v1669_v46, %v1676_v18  ;;  %v10250_v14 = vrot.slane %v3334_v3, 7  ;;  %v6029_v36 = vmax.f32 %v5905_v63, 0.0  ;;  %v5240_v31 = vld [vmem:[#allocation3 + $0xe4] sm:$0xff]  ;;  %v7037_v30 = vld [vmem:[#allocation3 + $0x170] ss:$12 sps:$4 sm:$0xff]  }
 0x21f   : > { %v1680_v17 = vshrl.u32 %v1471_v37, 16  ;;  %v4408_v49 = vor.u32 %v4406_v10, %v10238_v43  ;;  %1829 = vst.msk [vmem:[#allocation3 + $0xf0] sm:$0xf] %vm419_vm1, %v1677_v51  ;;  %v1683_v16 = vshll.u32 %v1471_v37, 16  ;;  %v3616_v57 = vsel %vm10116_vm0, 0, %v3583_v21  ;;  %v5238_v20 = vld [vmem:[#allocation3 + $0xd8] sm:$0xff] }
 0x220   : > { %v3924_v46 = vrot.slane %v3922_v1, 4  ;;  %vm11008_vm13 = vcmask 519424   ;;  %v3339_v18 = vor.u32 %v3337_v8, %v10250_v14  ;;  %v6060_v3 = vpack.c.bf16 %v6029_v36, %v6028_v54  ;;  %v2065_v37 = vld [vmem:[#allocation2 + $0x84] sm:$0xf]  ;;  %v3518_v54 = vld [vmem:[#allocation2 + $0x88] sm:$0xf] }
 0x221   : > { %2022 = vst.msk [vmem:[#allocation3 + $0xf0] sm:$0xf] %vm11008_vm13, %v10063_v25  ;;  %v10266_v63 = vrot.slane %v1680_v17, 7  ;;  %v3928_v10 = vshll.u32 %v3616_v57, 16  ;;  %v4409_v21 = vsel %vm7396_vm15, %v4401_v22, %v4408_v49  ;;  %vm11009_vm12 = vcmask 781824  }
 0x222   : > { %2989 = vst.msk [vmem:[#allocation3 + $0xf0] sm:$0xf] %vm11009_vm12, %v10143_v41  ;;  %vm11010_vm7 = vcmask 261120   ;;  %v3925_v25 = vor.u32 %v3924_v46, %v10132_v47  ;;  %v3932_v7 = vshrl.u32 %v3616_v57, 16  ;;  %v6596_v1 = vcombine.low %v5238_v20, %v5240_v31  ;;  %v3519_v8 = vld [vmem:[#allocation2 + $0x8c] sm:$0xf]  ;;  %4486 = vrot.lane.b32.xlu1 %v4409_v21, %s7158_s15  ;;  %4676 = vrot.lane.b32.xlu0 %v4584_v60, %s7157_s14  ;;  %v10285_v47 = vpop.f32.mrf.mxu0 }
 0x223   : > { %6890 = vmatmul.mubr.msk.bf16.gmra.mxu1 %vm11010_vm7, %v7037_v30  ;;  %v3340_v52 = vsel %vm7396_vm15, %v3332_v53, %v3339_v18  ;;  %v1685_v11 = vor.u32 %v1683_v16, %v10266_v63  ;;  %v1871_v22 = vld [vmem:[#allocation2 + $0x80] sm:$0xf]  ;;  %v3930_v51 = vrot.slane %v3928_v10, 5  ;;  %v3617_v41 = vsel %vm10108_vm6, 0, %v3584_v35  ;;  %3550 = vst.msk [vmem:[#allocation3 + $0x16c] sm:$0xf] %vm419_vm1, %v3518_v54  ;;  %vm11012_vm12 = vmmov %vm11010_vm7  ;;  %v10292_v35 = vpop.permute.xlu1 %1951 }
 0x224   : > { %vm11011_vm13 = vcmask 1044224   ;;  %3551 = vst.msk [vmem:[#allocation3 + $0x178] sm:$0xf] %vm419_vm1, %v3519_v8  ;;  %6897 = vmatprep.mubr.msk.bf16.mxu1 %vm11012_vm12, %v6060_v3  ;;  %v3926_v53 = vrot.slane %v3925_v25, 4  ;;  %5811 = vmatmul.mubr.bf16.gmra.mxu0 %v6596_v1  ;;  %v3934_v60 = vrot.slane %v3932_v7, 4  ;;  %v3938_v36 = vshll.u32 %v3617_v41, 16  ;;  %v3987_v3 = vpop.permute.xlu0 %3986  ;;  %v10311_v20 = vpop.f32.mrf.mxu0 }
 0x225   : > { %3476 = vst.msk [vmem:[#allocation3 + $0xf0] sm:$0xf] %vm11011_vm13, %v10189_v50  ;;  %v2546_v17 = vsel %vm10116_vm0, 0, %v2065_v37  ;;  %v2066_v31 = vld [vmem:[#allocation2 + $0x88] sm:$0x1]  ;;  %v1686_v50 = vsel %vm7396_vm15, %v1678_v40, %v1685_v11  ;;  %v2854_v49 = vrot.slane %v2852_v15, 4  ;;  %v6733_v38 = vadd.f32 %v10179_v55, %v10149_v5 }
 0x226   : > { %v2858_v16 = vshll.u32 %v2546_v17, 16  ;;  %v2862_v30 = vshrl.u32 %v2546_v17, 16  ;;  %1830 = vst.msk [vmem:[#allocation3 + $0xfc] sm:$0xf] %vm419_vm1, %v1686_v50  ;;  %v3931_v57 = vsel %vm7417_vm2, %v3926_v53, %v3930_v51  ;;  %v3935_v46 = vor.u32 %v3934_v60, %v3930_v51  ;;  %3417 = vrot.lane.b32.xlu1 %v3340_v52, %s7157_s14  ;;  %1965 = vrot.lane.b32.xlu0 %v1871_v22, %s7154_s29  ;;  %v4585_v5 = vld [vmem:[#allocation2 + $0x8c] sm:$0xf] }
 0x227   : > { %v3940_v18 = vrot.slane %v3938_v36, 5  ;;  %vm11013_vm0 = vcmask 519424   ;;  %v2855_v9 = vor.u32 %v2854_v49, %v10183_v34  ;;  %v2547_v40 = vsel %vm10108_vm6, 0, %v2066_v31  ;;  %v4102_v54 = vld [vmem:[#allocation2 + $0x94] sm:$0xf]  ;;  %v3989_v11 = vpop.permute.xlu1 %3988  ;;  %v10341_v31 = vpop.f32.mrf.mxu1 }
 0x228   : > { %2023 = vst.msk [vmem:[#allocation3 + $0xfc] sm:$0xf] %vm11013_vm0, %v10098_v32  ;;  %v2860_v15 = vrot.slane %v2858_v16, 5  ;;  %v2864_v10 = vrot.slane %v2862_v30, 4  ;;  %vm11014_vm7 = vmmov %vm11013_vm0  ;;  %vm11015_vm13 = vcmask 781824   ;;  %v3936_v55 = vrot.slane %v3935_v46, 4 }
 0x229   : > { %4060 = vst.msk [vmem:[#allocation3 + $0x10c] sm:$0xf] %vm11014_vm7, %v3987_v3  ;;  %v5749_v32 = vadd.f32 %v6733_v38, %v10048_v59  ;;  %v2868_v37 = vshll.u32 %v2547_v40, 16  ;;  %v11016_v21 = vshrl.u32 %v10085_v27, 16  ;;  %v2856_v25 = vrot.slane %v2855_v9, 4 }
 0x22a   : > { %2990 = vst.msk [vmem:[#allocation3 + $0xfc] sm:$0xf] %vm11015_vm13, %v10156_v56  ;;  %v2865_v7 = vor.u32 %v2864_v10, %v2860_v15  ;;  %v4410_v39 = vrot.slane %v10238_v43, 4  ;;  %v6736_v1 = vadd.f32 %v10236_v58, %v10211_v23  ;;  %vm11017_vm6 = vcmask 1044224   ;;  %4678 = vrot.lane.b32.xlu1 %v4585_v5, %s7157_s14  ;;  %4002 = vrot.lane.b32.xlu0 %v3931_v57, %s7154_s29  ;;  %v956_v22 = vld [vmem:[#allocation2 + $0x60] sm:$0xf] }
 0x22b   : > { %v1403_v34 = vrot.slane %v11016_v21, 4  ;;  %3477 = vst.msk [vmem:[#allocation3 + $0xfc] sm:$0xf] %vm11017_vm6, %v10222_v44  ;;  %v3941_v56 = vsel %vm7417_vm2, %v3936_v55, %v3940_v18  ;;  %v5910_v8 = vadd.f32 %v10021_v61, %v5749_v32  ;;  %v2870_v52 = vrot.slane %v2868_v37, 5  ;;  %v3033_v51 = vld [vmem:[#allocation2 + $0x8c] sm:$0xf]  ;;  %v10334_v61 = vpop.permute.xlu0 %2916  ;;  %v10364_v5 = vpop.permute.xlu1 %2918 }
 0x22c   : > { %v2861_v58 = vsel %vm7417_vm2, %v2856_v25, %v2860_v15  ;;  %v2866_v23 = vrot.slane %v2865_v7, 4  ;;  %v5752_v44 = vadd.f32 %v6736_v1, %v10048_v59  ;;  %vm1448_vm12 = vcmp.ne.s16.totalorder %v7410_v29, 0  ;;  %4061 = vst.msk [vmem:[#allocation3 + $0x118] sm:$0xf] %vm11013_vm0, %v3989_v11  ;;  %v1872_v41 = vld [vmem:[#allocation2 + $0x84] sm:$0xf] }
 0x22d   : > { %v1404_v27 = vor.u32 %v1403_v34, %v10193_v2  ;;  %v10336_v2 = vpop.f32.mrf.mxu0  ;;  %v6030_v53 = vmax.f32 %v5910_v8, 0.0  ;;  %v4135_v36 = vsel %vm1448_vm12, 0, %v4102_v54  ;;  %v3341_v17 = vrot.slane %v10250_v14, 4  ;;  %v4101_v49 = vld [vmem:[#allocation2 + $0x90] sm:$0xf]  ;;  %v10371_v34 = vpop.f32.mrf.mxu1 }
 0x22e   : > { %v10345_v50 = vsel %vm7417_vm2, %v2866_v23, %v2870_v52  ;;  %v5913_v16 = vadd.f32 %v10177_v12, %v5752_v44  ;;  %v4421_v30 = vshrl.u32 %v4135_v36, 16  ;;  %v4424_v57 = vshll.u32 %v4135_v36, 16  ;;  %v3032_v46 = vld [vmem:[#allocation2 + $0x88] sm:$0xf]  ;;  %1967 = vrot.lane.b32.xlu1 %v1872_v41, %s7154_s29  ;;  %2932 = vrot.lane.b32.xlu0 %v2861_v58, %s7158_s15  ;;  %v7042_v8 = vld [vmem:[#allocation3 + $0xf4] ss:$12 sps:$4 sm:$0xff]  }
 0x22f   : > { %v1405_v60 = vrot.slane %v1404_v27, 4  ;;  %v10348_v18 = vpop.f32.mrf.mxu0  ;;  %v1472_v3 = vsel %vm9420_vm4, 0, %v956_v22  ;;  %v1687_v9 = vrot.slane %v10266_v63, 4  ;;  %v3066_v15 = vsel %vm1448_vm12, 0, %v3033_v51  ;;  %v4473_v0 = vpop.permute.xlu0 %4472  ;;  %v5242_v44 = vld [vmem:[#allocation3 + $0xf0] sm:$0xff]  ;;  %5818 = vmatprep.mubr.bf16.mxu0 %v7042_v8 }
 0x230   : > { %v6031_v40 = vmax.f32 %v5913_v16, 0.0  ;;  %v4423_v10 = vrot.slane %v4421_v30, 7  ;;  %v1689_v42 = vshrl.u32 %v1472_v3, 16  ;;  %v1692_v32 = vshll.u32 %v1472_v3, 16 }
 0x231   : > { %v1410_v38 = vsel %vm7417_vm2, %v1405_v60, %v7324_v26  ;;  %v957_v26 = vld [vmem:[#allocation2 + $0x64] sm:$0xf]  ;;  %v3352_v37 = vshrl.u32 %v3066_v15, 16  ;;  %vm11020_vm2 = vmmov %vm11015_vm13  ;;  %v6744_v52 = vpop.f32.mrf.mxu0  ;;  %v3355_v51 = vshll.u32 %v3066_v15, 16  ;;  %vm11021_vm4 = vcmask 261120   ;;  %v4475_v15 = vpop.permute.xlu1 %4474 }
 0x232   : > { %vm10360_vm7 = vcmp.ne.s16.totalorder %v1410_v38, 0  ;;  %v5244_v21 = vld [vmem:[#allocation3 + $0xfc] sm:$0xff]  ;;  %4546 = vst.msk [vmem:[#allocation3 + $0x10c] sm:$0xf] %vm11020_vm2, %v4473_v0  ;;  %v6061_v1 = vpack.c.bf16 %v6031_v40, %v6030_v53  ;;  %v4426_v54 = vor.u32 %v4424_v57, %v4423_v10  ;;  %v1691_v58 = vrot.slane %v1689_v42, 7  ;;  %4004 = vrot.lane.b32.xlu1 %v3941_v56, %s7154_s29  ;;  %v10377_v57 = vpop.f32.mrf.mxu1  ;;  %vm11023_vm13 = vmmov %vm11013_vm0 }
 0x233   : > { %v4134_v63 = vsel %vm10360_vm7, 0, %v4101_v49  ;;  %v3065_v55 = vsel %vm10360_vm7, 0, %v3032_v46  ;;  %v3354_v23 = vrot.slane %v3352_v37, 7  ;;  %v1473_v41 = vsel %vm9530_vm9, 0, %v957_v26  ;;  %v3404_v36 = vpop.permute.xlu0 %3403  ;;  %v958_v40 = vld [vmem:[#allocation2 + $0x68] sm:$0xf]  ;;  %v6746_v19 = vpop.f32.mrf.mxu0  ;;  %vm11022_vm9 = vmmov %vm11020_vm2 }
 0x234   : > { %v4412_v25 = vshrl.u32 %v4134_v63, 16  ;;  %v4415_v7 = vshll.u32 %v4134_v63, 16  ;;  %v3343_v27 = vshrl.u32 %v3065_v55, 16  ;;  %v3346_v11 = vshll.u32 %v3065_v55, 16  ;;  %6898 = vmatmul.mubr.msk.bf16.vlgmr.msra.gmra.mxu1 %vm11021_vm4, %v6061_v1  ;;  %4547 = vst.msk [vmem:[#allocation3 + $0x118] sm:$0xf] %vm11022_vm9, %v4475_v15  ;;  %vm11024_vm0 = vmmov %vm11020_vm2 }
 0x235   : > { %v6599_v60 = vcombine.low %v5242_v44, %v5244_v21  ;;  %v1694_v49 = vor.u32 %v1692_v32, %v1691_v58  ;;  %v1696_v16 = vrot.slane %v1691_v58, 4  ;;  %v1698_v30 = vshrl.u32 %v1473_v41, 16  ;;  %v959_v21 = vld [vmem:[#allocation2 + $0x6c] sm:$0xf]  ;;  %vm11025_vm2 = vmmov %vm11017_vm6 }
 0x236   : > { %v4414_v22 = vrot.slane %v4412_v25, 7  ;;  %v3345_v53 = vrot.slane %v3343_v27, 7  ;;  %v3357_v3 = vor.u32 %v3355_v51, %v3354_v23  ;;  %v1701_v56 = vshll.u32 %v1473_v41, 16  ;;  %2934 = vrot.lane.b32.xlu1 %v10345_v50, %s7158_s15  ;;  %v6747_v25 = vpop.f32.mrf.mxu0  ;;  %vm11028_vm4 = vmmov %vm11025_vm2 }
 0x237   : > { %5819 = vmatmul.mubr.bf16.gmra.mxu0 %v6599_v60  ;;  %v1695_v42 = vsel %vm7396_vm15, %v1687_v9, %v1694_v49  ;;  %v10381_v0 = vrot.slane %v1698_v30, 7  ;;  %v6739_v9 = vadd.f32 %v10285_v47, %v10253_v24  ;;  %v6742_v32 = vadd.f32 %v10336_v2, %v10311_v20  ;;  %v4665_v37 = vpop.permute.xlu0 %4664  ;;  %v5920_v47 = vpop.f32.mrf.mxu1  ;;  %vm11029_vm9 = vmmov %vm11025_vm2  ;;  %v962_v30 = vld [vmem:[#allocation2 + $0x78] sm:$0xf] }
 0x238   : > { %v4417_v46 = vor.u32 %v4415_v7, %v4414_v22  ;;  %v4419_v38 = vrot.slane %v4414_v22, 4  ;;  %v3348_v10 = vor.u32 %v3346_v11, %v3345_v53  ;;  %v3350_v26 = vrot.slane %v3345_v53, 4  ;;  %1831 = vst.msk [vmem:[#allocation3 + $0x108] sm:$0xf] %vm419_vm1, %v1695_v42  ;;  %v3406_v2 = vpop.permute.xlu1 %3405  ;;  %v960_v7 = vld [vmem:[#allocation2 + $0x70] sm:$0xf] }
 0x239   : > { %2024 = vst.msk [vmem:[#allocation3 + $0x108] sm:$0xf] %vm11023_vm13, %v10261_v45  ;;  %v1703_v24 = vor.u32 %v1701_v56, %v10381_v0  ;;  %v1474_v20 = vsel %vm9654_vm3, 0, %v958_v40  ;;  %v5757_v14 = vadd.f32 %v6739_v9, %v10048_v59  ;;  %v1705_v45 = vrot.slane %v10381_v0, 4  ;;  %vm11026_vm3 = vmmov %vm11023_vm13  ;;  %v4586_v22 = vld [vmem:[#allocation2 + $0x90] sm:$0xf] }
 0x23a   : > { %v4418_v63 = vsel %vm7396_vm15, %v4410_v39, %v4417_v46  ;;  %v4427_v55 = vsel %vm7396_vm15, %v4419_v38, %v4426_v54  ;;  %v3349_v43 = vsel %vm7396_vm15, %v3341_v17, %v3348_v10  ;;  %v3358_v39 = vsel %vm7396_vm15, %v3350_v26, %v3357_v3  ;;  %4738 = vst.msk [vmem:[#allocation3 + $0x10c] sm:$0xf] %vm11017_vm6, %v4665_v37  ;;  %v4587_v56 = vld [vmem:[#allocation2 + $0x94] sm:$0xf]  ;;  %v963_v10 = vld [vmem:[#allocation2 + $0x7c] sm:$0xf]  ;;  %vm11036_vm6 = vmmov %vm11024_vm0 }
 0x23b   : > { %4488 = vrot.lane.b32.xlu0 %v4418_v63, %s7158_s15  ;;  %2991 = vst.msk [vmem:[#allocation3 + $0x108] sm:$0xf] %vm11024_vm0, %v10334_v61  ;;  %v5760_v17 = vadd.f32 %v6742_v32, %v10048_v59  ;;  %v1707_v50 = vshrl.u32 %v1474_v20, 16  ;;  %v1704_v1 = vsel %vm7396_vm15, %v1696_v16, %v1703_v24  ;;  %v1710_v13 = vshll.u32 %v1474_v20, 16  ;;  %4490 = vrot.lane.b32.xlu1 %v4427_v55, %s7158_s15  ;;  %v10446_v63 = vpop.f32.mrf.mxu1 }
 0x23c   : > { %3478 = vst.msk [vmem:[#allocation3 + $0x108] sm:$0xf] %vm11025_vm2, %v3404_v36  ;;  %v1475_v54 = vsel %vm9758_vm11, 0, %v959_v21  ;;  %v6745_v61 = vadd.f32 %v6744_v52, %v10348_v18  ;;  %v5918_v8 = vadd.f32 %v10371_v34, %v5757_v14  ;;  %v6748_v44 = vadd.f32 %v6747_v25, %v6746_v19  ;;  %v961_v52 = vld [vmem:[#allocation2 + $0x74] sm:$0xf]  ;;  %vm11027_vm11 = vmmov %vm11024_vm0  ;;  %v4667_v41 = vpop.permute.xlu1 %4666  ;;  %v1954_v36 = vpop.permute.xlu0 %1953 }
 0x23d   : > { %1832 = vst.msk [vmem:[#allocation3 + $0x114] sm:$0xf] %vm419_vm1, %v1704_v1  ;;  %v5921_v27 = vadd.f32 %v5920_v47, %v5760_v17  ;;  %v1709_v11 = vrot.slane %v1707_v50, 7  ;;  %v1716_v58 = vshrl.u32 %v1475_v54, 16  ;;  %v1719_v23 = vshll.u32 %v1475_v54, 16  ;;  %v6749_v54 = vpop.f32.mrf.mxu0 }
 0x23e   : > { %2025 = vst.msk [vmem:[#allocation3 + $0x114] sm:$0xf] %vm11026_vm3, %v10292_v35  ;;  %v5765_v62 = vadd.f32 %v6745_v61, %v10048_v59  ;;  %v1476_v18 = vsel %vm9849_vm10, 0, %v960_v7  ;;  %v6032_v34 = vmax.f32 %v5918_v8, 0.0  ;;  %v5768_v33 = vadd.f32 %v6748_v44, %v10048_v59  ;;  %vm11030_vm10 = vmmov %vm11026_vm3  ;;  %v964_v21 = vld [vmem:[#allocation2 + $0x80] sm:$0xf]  ;;  %v5933_v61 = vpop.f32.mrf.mxu1 }
 0x23f   : > { %3419 = vrot.lane.b32.xlu0 %v3349_v43, %s7157_s14  ;;  %2992 = vst.msk [vmem:[#allocation3 + $0x114] sm:$0xf] %vm11027_vm11, %v10364_v5  ;;  %v6033_v51 = vmax.f32 %v5921_v27, 0.0  ;;  %v1712_v60 = vor.u32 %v1710_v13, %v1709_v11  ;;  %v1714_v53 = vrot.slane %v1709_v11, 4  ;;  %v1718_v35 = vrot.slane %v1716_v58, 7  ;;  %3421 = vrot.lane.b32.xlu1 %v3358_v39, %s7157_s14  ;;  %vm11039_vm11 = vmmov %vm11025_vm2 }
 0x240   : > { %3479 = vst.msk [vmem:[#allocation3 + $0x114] sm:$0xf] %vm11028_vm4, %v3406_v2  ;;  %v5926_v49 = vadd.f32 %v10341_v31, %v5765_v62  ;;  %v1725_v16 = vshrl.u32 %v1476_v18, 16  ;;  %v1728_v38 = vshll.u32 %v1476_v18, 16  ;;  %v1477_v3 = vsel %vm9960_vm8, 0, %v961_v52  ;;  %v1956_v42 = vpop.permute.xlu1 %1955  ;;  %v3991_v43 = vpop.permute.xlu0 %3990  ;;  %vm11032_vm8 = vmmov %vm11026_vm3 }
 0x241   : > { %4739 = vst.msk [vmem:[#allocation3 + $0x118] sm:$0xf] %vm11029_vm9, %v4667_v41  ;;  %v6062_v5 = vpack.c.bf16 %v6033_v51, %v6032_v34  ;;  %v1713_v46 = vsel %vm7396_vm15, %v1705_v45, %v1712_v60  ;;  %v1721_v31 = vor.u32 %v1719_v23, %v1718_v35  ;;  %v5929_v40 = vadd.f32 %v10377_v57, %v5768_v33  ;;  %v965_v45 = vld [vmem:[#allocation2 + $0x84] sm:$0xf]  ;;  %v6750_v18 = vpop.f32.mrf.mxu0 }
 0x242   : > { %1833 = vst.msk [vmem:[#allocation3 + $0x120] sm:$0xf] %vm419_vm1, %v1713_v46  ;;  %v6034_v15 = vmax.f32 %v5926_v49, 0.0  ;;  %v1723_v19 = vrot.slane %v1718_v35, 4  ;;  %vm11031_vm13 = vcmask 261120   ;;  %v1727_v26 = vrot.slane %v1725_v16, 7 }
 0x243   : > { %4680 = vrot.lane.b32.xlu0 %v4586_v22, %s7157_s14  ;;  %2026 = vst.msk [vmem:[#allocation3 + $0x120] sm:$0xf] %vm11030_vm10, %v1954_v36  ;;  %6901 = vmatprep.mubr.msk.bf16.mxu1 %vm11031_vm13, %v6062_v5  ;;  %v1734_v0 = vshrl.u32 %v1477_v3, 16  ;;  %v1737_v28 = vshll.u32 %v1477_v3, 16  ;;  %v1478_v55 = vsel %vm10074_vm14, 0, %v962_v30  ;;  %v1722_v9 = vsel %vm7396_vm15, %v1714_v53, %v1721_v31  ;;  %vm11033_vm14 = vmmov %vm11026_vm3  ;;  %v5246_v50 = vld [vmem:[#allocation3 + $0x108] sm:$0xff]  ;;  %v6752_v36 = vpop.f32.mrf.mxu0  ;;  %v10473_v53 = vpop.f32.mrf.mxu1 }
 0x244   : > { %v6035_v32 = vmax.f32 %v5929_v40, 0.0  ;;  %v1743_v57 = vshrl.u32 %v1478_v55, 16  ;;  %v1746_v37 = vshll.u32 %v1478_v55, 16  ;;  %4682 = vrot.lane.b32.xlu1 %v4587_v56, %s7157_s14  ;;  %1834 = vst.msk [vmem:[#allocation3 + $0x12c] sm:$0xf] %vm419_vm1, %v1722_v9  ;;  %v1730_v39 = vor.u32 %v1728_v38, %v1727_v26  ;;  %v3993_v62 = vpop.permute.xlu1 %3992  ;;  %v2921_v34 = vpop.permute.xlu0 %2920 }
 0x245   : > { %v1732_v24 = vrot.slane %v1727_v26, 4  ;;  %v1736_v47 = vrot.slane %v1734_v0, 7  ;;  %v1479_v20 = vsel %vm10217_vm5, 0, %v963_v10  ;;  %2027 = vst.msk [vmem:[#allocation3 + $0x12c] sm:$0xf] %vm11032_vm8, %v1956_v42  ;;  %v1480_v8 = vsel %vm10360_vm7, 0, %v964_v21  ;;  %vm11034_vm5 = vmmov %vm11031_vm13  ;;  %v6753_v5 = vpop.f32.mrf.mxu0  ;;  %v5936_v40 = vpop.f32.mrf.mxu1 }
 0x246   : > { %4062 = vst.msk [vmem:[#allocation3 + $0x124] sm:$0xf] %vm11033_vm14, %v3991_v43  ;;  %v6063_v48 = vpack.c.bf16 %v6035_v32, %v6034_v15  ;;  %v1745_v14 = vrot.slane %v1743_v57, 7  ;;  %v1752_v2 = vshrl.u32 %v1479_v20, 16  ;;  %v1755_v17 = vshll.u32 %v1479_v20, 16  ;;  %vm11035_vm7 = vmmov %vm11026_vm3 }
 0x247   : > { %v1731_v1 = vsel %vm7396_vm15, %v1723_v19, %v1730_v39  ;;  %v1739_v13 = vor.u32 %v1737_v28, %v1736_v47  ;;  %v1741_v4 = vrot.slane %v1736_v47, 4  ;;  %v1761_v52 = vshrl.u32 %v1480_v8, 16  ;;  %4063 = vst.msk [vmem:[#allocation3 + $0x130] sm:$0xf] %vm11035_vm7, %v3993_v62  ;;  %vm11038_vm3 = vmmov %vm11024_vm0 }
 0x248   : > { %v5248_v25 = vld [vmem:[#allocation3 + $0x114] sm:$0xff]  ;;  %1835 = vst.msk [vmem:[#allocation3 + $0x138] sm:$0xf] %vm419_vm1, %v1731_v1  ;;  %6902 = vmatmul.mubr.msk.bf16.gmra.mxu1 %vm11034_vm5, %v6063_v48  ;;  %v1748_v11 = vor.u32 %v1746_v37, %v1745_v14  ;;  %v1750_v58 = vrot.slane %v1745_v14, 4  ;;  %v1754_v23 = vrot.slane %v1752_v2, 7  ;;  %v1764_v22 = vshll.u32 %v1480_v8, 16  ;;  %v2923_v56 = vpop.permute.xlu1 %2922  ;;  %v4477_v31 = vpop.permute.xlu0 %4476  ;;  %vm11040_vm4 = vmmov %vm11034_vm5 }
 0x249   : > { %v7044_v7 = vld [vmem:[#allocation3 + $0x10c] ss:$12 sps:$4 sm:$0xff]   ;;  %v6602_v27 = vcombine.low %v5246_v50, %v5248_v25  ;;  %v1740_v44 = vsel %vm7396_vm15, %v1732_v24, %v1739_v13  ;;  %v1481_v12 = vsel %vm1448_vm12, 0, %v965_v45  ;;  %v6751_v51 = vadd.f32 %v6750_v18, %v6749_v54  ;;  %2993 = vst.msk [vmem:[#allocation3 + $0x120] sm:$0xf] %vm11036_vm6, %v2921_v34  ;;  %vm11037_vm12 = vmmov %vm11024_vm0 }
 0x24a   : > { %5826 = vmatprep.mubr.bf16.mxu0 %v7044_v7  ;;  %1836 = vst.msk [vmem:[#allocation3 + $0x144] sm:$0xf] %vm419_vm1, %v1740_v44  ;;  %v1749_v41 = vsel %vm7396_vm15, %v1741_v4, %v1748_v11  ;;  %v1757_v60 = vor.u32 %v1755_v17, %v1754_v23  ;;  %v1759_v29 = vrot.slane %v1754_v23, 4  ;;  %v1763_v35 = vrot.slane %v1761_v52, 7  ;;  %vm11042_vm9 = vmmov %vm11035_vm7  ;;  %v10503_v54 = vld [vmem:[%s10789_s2] ss:$0 sm:$0xff] }
 0x24b   : > { %5827 = vmatmul.mubr.bf16.gmra.mxu0 %v6602_v27  ;;  %1837 = vst.msk [vmem:[#allocation3 + $0x150] sm:$0xf] %vm419_vm1, %v1749_v41  ;;  %v1770_v49 = vshrl.u32 %v1481_v12, 16  ;;  %v1773_v33 = vshll.u32 %v1481_v12, 16  ;;  %v5773_v16 = vadd.f32 %v6751_v51, %v10048_v59  ;;  %v6754_v15 = vadd.f32 %v6753_v5, %v6752_v36  ;;  %vm11044_vm10 = vmmov %vm11035_vm7  ;;  %v10518_v51 = vpop.f32.mrf.mxu1 }
 0x24c   : > { %v1758_v30 = vsel %vm7396_vm15, %v1750_v58, %v1757_v60  ;;  %v1766_v46 = vor.u32 %v1764_v22, %v1763_v35  ;;  %v1768_v38 = vrot.slane %v1763_v35, 4  ;;  %2994 = vst.msk [vmem:[#allocation3 + $0x12c] sm:$0xf] %vm11037_vm12, %v2923_v56  ;;  %v3408_v55 = vpop.permute.xlu0 %3407  ;;  %vm11045_vm13 = vmmov %vm11035_vm7 }
 0x24d   : > { %1838 = vst.msk [vmem:[#allocation3 + $0x15c] sm:$0xf] %vm419_vm1, %v1758_v30  ;;  %v1772_v3 = vrot.slane %v1770_v49, 7  ;;  %v5934_v42 = vadd.f32 %v5933_v61, %v5773_v16  ;;  %v5776_v26 = vadd.f32 %v6754_v15, %v10048_v59  ;;  %vm11046_vm8 = vmmov %vm11035_vm7  ;;  %v5949_v60 = vpop.f32.mrf.mxu1 }
 0x24e   : > { %4548 = vst.msk [vmem:[#allocation3 + $0x124] sm:$0xf] %vm11024_vm0, %v4477_v31  ;;  %v1767_v19 = vsel %vm7396_vm15, %v1759_v29, %v1766_v46  ;;  %vm11047_vm14 = vmmov %vm11024_vm0 }
 0x24f   : > { %v1775_v10 = vor.u32 %v1773_v33, %v1772_v3  ;;  %1839 = vst.msk [vmem:[#allocation3 + $0x168] sm:$0xf] %vm419_vm1, %v1767_v19  ;;  %v5937_v28 = vadd.f32 %v5936_v40, %v5776_v26  ;;  %v6036_v9 = vmax.f32 %v5934_v42, 0.0  ;;  %vm11048_vm5 = vmmov %vm11024_vm0  ;;  %v6876_v5 = vpop.f32.mrf.mxu1 }
 0x250   : > { %3480 = vst.msk [vmem:[#allocation3 + $0x120] sm:$0xf] %vm11025_vm2, %v3408_v55  ;;  %v4669_v21 = vpop.permute.xlu0 %4668  ;;  %vm11049_vm7 = vmmov %vm11024_vm0 }
 0x251   : > { %v1776_v0 = vsel %vm7396_vm15, %v1768_v38, %v1775_v10  ;;  %v6037_v32 = vmax.f32 %v5937_v28, 0.0  ;;  %v4479_v37 = vpop.permute.xlu1 %4478  ;;  %4740 = vst.msk [vmem:[#allocation3 + $0x124] sm:$0xf] %vm11039_vm11, %v4669_v21  ;;  %vm11041_vm15 = vmmov %vm11025_vm2  ;;  %v5952_v40 = vpop.f32.mrf.mxu1 }
 0x252   : > { %1840 = vst.msk [vmem:[#allocation3 + $0x174] sm:$0xf] %vm419_vm1, %v1776_v0  ;;  %vm11043_vm1 = vmmov %vm11025_vm2 }
 0x253   : > { %v6064_v57 = vpack.c.bf16 %v6037_v32, %v6036_v9  ;;  %4549 = vst.msk [vmem:[#allocation3 + $0x130] sm:$0xf] %vm11038_vm3, %v4479_v37  ;;  %vm11050_vm6 = vmmov %vm11043_vm1 }
 0x254   : > { %v1958_v6 = vpop.permute.xlu0 %1957  ;;  %vm11051_vm12 = vmmov %vm11024_vm0 }
 0x255   : > { %6905 = vmatprep.mubr.msk.bf16.mxu1 %vm11040_vm4, %v6064_v57  ;;  %v3410_v59 = vpop.permute.xlu1 %3409  ;;  %2028 = vst.msk [vmem:[#allocation3 + $0x138] sm:$0xf] %vm11042_vm9, %v1958_v6  ;;  %vm11052_vm0 = vmmov %vm11043_vm1 }
 0x256   : > { %3481 = vst.msk [vmem:[#allocation3 + $0x12c] sm:$0xf] %vm11041_vm15, %v3410_v59  ;;  %vm11053_vm2 = vmmov %vm11052_vm0 }
 0x257   : > { %vm11054_vm3 = vmmov %vm11040_vm4 }
 0x258   : > { %v5250_v47 = vld [vmem:[#allocation3 + $0x120] sm:$0xff]  ;;  %vm11055_vm11 = vmmov %vm11046_vm8 }
 0x259   : > { %v4671_v43 = vpop.permute.xlu1 %4670  ;;  %vm11056_vm4 = vmmov %vm11052_vm0 }
 0x25a   : > { %4741 = vst.msk [vmem:[#allocation3 + $0x130] sm:$0xf] %vm11043_vm1, %v4671_v43  ;;  %vm11057_vm15 = vmmov %vm11046_vm8 }
 0x25b   : > { %v6755_v14 = vpop.f32.mrf.mxu0  ;;  %vm11058_vm9 = vmmov %vm11046_vm8 }
 0x25c   : > { %vm11059_vm1 = vmmov %vm11046_vm8 }
 0x25d   : > { %v1960_v39 = vpop.permute.xlu1 %1959  ;;  %v6756_v50 = vpop.f32.mrf.mxu0 }
 0x25e   : > { %2029 = vst.msk [vmem:[#allocation3 + $0x144] sm:$0xf] %vm11044_vm10, %v1960_v39  ;;  %v3995_v24 = vpop.permute.xlu0 %3994  ;;  %v6757_v25 = vadd.f32 %v6756_v50, %v6755_v14  ;;  %vm11060_vm10 = vmmov %vm11048_vm5 }
 0x25f   : > { %4064 = vst.msk [vmem:[#allocation3 + $0x13c] sm:$0xf] %vm11045_vm13, %v3995_v24  ;;  %v6758_v7 = vpop.f32.mrf.mxu0  ;;  %vm11061_vm13 = vmmov %vm11048_vm5 }
 0x260   : > { %v5781_v61 = vadd.f32 %v10503_v54, %v6757_v25 }
 0x261   : > { %v5252_v20 = vld [vmem:[#allocation3 + $0x12c] sm:$0xff]  ;;  %v6759_v4 = vpop.f32.mrf.mxu0 }
 0x262   : > { %v7046_v48 = vld [vmem:[#allocation3 + $0x124] ss:$12 sps:$4 sm:$0xff]   ;;  %v6605_v17 = vcombine.low %v5250_v47, %v5252_v20  ;;  %v6760_v8 = vadd.f32 %v6759_v4, %v6758_v7  ;;  %v5942_v11 = vadd.f32 %v10446_v63, %v5781_v61 }
 0x263   : > { %v3997_v2 = vpop.permute.xlu1 %3996  ;;  %5834 = vmatprep.mubr.bf16.mxu0 %v7046_v48 }
 0x264   : > { %4065 = vst.msk [vmem:[#allocation3 + $0x148] sm:$0xf] %vm11046_vm8, %v3997_v2  ;;  %v2925_v45 = vpop.permute.xlu0 %2924  ;;  %5835 = vmatmul.mubr.bf16.gmra.mxu0 %v6605_v17  ;;  %v5784_v58 = vadd.f32 %v10503_v54, %v6760_v8  ;;  %v6038_v18 = vmax.f32 %v5942_v11, 0.0  ;;  %vm11062_vm8 = vmmov %vm11048_vm5 }
 0x265   : > { %2995 = vst.msk [vmem:[#allocation3 + $0x138] sm:$0xf] %vm11047_vm14, %v2925_v45  ;;  %vm11063_vm14 = vmmov %vm11052_vm0 }
 0x266   : > { %v5945_v62 = vadd.f32 %v10473_v53, %v5784_v58 }
 0x268   : > { %v2927_v1 = vpop.permute.xlu1 %2926  ;;  %v4481_v13 = vpop.permute.xlu0 %4480  ;;  %v6039_v52 = vmax.f32 %v5945_v62, 0.0 }
 0x269   : > { %2996 = vst.msk [vmem:[#allocation3 + $0x144] sm:$0xf] %vm11048_vm5, %v2927_v1  ;;  %vm11064_vm5 = vmmov %vm11054_vm3 }
 0x26a   : > { %4550 = vst.msk [vmem:[#allocation3 + $0x13c] sm:$0xf] %vm11049_vm7, %v4481_v13  ;;  %v6065_v12 = vpack.c.bf16 %v6039_v52, %v6038_v18 }
 0x26c   : > { %v3412_v27 = vpop.permute.xlu0 %3411  ;;  %6906 = vmatmul.mubr.msk.bf16.gmra.mxu1 %vm11054_vm3, %v6065_v12 }
 0x26d   : > { %3482 = vst.msk [vmem:[#allocation3 + $0x138] sm:$0xf] %vm11050_vm6, %v3412_v27  ;;  %vm11065_vm6 = vmmov %vm11052_vm0 }
 0x26e   : > { %v4483_v23 = vpop.permute.xlu1 %4482 }
 0x26f   : > { %4551 = vst.msk [vmem:[#allocation3 + $0x148] sm:$0xf] %vm11051_vm12, %v4483_v23  ;;  %vm11066_vm12 = vmmov %vm11052_vm0 }
 0x270   : > { %v4673_v44 = vpop.permute.xlu0 %4672 }
 0x271   : > { %4742 = vst.msk [vmem:[#allocation3 + $0x13c] sm:$0xf] %vm11052_vm0, %v4673_v44  ;;  %vm11067_vm0 = vmmov %vm11059_vm1 }
 0x272   : > { %v3414_v22 = vpop.permute.xlu1 %3413  ;;  %vm11068_vm3 = vmmov %vm11067_vm0 }
 0x273   : > { %3483 = vst.msk [vmem:[#allocation3 + $0x144] sm:$0xf] %vm11053_vm2, %v3414_v22 }
 0x274   : > { %v1962_v34 = vpop.permute.xlu0 %1961 }
 0x275   : > { %2030 = vst.msk [vmem:[#allocation3 + $0x150] sm:$0xf] %vm11055_vm11, %v1962_v34  ;;  %vm11069_vm11 = vmmov %vm11067_vm0  ;;  %v6879_v34 = vpop.f32.mrf.mxu1 }
 0x276   : > { %v4675_v63 = vpop.permute.xlu1 %4674 }
 0x277   : > { %4743 = vst.msk [vmem:[#allocation3 + $0x148] sm:$0xf] %vm11056_vm4, %v4675_v63  ;;  %vm11070_vm4 = vmmov %vm11049_vm7  ;;  %v5965_v63 = vpop.f32.mrf.mxu1 }
 0x278   : > { %v5254_v53 = vld [vmem:[#allocation3 + $0x138] sm:$0xff] }
 0x27a   : > { %v1964_v41 = vpop.permute.xlu1 %1963  ;;  %v6761_v49 = vpop.f32.mrf.mxu0 }
 0x27b   : > { %2031 = vst.msk [vmem:[#allocation3 + $0x15c] sm:$0xf] %vm11057_vm15, %v1964_v41  ;;  %vm11071_vm15 = vmmov %vm11067_vm0 }
 0x27c   : > { %v6762_v16 = vpop.f32.mrf.mxu0 }
 0x27d   : > { %v6763_v30 = vadd.f32 %v6762_v16, %v6761_v49 }
 0x27e   : > { %v5256_v29 = vld [vmem:[#allocation3 + $0x144] sm:$0xff]  ;;  %v6764_v38 = vpop.f32.mrf.mxu0 }
 0x27f   : > { %v3999_v36 = vpop.permute.xlu0 %3998  ;;  %v7048_v35 = vld [vmem:[#allocation3 + $0x13c] ss:$12 sps:$4 sm:$0xff]   ;;  %v6608_v33 = vcombine.low %v5254_v53, %v5256_v29  ;;  %v5789_v3 = vadd.f32 %v10503_v54, %v6763_v30 }
 0x280   : > { %4066 = vst.msk [vmem:[#allocation3 + $0x154] sm:$0xf] %vm11058_vm9, %v3999_v36  ;;  %5842 = vmatprep.mubr.bf16.mxu0 %v7048_v35  ;;  %v6765_v56 = vpop.f32.mrf.mxu0  ;;  %vm11072_vm9 = vmmov %vm11070_vm4  ;;  %v6880_v36 = vpop.f32.mrf.mxu1 }
 0x281   : > { %5843 = vmatmul.mubr.bf16.gmra.mxu0 %v6608_v33  ;;  %v6766_v15 = vadd.f32 %v6765_v56, %v6764_v38  ;;  %v5950_v19 = vadd.f32 %v5949_v60, %v5789_v3 }
 0x282   : > { %v5968_v49 = vpop.f32.mrf.mxu1 }
 0x283   : > { %v5792_v10 = vadd.f32 %v10503_v54, %v6766_v15  ;;  %v6040_v28 = vmax.f32 %v5950_v19, 0.0 }
 0x284   : > { %v4001_v46 = vpop.permute.xlu1 %4000  ;;  %v10551_v30 = vpop.f32.mrf.mxu1 }
 0x285   : > { %4067 = vst.msk [vmem:[#allocation3 + $0x160] sm:$0xf] %vm11059_vm1, %v4001_v46  ;;  %v5953_v26 = vadd.f32 %v5952_v40, %v5792_v10  ;;  %vm11073_vm1 = vmmov %vm11070_vm4 }
 0x286   : > { %v5981_v3 = vpop.f32.mrf.mxu1 }
 0x287   : > { %v2929_v31 = vpop.permute.xlu0 %2928  ;;  %v6041_v55 = vmax.f32 %v5953_v26, 0.0 }
 0x288   : > { %2997 = vst.msk [vmem:[#allocation3 + $0x150] sm:$0xf] %vm11060_vm10, %v2929_v31  ;;  %vm11074_vm10 = vmmov %vm11073_vm1  ;;  %v10554_v40 = vpop.f32.mrf.mxu1 }
 0x289   : > { %v6066_v9 = vpack.c.bf16 %v6041_v55, %v6040_v28 }
 0x28a   : > { %v5984_v10 = vpop.f32.mrf.mxu1 }
 0x28b   : > { %v4485_v42 = vpop.permute.xlu0 %4484  ;;  %6909 = vmatprep.mubr.msk.bf16.mxu1 %vm11064_vm5, %v6066_v9 }
 0x28c   : > { %v2931_v0 = vpop.permute.xlu1 %2930  ;;  %4552 = vst.msk [vmem:[#allocation3 + $0x154] sm:$0xf] %vm11061_vm13, %v4485_v42  ;;  %vm11075_vm13 = vmmov %vm11053_vm2 }
 0x28d   : > { %2998 = vst.msk [vmem:[#allocation3 + $0x15c] sm:$0xf] %vm11062_vm8, %v2931_v0  ;;  %vm11076_vm8 = vmmov %vm11064_vm5 }
 0x28e   : > { %vm11078_vm5 = vmmov %vm11053_vm2 }
 0x290   : > { %v3416_v32 = vpop.permute.xlu0 %3415 }
 0x291   : > { %3484 = vst.msk [vmem:[#allocation3 + $0x150] sm:$0xf] %vm11063_vm14, %v3416_v32  ;;  %vm11077_vm14 = vmmov %vm11053_vm2 }
 0x294   : > { %v4487_v57 = vpop.permute.xlu1 %4486  ;;  %v4677_v37 = vpop.permute.xlu0 %4676 }
 0x295   : > { %4553 = vst.msk [vmem:[#allocation3 + $0x160] sm:$0xf] %vm11049_vm7, %v4487_v57  ;;  %vm11079_vm7 = vmmov %vm11053_vm2 }
 0x296   : > { %4744 = vst.msk [vmem:[#allocation3 + $0x154] sm:$0xf] %vm11065_vm6, %v4677_v37  ;;  %vm11080_vm6 = vmmov %vm11076_vm8 }
 0x298   : > { %v3418_v21 = vpop.permute.xlu1 %3417  ;;  %v1966_v59 = vpop.permute.xlu0 %1965 }
 0x299   : > { %3485 = vst.msk [vmem:[#allocation3 + $0x15c] sm:$0xf] %vm11066_vm12, %v3418_v21  ;;  %v6767_v39 = vpop.f32.mrf.mxu0  ;;  %vm11081_vm12 = vmmov %vm11080_vm6 }
 0x29a   : > { %2032 = vst.msk [vmem:[#allocation3 + $0x168] sm:$0xf] %vm11067_vm0, %v1966_v59  ;;  %vm11082_vm0 = vmmov %vm11080_vm6 }
 0x29b   : > { %v6768_v24 = vpop.f32.mrf.mxu0 }
 0x29c   : > { %v4679_v6 = vpop.permute.xlu1 %4678  ;;  %v4003_v43 = vpop.permute.xlu0 %4002  ;;  %v6769_v48 = vadd.f32 %v6768_v24, %v6767_v39 }
 0x29d   : > { %4745 = vst.msk [vmem:[#allocation3 + $0x160] sm:$0xf] %vm11053_vm2, %v4679_v6  ;;  %v6770_v14 = vpop.f32.mrf.mxu0  ;;  %v5258_v50 = vld [vmem:[#allocation3 + $0x150] sm:$0xff]  ;;  %vm11083_vm2 = vmmov %vm11082_vm0 }
 0x29e   : > { %4068 = vst.msk [vmem:[#allocation3 + $0x16c] sm:$0xf] %vm11068_vm3, %v4003_v43  ;;  %v5797_v2 = vadd.f32 %v10503_v54, %v6769_v48  ;;  %vm11084_vm3 = vmmov %vm11082_vm0 }
 0x29f   : > { %v6771_v17 = vpop.f32.mrf.mxu0 }
 0x2a0   : > { %v1968_v47 = vpop.permute.xlu1 %1967  ;;  %v2933_v20 = vpop.permute.xlu0 %2932  ;;  %v6772_v1 = vadd.f32 %v6771_v17, %v6770_v14  ;;  %v5958_v61 = vadd.f32 %v10518_v51, %v5797_v2  ;;  %v10578_v17 = vld [vmem:[%s10791_s4] ss:$0 sm:$0xff] }
 0x2a1   : > { %2033 = vst.msk [vmem:[#allocation3 + $0x174] sm:$0xf] %vm11069_vm11, %v1968_v47  ;;  %vm11085_vm11 = vmmov %vm11082_vm0 }
 0x2a2   : > { %2999 = vst.msk [vmem:[#allocation3 + $0x168] sm:$0xf] %vm11070_vm4, %v2933_v20  ;;  %v5800_v4 = vadd.f32 %v10503_v54, %v6772_v1  ;;  %v6042_v58 = vmax.f32 %v5958_v61, 0.0  ;;  %vm11086_vm4 = vmmov %vm11082_vm0 }
 0x2a4   : > { %v4005_v45 = vpop.permute.xlu1 %4004  ;;  %v5260_v25 = vld [vmem:[#allocation3 + $0x15c] sm:$0xff]  ;;  %v5961_v27 = vadd.f32 %v6876_v5, %v5800_v4 }
 0x2a5   : > { %v7050_v7 = vld [vmem:[#allocation3 + $0x154] ss:$12 sps:$4 sm:$0xff]   ;;  %4069 = vst.msk [vmem:[#allocation3 + $0x178] sm:$0xf] %vm11071_vm15, %v4005_v45  ;;  %v6611_v13 = vcombine.low %v5258_v50, %v5260_v25  ;;  %vm11087_vm15 = vmmov %vm11082_vm0 }
 0x2a6   : > { %5850 = vmatprep.mubr.bf16.mxu0 %v7050_v7  ;;  %v6043_v23 = vmax.f32 %v5961_v27, 0.0  ;;  %v6310_v25 = vld [vmem:[%s7293_s28 + $0x10] sm:$0xff] }
 0x2a7   : > { %5851 = vmatmul.mubr.bf16.gmra.mxu0 %v6611_v13  ;;  %v6308_v13 = vld [vmem:[%s7293_s28] sm:$0xff] }
 0x2a8   : > { %v2935_v8 = vpop.permute.xlu1 %2934  ;;  %v6067_v44 = vpack.c.bf16 %v6043_v23, %v6042_v58 }
 0x2a9   : > { %3000 = vst.msk [vmem:[#allocation3 + $0x174] sm:$0xf] %vm11072_vm9, %v2935_v8  ;;  %vm11088_vm9 = vmmov %vm11082_vm0 }
 0x2aa   : > { %6910 = vmatmul.mubr.msk.bf16.gmra.mxu1 %vm11076_vm8, %v6067_v44  ;;  %vm11092_vm8 = vmmov %vm11082_vm0 }
 0x2ad   : > { %v4489_v11 = vpop.permute.xlu0 %4488  ;;  %v4491_v62 = vpop.permute.xlu1 %4490 }
 0x2ae   : > { %4554 = vst.msk [vmem:[#allocation3 + $0x16c] sm:$0xf] %vm11073_vm1, %v4489_v11  ;;  %v6311_v11 = vld [vmem:[%s7293_s28 + $0x18] sm:$0xff]  ;;  %vm11089_vm1 = vmmov %vm11082_vm0 }
 0x2af   : > { %4555 = vst.msk [vmem:[#allocation3 + $0x178] sm:$0xf] %vm11074_vm10, %v4491_v62  ;;  %vm11090_vm10 = vmmov %vm11082_vm0 }
 0x2b1   : > { %v3420_v18 = vpop.permute.xlu0 %3419  ;;  %v3422_v52 = vpop.permute.xlu1 %3421 }
 0x2b2   : > { %3486 = vst.msk [vmem:[#allocation3 + $0x168] sm:$0xf] %vm11075_vm13, %v3420_v18  ;;  %vm11091_vm13 = vmmov %vm11082_vm0 }
 0x2b3   : > { %3487 = vst.msk [vmem:[#allocation3 + $0x174] sm:$0xf] %vm11077_vm14, %v3422_v52  ;;  %vm11093_vm14 = vmmov %vm11082_vm0 }
 0x2b5   : > { %v4681_v22 = vpop.permute.xlu0 %4680 }
 0x2b6   : > { %4746 = vst.msk [vmem:[#allocation3 + $0x16c] sm:$0xf] %vm11078_vm5, %v4681_v22  ;;  %v4683_v12 = vpop.permute.xlu1 %4682  ;;  %v6309_v22 = vld [vmem:[%s7293_s28 + $0x8] sm:$0xff]  ;;  %vm11094_vm5 = vmmov %vm11082_vm0 }
 0x2b7   : > { %4747 = vst.msk [vmem:[#allocation3 + $0x178] sm:$0xf] %vm11079_vm7, %v4683_v12  ;;  %vm11095_vm7 = vmmov %vm11082_vm0 }
 0x2ba   : > { %v7054_v41 = vld [vmem:[#allocation3 + $0x168] ss:$12 sps:$4 sm:$0xff]   ;;  %v6773_v60 = vpop.f32.mrf.mxu0 }
 0x2bc   : > { %v6774_v53 = vpop.f32.mrf.mxu0 }
 0x2bd   : > { %v6775_v29 = vadd.f32 %v6774_v53, %v6773_v60  ;;  %v10557_v42 = vpop.f32.mrf.mxu1 }
 0x2be   : > { %v7052_v51 = vld [vmem:[#allocation3 + $0x16c] ss:$12 sps:$4 sm:$0xff]   ;;  %v6776_v35 = vpop.f32.mrf.mxu0 }
 0x2bf   : > { %5858 = vmatprep.mubr.bf16.mxu0 %v7052_v51  ;;  %v5805_v33 = vadd.f32 %v10503_v54, %v6775_v29  ;;  %v10559_v26 = vpop.f32.mrf.mxu1 }
 0x2c0   : > { %5859 = vmatmul.mubr.bf16.gmra.mxu0 %v7054_v41  ;;  %v6777_v16 = vpop.f32.mrf.mxu0 }
 0x2c1   : > { %v6778_v5 = vadd.f32 %v6777_v16, %v6776_v35  ;;  %v5966_v46 = vadd.f32 %v5965_v63, %v5805_v33  ;;  %v10561_v0 = vpop.f32.mrf.mxu1 }
 0x2c3   : > { %v5808_v38 = vadd.f32 %v10503_v54, %v6778_v5  ;;  %v6044_v31 = vmax.f32 %v5966_v46, 0.0  ;;  %v10563_v28 = vpop.f32.mrf.mxu1 }
 0x2c5   : > { %v5969_v56 = vadd.f32 %v5968_v49, %v5808_v38 }
 0x2c7   : > { %v6045_v15 = vmax.f32 %v5969_v56, 0.0 }
 0x2c9   : > { %v6068_v19 = vpack.c.bf16 %v6045_v15, %v6044_v31  ;;  %v6314_v31 = vld [vmem:[%s7293_s28 + $0x30] sm:$0xff] }
 0x2cb   : > { %6913 = vmatprep.mubr.msk.bf16.mxu1 %vm11080_vm6, %v6068_v19  ;;  %vm11096_vm6 = vmmov %vm11082_vm0 }
 0x2e3   : > { %v10565_v55 = vpop.f32.mrf.mxu1 }
 0x2e4   : > { %v6779_v9 = vpop.f32.mrf.mxu0 }
 0x2e5   : > { %v10567_v37 = vpop.f32.mrf.mxu1 }
 0x2e6   : > { %v6780_v32 = vpop.f32.mrf.mxu0 }
 0x2e7   : > { %v6781_v57 = vadd.f32 %v6780_v32, %v6779_v9  ;;  %v10570_v39 = vpop.f32.mrf.mxu1 }
 0x2e8   : > { %v6782_v21 = vpop.f32.mrf.mxu0 }
 0x2e9   : > { %v5813_v59 = vadd.f32 %v10503_v54, %v6781_v57  ;;  %v10573_v48 = vpop.f32.mrf.mxu1 }
 0x2ea   : > { %v6783_v6 = vpop.f32.mrf.mxu0 }
 0x2eb   : > { %v6784_v43 = vadd.f32 %v6783_v6, %v6782_v21  ;;  %v5974_v24 = vadd.f32 %v6879_v34, %v5813_v59 }
 0x2ed   : > { %v5816_v47 = vadd.f32 %v10503_v54, %v6784_v43  ;;  %v6046_v14 = vmax.f32 %v5974_v24, 0.0 }
 0x2ef   : > { %v5977_v20 = vadd.f32 %v6880_v36, %v5816_v47 }
 0x2f1   : > { %v6047_v2 = vmax.f32 %v5977_v20, 0.0 }
 0x2f3   : > { %v6069_v45 = vpack.c.bf16 %v6047_v2, %v6046_v14  ;;  %v6313_v2 = vld [vmem:[%s7293_s28 + $0x28] sm:$0xff] }
 0x2f4   : > { %v6899_v50 = vpop.f32.mrf.mxu1 }
 0x2f5   : > { %v6190_v7 = vadd.f32 %v6899_v50, %v10578_v17  ;;  %6914 = vmatmul.mubr.msk.bf16.gmra.mxu1 %vm11081_vm12, %v6069_v45  ;;  %vm11097_vm12 = vmmov %vm11082_vm0 }
 0x2f6   : > { %v6181_v1 = vpop.f32.mrf.mxu1 }
 0x2f7   : > { %v6785_v61 = vpop.f32.mrf.mxu0  ;;  %v6342_v4 = vadd.f32 %v6310_v25, %v6190_v7  ;;  %v6182_v8 = vadd.f32 %v10578_v17, %v6181_v1 }
 0x2f8   : > { %v6900_v27 = vpop.f32.mrf.mxu1 }
 0x2f9   : > { %v6786_v58 = vpop.f32.mrf.mxu0  ;;  %v6374_v23 = vmax.f32 %v6342_v4, 0.0  ;;  %v6340_v62 = vadd.f32 %v6308_v13, %v6182_v8  ;;  %v6193_v44 = vadd.f32 %v6900_v27, %v10578_v17 }
 0x2fa   : > { %v6787_v18 = vadd.f32 %v6786_v58, %v6785_v61  ;;  %v6184_v52 = vpop.f32.mrf.mxu1 }
 0x2fb   : > { %v6788_v12 = vpop.f32.mrf.mxu0  ;;  %6406 = vst.msk [vmem:[%s7299_s12 + $0x10] sm:$0xff] %vm11082_vm0, %v6374_v23  ;;  %v6372_v34 = vmax.f32 %v6340_v62, 0.0  ;;  %v6343_v63 = vadd.f32 %v6311_v11, %v6193_v44  ;;  %v6185_v51 = vadd.f32 %v10578_v17, %v6184_v52 }
 0x2fc   : > { %v5821_v41 = vadd.f32 %v10503_v54, %v6787_v18 }
 0x2fd   : > { %v6789_v60 = vpop.f32.mrf.mxu0  ;;  %6404 = vst.msk [vmem:[%s7299_s12] sm:$0xff] %vm11083_vm2, %v6372_v34  ;;  %v6375_v36 = vmax.f32 %v6343_v63, 0.0  ;;  %v6341_v53 = vadd.f32 %v6309_v22, %v6185_v51  ;;  %vm11098_vm2 = vmmov %vm11082_vm0 }
 0x2fe   : > { %v6790_v29 = vadd.f32 %v6789_v60, %v6788_v12  ;;  %v5982_v49 = vadd.f32 %v5981_v3, %v5821_v41  ;;  %v6312_v3 = vld [vmem:[%s7293_s28 + $0x20] sm:$0xff] }
 0x2ff   : > { %6407 = vst.msk [vmem:[%s7299_s12 + $0x18] sm:$0xff] %vm11084_vm3, %v6375_v36  ;;  %v6373_v35 = vmax.f32 %v6341_v53, 0.0  ;;  %vm11099_vm3 = vmmov %vm11082_vm0 }
 0x300   : > { %v5824_v33 = vadd.f32 %v10503_v54, %v6790_v29  ;;  %v6048_v5 = vmax.f32 %v5982_v49, 0.0 }
 0x301   : > { %6405 = vst.msk [vmem:[%s7299_s12 + $0x8] sm:$0xff] %vm11085_vm11, %v6373_v35  ;;  %v6318_v35 = vld [vmem:[%s7293_s28 + $0x50] sm:$0xff]  ;;  %vm11100_vm11 = vmmov %vm11082_vm0 }
 0x302   : > { %v5985_v16 = vadd.f32 %v5984_v10, %v5824_v33  ;;  %v6315_v10 = vld [vmem:[%s7293_s28 + $0x38] sm:$0xff] }
 0x304   : > { %v6049_v46 = vmax.f32 %v5985_v16, 0.0  ;;  %v6316_v16 = vld [vmem:[%s7293_s28 + $0x40] sm:$0xff] }
 0x306   : > { %v6070_v38 = vpack.c.bf16 %v6049_v46, %v6048_v5 }
 0x308   : > { %6917 = vmatprep.mubr.msk.bf16.mxu1 %vm11086_vm4, %v6070_v38  ;;  %v6903_v56 = vpop.f32.mrf.mxu1  ;;  %vm11101_vm4 = vmmov %vm11082_vm0 }
 0x309   : > { %v6206_v15 = vadd.f32 %v6903_v56, %v10578_v17 }
 0x30a   : > { %v6197_v9 = vpop.f32.mrf.mxu1 }
 0x30b   : > { %v6791_v19 = vpop.f32.mrf.mxu0  ;;  %v6346_v32 = vadd.f32 %v6314_v31, %v6206_v15  ;;  %v6198_v57 = vadd.f32 %v10578_v17, %v6197_v9 }
 0x30c   : > { %v6904_v59 = vpop.f32.mrf.mxu1 }
 0x30d   : > { %v6792_v21 = vpop.f32.mrf.mxu0  ;;  %v6378_v43 = vmax.f32 %v6346_v32, 0.0  ;;  %v6344_v24 = vadd.f32 %v6312_v3, %v6198_v57  ;;  %v6209_v47 = vadd.f32 %v6904_v59, %v10578_v17 }
 0x30e   : > { %v6793_v6 = vadd.f32 %v6792_v21, %v6791_v19  ;;  %v6200_v14 = vpop.f32.mrf.mxu1  ;;  %v6317_v19 = vld [vmem:[%s7293_s28 + $0x48] sm:$0xff] }
 0x30f   : > { %v6794_v20 = vpop.f32.mrf.mxu0  ;;  %6410 = vst.msk [vmem:[%s7299_s12 + $0x30] sm:$0xff] %vm11087_vm15, %v6378_v43  ;;  %v6376_v50 = vmax.f32 %v6344_v24, 0.0  ;;  %v6347_v25 = vadd.f32 %v6315_v10, %v6209_v47  ;;  %v6201_v7 = vadd.f32 %v10578_v17, %v6200_v14  ;;  %vm11102_vm15 = vmmov %vm11082_vm0 }
 0x310   : > { %v5829_v45 = vadd.f32 %v10503_v54, %v6793_v6 }
 0x311   : > { %v6795_v1 = vpop.f32.mrf.mxu0  ;;  %6408 = vst.msk [vmem:[%s7299_s12 + $0x20] sm:$0xff] %vm11088_vm9, %v6376_v50  ;;  %v6379_v61 = vmax.f32 %v6347_v25, 0.0  ;;  %v6345_v4 = vadd.f32 %v6313_v2, %v6201_v7  ;;  %vm11103_vm9 = vmmov %vm11082_vm0 }
 0x312   : > { %v6796_v13 = vadd.f32 %v6795_v1, %v6794_v20  ;;  %v5990_v8 = vadd.f32 %v10551_v30, %v5829_v45 }
 0x313   : > { %6411 = vst.msk [vmem:[%s7299_s12 + $0x38] sm:$0xff] %vm11089_vm1, %v6379_v61  ;;  %v6377_v11 = vmax.f32 %v6345_v4, 0.0  ;;  %vm11104_vm1 = vmmov %vm11082_vm0 }
 0x314   : > { %v5832_v27 = vadd.f32 %v10503_v54, %v6796_v13  ;;  %v6050_v23 = vmax.f32 %v5990_v8, 0.0 }
 0x315   : > { %6409 = vst.msk [vmem:[%s7299_s12 + $0x28] sm:$0xff] %vm11090_vm10, %v6377_v11  ;;  %vm11105_vm10 = vmmov %vm11082_vm0 }
 0x316   : > { %v5993_v58 = vadd.f32 %v10554_v40, %v5832_v27 }
 0x318   : > { %v6051_v62 = vmax.f32 %v5993_v58, 0.0 }
 0x31a   : > { %v6071_v44 = vpack.c.bf16 %v6051_v62, %v6050_v23  ;;  %v6322_v23 = vld [vmem:[%s7293_s28 + $0x70] sm:$0xff] }
 0x31c   : > { %6918 = vmatmul.mubr.msk.bf16.gmra.mxu1 %vm11091_vm13, %v6071_v44  ;;  %vm11106_vm13 = vmmov %vm11082_vm0 }
 0x324   : > { %v6797_v18 = vpop.f32.mrf.mxu0 }
 0x326   : > { %v6798_v52 = vpop.f32.mrf.mxu0 }
 0x327   : > { %v6799_v22 = vadd.f32 %v6798_v52, %v6797_v18  ;;  %v6320_v52 = vld [vmem:[%s7293_s28 + $0x60] sm:$0xff] }
 0x328   : > { %v6800_v30 = vpop.f32.mrf.mxu0 }
 0x329   : > { %v5837_v12 = vadd.f32 %v10503_v54, %v6799_v22 }
 0x32a   : > { %v6801_v34 = vpop.f32.mrf.mxu0 }
 0x32b   : > { %v6802_v63 = vadd.f32 %v6801_v34, %v6800_v30  ;;  %v5998_v40 = vadd.f32 %v10559_v26, %v5837_v12 }
 0x32c   : > { %v6907_v29 = vpop.f32.mrf.mxu1 }
 0x32d   : > { %v5840_v51 = vadd.f32 %v10503_v54, %v6802_v63  ;;  %v6052_v60 = vmax.f32 %v5998_v40, 0.0  ;;  %v6222_v49 = vadd.f32 %v6907_v29, %v10578_v17  ;;  %v6323_v63 = vld [vmem:[%s7293_s28 + $0x78] sm:$0xff] }
 0x32e   : > { %v6213_v33 = vpop.f32.mrf.mxu1 }
 0x32f   : > { %v6001_v41 = vadd.f32 %v10563_v28, %v5840_v51  ;;  %v6350_v5 = vadd.f32 %v6318_v35, %v6222_v49  ;;  %v6214_v26 = vadd.f32 %v10578_v17, %v6213_v33  ;;  %v6319_v28 = vld [vmem:[%s7293_s28 + $0x58] sm:$0xff] }
 0x330   : > { %v6908_v46 = vpop.f32.mrf.mxu1 }
 0x331   : > { %v6053_v36 = vmax.f32 %v6001_v41, 0.0  ;;  %v6382_v38 = vmax.f32 %v6350_v5, 0.0  ;;  %v6348_v56 = vadd.f32 %v6316_v16, %v6214_v26  ;;  %v6225_v31 = vadd.f32 %v6908_v46, %v10578_v17 }
 0x332   : > { %v6216_v15 = vpop.f32.mrf.mxu1 }
 0x333   : > { %v6072_v53 = vpack.c.bf16 %v6053_v36, %v6052_v60  ;;  %6414 = vst.msk [vmem:[%s7299_s12 + $0x50] sm:$0xff] %vm11093_vm14, %v6382_v38  ;;  %v6380_v9 = vmax.f32 %v6348_v56, 0.0  ;;  %v6351_v3 = vadd.f32 %v6319_v28, %v6225_v31  ;;  %v6217_v32 = vadd.f32 %v10578_v17, %v6216_v15  ;;  %vm11108_vm14 = vmmov %vm11082_vm0 }
 0x335   : > { %6921 = vmatprep.mubr.msk.bf16.mxu1 %vm11092_vm8, %v6072_v53  ;;  %6412 = vst.msk [vmem:[%s7299_s12 + $0x40] sm:$0xff] %vm11094_vm5, %v6380_v9  ;;  %v6383_v57 = vmax.f32 %v6351_v3, 0.0  ;;  %v6349_v21 = vadd.f32 %v6317_v19, %v6217_v32  ;;  %v6321_v53 = vld [vmem:[%s7293_s28 + $0x68] sm:$0xff]  ;;  %vm11107_vm8 = vmmov %vm11082_vm0 }
 0x336   : > { %vm11109_vm5 = vmmov %vm11082_vm0 }
 0x337   : > { %6415 = vst.msk [vmem:[%s7299_s12 + $0x58] sm:$0xff] %vm11095_vm7, %v6383_v57  ;;  %v6381_v59 = vmax.f32 %v6349_v21, 0.0  ;;  %vm11110_vm7 = vmmov %vm11082_vm0 }
 0x339   : > { %6413 = vst.msk [vmem:[%s7299_s12 + $0x48] sm:$0xff] %vm11096_vm6, %v6381_v59  ;;  %vm11111_vm6 = vmmov %vm11082_vm0 }
 0x341   : > { %v6803_v10 = vpop.f32.mrf.mxu0 }
 0x343   : > { %v6804_v6 = vpop.f32.mrf.mxu0 }
 0x344   : > { %v6805_v43 = vadd.f32 %v6804_v6, %v6803_v10  ;;  %v6326_v10 = vld [vmem:[%s7293_s28 + $0x90] sm:$0xff] }
 0x345   : > { %v6806_v24 = vpop.f32.mrf.mxu0 }
 0x346   : > { %v5845_v47 = vadd.f32 %v10503_v54, %v6805_v43 }
 0x347   : > { %v6807_v20 = vpop.f32.mrf.mxu0 }
 0x348   : > { %v6808_v14 = vadd.f32 %v6807_v20, %v6806_v24  ;;  %v6006_v2 = vadd.f32 %v10557_v42, %v5845_v47  ;;  %v6324_v24 = vld [vmem:[%s7293_s28 + $0x80] sm:$0xff] }
 0x34a   : > { %v5848_v45 = vadd.f32 %v10503_v54, %v6808_v14  ;;  %v6054_v25 = vmax.f32 %v6006_v2, 0.0 }
 0x34c   : > { %v6009_v50 = vadd.f32 %v10561_v0, %v5848_v45 }
 0x34e   : > { %v6055_v7 = vmax.f32 %v6009_v50, 0.0  ;;  %v6325_v50 = vld [vmem:[%s7293_s28 + $0x88] sm:$0xff] }
 0x350   : > { %v6073_v1 = vpack.c.bf16 %v6055_v7, %v6054_v25 }
 0x352   : > { %6922 = vmatmul.mubr.msk.bf16.gmra.mxu1 %vm11097_vm12, %v6073_v1  ;;  %vm11112_vm12 = vmmov %vm11082_vm0 }
 0x367   : > { %v6809_v13 = vpop.f32.mrf.mxu0 }
 0x369   : > { %v6810_v61 = vpop.f32.mrf.mxu0 }
 0x36a   : > { %v6811_v4 = vadd.f32 %v6810_v61, %v6809_v13  ;;  %v6911_v42 = vpop.f32.mrf.mxu1 }
 0x36b   : > { %v6812_v8 = vpop.f32.mrf.mxu0  ;;  %v6238_v62 = vadd.f32 %v6911_v42, %v10578_v17  ;;  %v6328_v42 = vld [vmem:[%s7293_s28 + $0xa0] sm:$0xff] }
 0x36c   : > { %v5853_v27 = vadd.f32 %v10503_v54, %v6811_v4  ;;  %v6229_v18 = vpop.f32.mrf.mxu1 }
 0x36d   : > { %v6813_v11 = vpop.f32.mrf.mxu0  ;;  %v6354_v22 = vadd.f32 %v6322_v23, %v6238_v62  ;;  %v6230_v30 = vadd.f32 %v10578_v17, %v6229_v18 }
 0x36e   : > { %v6814_v58 = vadd.f32 %v6813_v11, %v6812_v8  ;;  %v6014_v0 = vadd.f32 %v10567_v37, %v5853_v27  ;;  %v6912_v34 = vpop.f32.mrf.mxu1  ;;  %v6330_v27 = vld [vmem:[%s7293_s28 + $0xb0] sm:$0xff] }
 0x36f   : > { %v6386_v40 = vmax.f32 %v6354_v22, 0.0  ;;  %v6352_v51 = vadd.f32 %v6320_v52, %v6230_v30  ;;  %v6241_v41 = vadd.f32 %v6912_v34, %v10578_v17 }
 0x370   : > { %v5856_v44 = vadd.f32 %v10503_v54, %v6814_v58  ;;  %v6056_v37 = vmax.f32 %v6014_v0, 0.0  ;;  %v6232_v36 = vpop.f32.mrf.mxu1 }
 0x371   : > { %6418 = vst.msk [vmem:[%s7299_s12 + $0x70] sm:$0xff] %vm11082_vm0, %v6386_v40  ;;  %v6384_v29 = vmax.f32 %v6352_v51, 0.0  ;;  %v6355_v35 = vadd.f32 %v6323_v63, %v6241_v41  ;;  %v6233_v49 = vadd.f32 %v10578_v17, %v6232_v36  ;;  %v6334_v36 = vld [vmem:[%s7293_s28 + $0xd0] sm:$0xff] }
 0x372   : > { %v6017_v12 = vadd.f32 %v10573_v48, %v5856_v44  ;;  %v6331_v44 = vld [vmem:[%s7293_s28 + $0xb8] sm:$0xff] }
 0x373   : > { %6416 = vst.msk [vmem:[%s7299_s12 + $0x60] sm:$0xff] %vm11098_vm2, %v6384_v29  ;;  %v6387_v48 = vmax.f32 %v6355_v35, 0.0  ;;  %v6353_v16 = vadd.f32 %v6321_v53, %v6233_v49  ;;  %v6332_v35 = vld [vmem:[%s7293_s28 + $0xc0] sm:$0xff]  ;;  %vm11113_vm2 = vmmov %vm11082_vm0 }
 0x374   : > { %v6057_v60 = vmax.f32 %v6017_v12, 0.0  ;;  %v6329_v12 = vld [vmem:[%s7293_s28 + $0xa8] sm:$0xff] }
 0x375   : > { %6419 = vst.msk [vmem:[%s7299_s12 + $0x78] sm:$0xff] %vm11100_vm11, %v6387_v48  ;;  %v6385_v5 = vmax.f32 %v6353_v16, 0.0  ;;  %v6335_v16 = vld [vmem:[%s7293_s28 + $0xd8] sm:$0xff]  ;;  %vm11115_vm11 = vmmov %vm11082_vm0 }
 0x376   : > { %v6074_v33 = vpack.c.bf16 %v6057_v60, %v6056_v37 }
 0x377   : > { %6417 = vst.msk [vmem:[%s7299_s12 + $0x68] sm:$0xff] %vm11101_vm4, %v6385_v5  ;;  %vm11116_vm4 = vmmov %vm11082_vm0 }
 0x378   : > { %6925 = vmatprep.mubr.msk.bf16.mxu1 %vm11099_vm3, %v6074_v33  ;;  %vm11114_vm3 = vmmov %vm11082_vm0 }
 0x380   : > { %v6815_v26 = vpop.f32.mrf.mxu0 }
 0x382   : > { %v6816_v46 = vpop.f32.mrf.mxu0 }
 0x383   : > { %v6817_v28 = vadd.f32 %v6816_v46, %v6815_v26 }
 0x384   : > { %v6818_v38 = vpop.f32.mrf.mxu0 }
 0x385   : > { %v5861_v56 = vadd.f32 %v10503_v54, %v6817_v28 }
 0x386   : > { %v6819_v31 = vpop.f32.mrf.mxu0 }
 0x387   : > { %v6820_v15 = vadd.f32 %v6819_v31, %v6818_v38  ;;  %v6022_v19 = vadd.f32 %v10565_v55, %v5861_v56  ;;  %v6333_v38 = vld [vmem:[%s7293_s28 + $0xc8] sm:$0xff] }
 0x389   : > { %v5864_v9 = vadd.f32 %v10503_v54, %v6820_v15  ;;  %v6058_v32 = vmax.f32 %v6022_v19, 0.0 }
 0x38b   : > { %v6025_v3 = vadd.f32 %v10570_v39, %v5864_v9  ;;  %v6327_v39 = vld [vmem:[%s7293_s28 + $0x98] sm:$0xff] }
 0x38d   : > { %v6059_v57 = vmax.f32 %v6025_v3, 0.0 }
 0x38f   : > { %v6075_v21 = vpack.c.bf16 %v6059_v57, %v6058_v32  ;;  %v6338_v57 = vld [vmem:[%s7293_s28 + $0xf0] sm:$0xff] }
 0x391   : > { %6926 = vmatmul.mubr.msk.bf16.gmra.mxu1 %vm11102_vm15, %v6075_v21  ;;  %vm11117_vm15 = vmmov %vm11082_vm0 }
 0x3b5   : > { %v6915_v59 = vpop.f32.mrf.mxu1 }
 0x3b6   : > { %v6254_v6 = vadd.f32 %v6915_v59, %v10578_v17 }
 0x3b7   : > { %v6245_v43 = vpop.f32.mrf.mxu1 }
 0x3b8   : > { %v6358_v47 = vadd.f32 %v6326_v10, %v6254_v6  ;;  %v6246_v54 = vadd.f32 %v10578_v17, %v6245_v43  ;;  %v6336_v10 = vld [vmem:[%s7293_s28 + $0xe0] sm:$0xff] }
 0x3b9   : > { %v6916_v55 = vpop.f32.mrf.mxu1 }
 0x3ba   : > { %v6390_v20 = vmax.f32 %v6358_v47, 0.0  ;;  %v6356_v14 = vadd.f32 %v6324_v24, %v6246_v54  ;;  %v6257_v2 = vadd.f32 %v6916_v55, %v10578_v17  ;;  %v6339_v47 = vld [vmem:[%s7293_s28 + $0xf8] sm:$0xff] }
 0x3bb   : > { %v6248_v45 = vpop.f32.mrf.mxu1 }
 0x3bc   : > { %6422 = vst.msk [vmem:[%s7299_s12 + $0x90] sm:$0xff] %vm11103_vm9, %v6390_v20  ;;  %v6388_v25 = vmax.f32 %v6356_v14, 0.0  ;;  %v6359_v7 = vadd.f32 %v6327_v39, %v6257_v2  ;;  %v6249_v1 = vadd.f32 %v10578_v17, %v6248_v45  ;;  %v6337_v14 = vld [vmem:[%s7293_s28 + $0xe8] sm:$0xff]  ;;  %s7084_s28 = scalar_lea.vmem %s10740_s10, 4096 }
 0x3bd   : > { %p7085_p12 = scmp.ne.s32.totalorder %s10740_s10, %s7084_s28  ;;  %p7092_p8 = scmp.lt.s32.totalorder %s7090_s16, %s7084_s28 }
 0x3be   : > { %6420 = vst.msk [vmem:[%s7299_s12 + $0x80] sm:$0xff] %vm11104_vm1, %v6388_v25  ;;  %v6391_v13 = vmax.f32 %v6359_v7, 0.0  ;;  %v6357_v61 = vadd.f32 %v6325_v50, %v6249_v1 }
 0x3bf   : > { %p7086_p4 = pnand %p7085_p12, %p11118_p13  ;;  %p7093_p10 = por %p7092_p8, %p7091_p7 }
 0x3c0   : > { %6423 = vst.msk [vmem:[%s7299_s12 + $0x98] sm:$0xff] %vm11105_vm10, %v6391_v13  ;;  %v6389_v4 = vmax.f32 %v6357_v61, 0.0 }
 0x3c1   : > { %p7087_p5 = pneg %p7086_p4 }
 0x3c2   : > { %6421 = vst.msk [vmem:[%s7299_s12 + $0x88] sm:$0xff] %vm11106_vm13, %v6389_v4 }
 0x3c3   : > { %p7094_p0 = pnand %p7093_p10, %p7087_p5 }
 0x3dc   : > { %v6919_v8 = vpop.f32.mrf.mxu1 }
 0x3dd   : > { %v6270_v11 = vadd.f32 %v6919_v8, %v10578_v17 }
 0x3de   : > { %v6261_v58 = vpop.f32.mrf.mxu1 }
 0x3df   : > { %v6362_v23 = vadd.f32 %v6330_v27, %v6270_v11  ;;  %v6262_v62 = vadd.f32 %v10578_v17, %v6261_v58 }
 0x3e0   : > { %v6920_v0 = vpop.f32.mrf.mxu1 }
 0x3e1   : > { %v6394_v18 = vmax.f32 %v6362_v23, 0.0  ;;  %v6360_v52 = vadd.f32 %v6328_v42, %v6262_v62  ;;  %v6273_v22 = vadd.f32 %v6920_v0, %v10578_v17 }
 0x3e2   : > { %v6264_v30 = vpop.f32.mrf.mxu1 }
 0x3e3   : > { %6426 = vst.msk [vmem:[%s7299_s12 + $0xb0] sm:$0xff] %vm11107_vm8, %v6394_v18  ;;  %v6392_v34 = vmax.f32 %v6360_v52, 0.0  ;;  %v6363_v63 = vadd.f32 %v6331_v44, %v6273_v22  ;;  %v6265_v40 = vadd.f32 %v10578_v17, %v6264_v30 }
 0x3e5   : > { %6424 = vst.msk [vmem:[%s7299_s12 + $0xa0] sm:$0xff] %vm11108_vm14, %v6392_v34  ;;  %v6395_v51 = vmax.f32 %v6363_v63, 0.0  ;;  %v6361_v41 = vadd.f32 %v6329_v12, %v6265_v40 }
 0x3e7   : > { %6427 = vst.msk [vmem:[%s7299_s12 + $0xb8] sm:$0xff] %vm11109_vm5, %v6395_v51  ;;  %v6393_v37 = vmax.f32 %v6361_v41, 0.0 }
 0x3e9   : > { %6425 = vst.msk [vmem:[%s7299_s12 + $0xa8] sm:$0xff] %vm11110_vm7, %v6393_v37 }
 0x412   : > { %v6923_v60 = vpop.f32.mrf.mxu1 }
 0x413   : > { %v6286_v53 = vadd.f32 %v6923_v60, %v10578_v17 }
 0x414   : > { %v6277_v29 = vpop.f32.mrf.mxu1 }
 0x415   : > { %v6366_v49 = vadd.f32 %v6334_v36, %v6286_v53  ;;  %v6278_v33 = vadd.f32 %v10578_v17, %v6277_v29 }
 0x416   : > { %v6924_v48 = vpop.f32.mrf.mxu1 }
 0x417   : > { %v6398_v5 = vmax.f32 %v6366_v49, 0.0  ;;  %v6364_v26 = vadd.f32 %v6332_v35, %v6278_v33  ;;  %v6289_v46 = vadd.f32 %v6924_v48, %v10578_v17 }
 0x418   : > { %v6280_v28 = vpop.f32.mrf.mxu1 }
 0x419   : > { %6430 = vst.msk [vmem:[%s7299_s12 + $0xd0] sm:$0xff] %vm11111_vm6, %v6398_v5  ;;  %v6396_v56 = vmax.f32 %v6364_v26, 0.0  ;;  %v6367_v31 = vadd.f32 %v6335_v16, %v6289_v46  ;;  %v6281_v15 = vadd.f32 %v10578_v17, %v6280_v28 }
 0x41b   : > { %6428 = vst.msk [vmem:[%s7299_s12 + $0xc0] sm:$0xff] %vm11112_vm12, %v6396_v56  ;;  %v6399_v19 = vmax.f32 %v6367_v31, 0.0  ;;  %v6365_v9 = vadd.f32 %v6333_v38, %v6281_v15 }
 0x41d   : > { %6431 = vst.msk [vmem:[%s7299_s12 + $0xd8] sm:$0xff] %vm11082_vm0, %v6399_v19  ;;  %v6397_v3 = vmax.f32 %v6365_v9, 0.0 }
 0x41f   : > { %6429 = vst.msk [vmem:[%s7299_s12 + $0xc8] sm:$0xff] %vm11113_vm2, %v6397_v3 }
 0x451   : > { %v6927_v32 = vpop.f32.mrf.mxu1 }
 0x452   : > { %v6302_v21 = vadd.f32 %v6927_v32, %v10578_v17 }
 0x453   : > { %v6293_v59 = vpop.f32.mrf.mxu1 }
 0x454   : > { %v6370_v6 = vadd.f32 %v6338_v57, %v6302_v21  ;;  %v6294_v43 = vadd.f32 %v10578_v17, %v6293_v59 }
 0x455   : > { %v6928_v24 = vpop.f32.mrf.mxu1 }
 0x456   : > { %v6402_v54 = vmax.f32 %v6370_v6, 0.0  ;;  %v6368_v55 = vadd.f32 %v6336_v10, %v6294_v43  ;;  %v6305_v39 = vadd.f32 %v6928_v24, %v10578_v17 }
 0x457   : > { %v6296_v20 = vpop.f32.mrf.mxu1 }
 0x458   : > { %6434 = vst.msk [vmem:[%s7299_s12 + $0xf0] sm:$0xff] %vm11114_vm3, %v6402_v54  ;;  %v6400_v2 = vmax.f32 %v6368_v55, 0.0  ;;  %v6371_v45 = vadd.f32 %v6339_v47, %v6305_v39  ;;  %v6297_v50 = vadd.f32 %v10578_v17, %v6296_v20 }
 0x45a   : > { %6432 = vst.msk [vmem:[%s7299_s12 + $0xe0] sm:$0xff] %vm11115_vm11, %v6400_v2  ;;  %v6403_v25 = vmax.f32 %v6371_v45, 0.0  ;;  %v6369_v7 = vadd.f32 %v6337_v14, %v6297_v50 }
 0x45c   : > { %6435 = vst.msk [vmem:[%s7299_s12 + $0xf8] sm:$0xff] %vm11116_vm4, %v6403_v25  ;;  %v6401_v1 = vmax.f32 %v6369_v7, 0.0 }
 0x45e   : > { %6433 = vst.msk [vmem:[%s7299_s12 + $0xe8] sm:$0xff] %vm11117_vm15, %v6401_v1 }
 0x45f   : > { %7097 = shalt.err (!%p7094_p0)
}
 0x460   : > { %s7098_s12 = scalar_lea.hbm %s10738_s17, 4096  ;;  %s7102_s14 = scalar_lea.hbm %s10792_s5, 8192 }
 0x461   : > { %p7099_p2 = scmp.ne.s32.totalorder %s10738_s17, %s7098_s12  ;;  %p7103_p3 = scmp.lt.s32.totalorder %s10738_s17, %s10792_s5 }
 0x462   : > { %p7104_p6 = scmp.lt.s32.totalorder %s7102_s14, %s7098_s12 }
 0x463   : > { %p7100_p9 = pnand %p7099_p2, %p11118_p13 }
 0x464   : > { %p7105_p11 = por %p7104_p6, %p7103_p3 }
 0x465   : > { %p7101_p1 = pneg %p7100_p9 }
 0x467   : > { %p7106_p12 = pnand %p7105_p11, %p7101_p1 }
 0x469   : > { %7109 = shalt.err (!%p7106_p12)
}
 0x46a   : > { %s7160_s9 = smov 128   ;;  %s7161_s11 = smov 8  }
 0x46b   : > { %6931 = dma.vmem_to_hbm [thread:$0]  (%p11118_p13), %s10740_s10, 4096, %s10738_s17, %s6437_s22, %s7160_s9, %s7160_s9, %s7161_s11  }
 0x46c PF: > { %s6465_s13 = sand.u32 1, %s7136_s18   ;;  %p11119_p4 = scmp.ne.s32.totalorder %s10804_s6, 0 }
 0x46d   : > { %p11120_p5 = scmp.ge.s32.totalorder %s7148_s21, 2  ;;  %s6466_s28 = scalar_lea.sflag [#allocation6], %s6465_s13 }
 0x46f   : > { %p6938_p7 = pnand %p11120_p5, %p11119_p4 }
 0x471   : > { %p6939_p8 = pneg %p6938_p7 }
 0x473   : > { %7131 = dma.done.wait (%p6939_p8), %s6466_s28, 4096  }
 0x474   : > { %7133 = vsyncadd (%p6939_p8), %s6466_s28, 4294963200  ;;  %p18_p10 = scmp.ge.s32.totalorder %s7217_s24, 4   ;;  %s11121_s18 = smov %s7140_s19 }
 0x475   : > { %s11122_s19 = smov %s7144_s20  ;;  %s11123_s20 = smov %s7229_s27 }
 0x476   : > { %s11124_s21 = smov %s7217_s24  ;;  %20 = sbr.rel (!%p18_p10) target bundleno = 5 (0x5), region = 89 }
 0x47b   :  { %6471 = vsyncpa [#allocation5], 1 }
 0x47c   :  { %6473 = vsyncpa [#allocation5 + $0x1], 1 }
 0x47d   :  { %6474 = vsyncpa [#allocation6], 1 }
 0x47e   :  { %6476 = vsyncpa [#allocation6 + $0x1], 1 }

</bundles_post_ra>
